<compile_context>
chip_gen: v5e
topology: v5e:2x2
jax: 0.10.0
libtpu: 0.0.40
codegen_flags: <defaults>
</compile_context>

<pallas_src>
import jax
import jax.numpy as jnp
import numpy as np
from jax.experimental import pallas as pl
from jax.experimental.pallas import tpu as pltpu

EPS = 1e-5  # nn.BatchNorm2d default


# ---------------------------------------------------------------------------
# Fused Pallas kernel: conv1+BN+ReLU+pool -> conv2+BN+ReLU+pool, per batch elem
# ---------------------------------------------------------------------------
def _pool_selectors(n_in, n_out, dtype):
    """Selection matrices for MaxPool(kernel=(1,2), stride=2) as matmuls.

    even[w, j] = 1 iff w == 2j, odd[w, j] = 1 iff w == 2j+1.
    y @ even / y @ odd pick the even/odd conv positions; their elementwise max
    (then max with 0 for ReLU) is the pooled output.  An odd n_in is floored,
    matching PyTorch MaxPool2d.
    """
    rows = jax.lax.broadcasted_iota(jnp.int32, (n_in, n_out), 0)
    cols = jax.lax.broadcasted_iota(jnp.int32, (n_in, n_out), 1)
    even = (rows == 2 * cols).astype(dtype)
    odd = (rows == 2 * cols + 1).astype(dtype)
    return even, odd


def _act_fused_kernel(x_ref, w1_ref, t1_ref, w2_ref, t2_ref, out_ref):
    # x_ref:   (1, Cin, W)   one batch element (width on lanes)
    # w1_ref:  (K, C1, Cin)  conv1 weights with BN scale folded in
    # t1_ref:  (C1, 1)       conv1 bias + BN shift
    # w2_ref:  (K, C2, C1)   conv2 weights with BN scale folded in
    # t2_ref:  (C2, 1)
    # out_ref: (1, C2, W2p)
    K = w1_ref.shape[0]
    C1 = w1_ref.shape[1]
    C2 = w2_ref.shape[1]
    W = x_ref.shape[2]
    Wout1 = W - K + 1
    W1p = Wout1 // 2
    Wout2 = W1p - K + 1
    W2p = Wout2 // 2

    x = x_ref[0]  # (Cin, W)

    # --- layer 1: conv as K tap matmuls, f32 accumulation --------------------
    y1 = jnp.zeros((C1, Wout1), jnp.float32)
    for k in range(K):  # static, unrolled
        y1 = y1 + jnp.dot(w1_ref[k], x[:, k:k + Wout1],
                          preferred_element_type=jnp.float32)
    y1 = y1 + t1_ref[...]  # (C1,1) broadcast over lanes (BN shift incl. bias)

    # --- ReLU + MaxPool(1,2)/2 -----------------------------------------------
    e1, o1 = _pool_selectors(Wout1, W1p, y1.dtype)
    a1 = jnp.maximum(
        jnp.maximum(jnp.dot(y1, e1, preferred_element_type=jnp.float32),
                    jnp.dot(y1, o1, preferred_element_type=jnp.float32)),
        0.0)                                   # (C1, W1p)
    a1 = a1.astype(w2_ref.dtype)

    # --- layer 2 --------------------------------------------------------------
    y2 = jnp.zeros((C2, Wout2), jnp.float32)
    for k in range(K):
        y2 = y2 + jnp.dot(w2_ref[k], a1[:, k:k + Wout2],
                          preferred_element_type=jnp.float32)
    y2 = y2 + t2_ref[...]

    e2, o2 = _pool_selectors(Wout2, W2p, y2.dtype)
    a2 = jnp.maximum(
        jnp.maximum(jnp.dot(y2, e2, preferred_element_type=jnp.float32),
                    jnp.dot(y2, o2, preferred_element_type=jnp.float32)),
        0.0)                                   # (C2, W2p)

    out_ref[0] = a2.astype(out_ref.dtype)


# ---------------------------------------------------------------------------
# Parameter folding + wrapper
# ---------------------------------------------------------------------------
def _fold_layer_params(weight, bias, gamma, beta, mean, var, dtype):
    """Fold eval-mode BN into the conv: returns (K, Cout, Cin) weights, (Cout,1) shift."""
    Cout, Cin, _, K = weight.shape          # PyTorch OIHW, H == 1
    inv_std = 1.0 / jnp.sqrt(var + EPS)
    scale = gamma * inv_std                 # (Cout,)
    w = (weight[:, :, 0, :] * scale[:, None, None]).transpose(2, 0, 1)  # (K,Cout,Cin)
    shift = beta + (bias - mean) * scale    # (Cout,)
    return w.astype(dtype), shift.reshape(Cout, 1).astype(jnp.float32)


def act_network_forward(x_nchw, p, *, compute_dtype=jnp.float32):
    B, Cin, H, W = x_nchw.shape
    assert H == 1
    K = p['w1'].shape[-1]

    w1, t1 = _fold_layer_params(p['w1'], p['b1'], p['g1'], p['be1'], p['m1'], p['v1'],
                                compute_dtype)
    w2, t2 = _fold_layer_params(p['w2'], p['b2'], p['g2'], p['be2'], p['m2'], p['v2'],
                                compute_dtype)
    C1 = w1.shape[1]
    C2 = w2.shape[1]
    Wout1 = W - K + 1
    W1p = Wout1 // 2
    Wout2 = W1p - K + 1
    W2p = Wout2 // 2

    x = x_nchw.reshape(B, Cin, W).astype(compute_dtype)

    out = pl.pallas_call(
        _act_fused_kernel,
        out_shape=jax.ShapeDtypeStruct((B, C2, W2p), jnp.float32),
        grid=(B,),
        in_specs=[
            pl.BlockSpec((1, Cin, W), lambda b: (b, 0, 0)),    # input (per batch)
            pl.BlockSpec((K, C1, Cin), lambda b: (0, 0, 0)),   # folded conv1 weights
            pl.BlockSpec((C1, 1), lambda b: (0, 0)),           # conv1 shift
            pl.BlockSpec((K, C2, C1), lambda b: (0, 0, 0)),    # folded conv2 weights
            pl.BlockSpec((C2, 1), lambda b: (0, 0)),           # conv2 shift
        ],
        out_specs=pl.BlockSpec((1, C2, W2p), lambda b: (b, 0, 0)),
        compiler_params=pltpu.CompilerParams(
            dimension_semantics=("parallel",)),                # megacore over batch
    )(x, w1, t1, w2, t2)

    # PyTorch x.view(B, -1) on NCHW == channel-major flatten; out is already
    # [B, C2, W2p] so this is a contiguous (free) reshape.
    return out.reshape(B, C2 * W2p)


# ---------------------------------------------------------------------------
# Pure-JAX reference (for correctness check)
# ---------------------------------------------------------------------------
def reference_forward(x, p):
    def block(x, w, b, g, be, m, v):
        y = jax.lax.conv_general_dilated(
            x, w, window_strides=(1, 1), padding='VALID',
            dimension_numbers=('NCHW', 'OIHW', 'NCHW'))
        y = y + b[None, :, None, None]
        inv = 1.0 / jnp.sqrt(v + EPS)
        y = g[None, :, None, None] * (y - m[None, :, None, None]) * inv[None, :, None, None] \
            + be[None, :, None, None]
        y = jnp.maximum(y, 0.0)
        Bb, C, Hh, Ww = y.shape
        y = y[:, :, :, :2 * (Ww // 2)]
        y = y.reshape(Bb, C, Hh, Ww // 2, 2).max(axis=-1)   # MaxPool (1,2)/2, H==1
        return y

    y = block(x, p['w1'], p['b1'], p['g1'], p['be1'], p['m1'], p['v1'])
    y = block(y, p['w2'], p['b2'], p['g2'], p['be2'], p['m2'], p['v2'])
    return y.reshape(y.shape[0], -1)


# ---------------------------------------------------------------------------
if __name__ == "__main__":
    key = jax.random.PRNGKey(0)
    ks = jax.random.split(key, 16)

    # uci_har: in_channels=570, kernel (1, 9); small batch / width for the demo
    B, Cin, H, W = 2, 570, 1, 32
    x = jax.random.normal(ks[0], (B, Cin, H, W), jnp.float32)

    params = {
        'w1': 0.05 * jax.random.normal(ks[1], (16, Cin, 1, 9), jnp.float32),
        'b1': 0.05 * jax.random.normal(ks[2], (16,), jnp.float32),
        'g1': 1.0 + 0.1 * jax.random.normal(ks[3], (16,), jnp.float32),
        'be1': 0.1 * jax.random.normal(ks[4], (16,), jnp.float32),
        'm1': 0.1 * jax.random.normal(ks[5], (16,), jnp.float32),
        'v1': 1.0 + 0.1 * jnp.abs(jax.random.normal(ks[6], (16,), jnp.float32)),
        'w2': 0.05 * jax.random.normal(ks[7], (32, 16, 1, 9), jnp.float32),
        'b2': 0.05 * jax.random.normal(ks[8], (32,), jnp.float32),
        'g2': 1.0 + 0.1 * jax.random.normal(ks[9], (32,), jnp.float32),
        'be2': 0.1 * jax.random.normal(ks[10], (32,), jnp.float32),
        'm2': 0.1 * jax.random.normal(ks[11], (32,), jnp.float32),
        'v2': 1.0 + 0.1 * jnp.abs(jax.random.normal(ks[12], (32,), jnp.float32)),
    }

    fwd = jax.jit(act_network_forward)
    out = jax.block_until_ready(fwd(x, params))
    ref = jax.block_until_ready(reference_forward(x, params))

    assert out.shape == ref.shape, (out.shape, ref.shape)
    np.testing.assert_allclose(np.asarray(out), np.asarray(ref), rtol=2e-3, atol=2e-3)

    # TODO(synk): training-mode BatchNorm (batch statistics + running-stat update)
    # has no single-forward Pallas equivalent here; eval-mode BN is implemented.
    # bf16 matmul inputs are available via act_network_forward(..., compute_dtype=jnp.bfloat16).
    print("KERNEL_OK")
</pallas_src>

<mosaic_0001>
module attributes {stable_mosaic.version = 11 : i64} {
  func.func @_act_fused_kernel(%arg0: i32, %arg1: memref<1x570x32xf32, #tpu.memory_space<vmem>>, %arg2: memref<9x16x570xf32, #tpu.memory_space<vmem>>, %arg3: memref<16x1xf32, #tpu.memory_space<vmem>>, %arg4: memref<9x32x16xf32, #tpu.memory_space<vmem>>, %arg5: memref<32x1xf32, #tpu.memory_space<vmem>>, %arg6: memref<1x32x2xf32, #tpu.memory_space<vmem>>) attributes {dimension_semantics = [#tpu.dimension_semantics<parallel>], iteration_bounds = array<i64: 2>, scalar_prefetch = 0 : i64, scratch_operands = 0 : i64, tpu.core_type = #tpu.core_type<tc>, window_params = [{transform_indices = @transform_0, window_bounds = array<i64: 1, 570, 32>}, {pipeline_mode = #tpu.pipeline_mode<synchronous>, transform_indices = @transform_1, window_bounds = array<i64: 9, 16, 570>}, {pipeline_mode = #tpu.pipeline_mode<synchronous>, transform_indices = @transform_2, window_bounds = array<i64: 16, 1>}, {pipeline_mode = #tpu.pipeline_mode<synchronous>, transform_indices = @transform_3, window_bounds = array<i64: 9, 32, 16>}, {pipeline_mode = #tpu.pipeline_mode<synchronous>, transform_indices = @transform_4, window_bounds = array<i64: 32, 1>}, {transform_indices = @transform_5, window_bounds = array<i64: 1, 32, 2>}]} {
    %c0 = arith.constant 0 : index
    %c0_0 = arith.constant 0 : index
    %c0_1 = arith.constant 0 : index
    %0 = vector.load %arg1[%c0, %c0_0, %c0_1] : memref<1x570x32xf32, #tpu.memory_space<vmem>>, vector<1x570x32xf32>
    %1 = vector.shape_cast %0 : vector<1x570x32xf32> to vector<570x32xf32>
    %cst = arith.constant 0.000000e+00 : f32
    %2 = vector.broadcast %cst : f32 to vector<16x24xf32>
    %c0_2 = arith.constant 0 : index
    %c0_3 = arith.constant 0 : index
    %c0_4 = arith.constant 0 : index
    %3 = vector.load %arg2[%c0_2, %c0_3, %c0_4] : memref<9x16x570xf32, #tpu.memory_space<vmem>>, vector<1x16x570xf32>
    %4 = vector.shape_cast %3 : vector<1x16x570xf32> to vector<16x570xf32>
    %5 = vector.extract_strided_slice %1 {offsets = [0, 0], sizes = [570, 24], strides = [1, 1]} : vector<570x32xf32> to vector<570x24xf32>
    %cst_5 = arith.constant dense<0.000000e+00> : vector<16x24xf32>
    %6 = tpu.matmul %4, %5, %cst_5 {dimension_numbers = #tpu.dot_dimension_numbers<[1], [0], [0], [1], [0, 0, 1, 1], [], []>} : vector<16x570xf32>, vector<570x24xf32>, vector<16x24xf32> -> vector<16x24xf32>
    %7 = arith.addf %2, %6 : vector<16x24xf32>
    %c1 = arith.constant 1 : index
    %c0_6 = arith.constant 0 : index
    %c0_7 = arith.constant 0 : index
    %8 = vector.load %arg2[%c1, %c0_6, %c0_7] : memref<9x16x570xf32, #tpu.memory_space<vmem>>, vector<1x16x570xf32>
    %9 = vector.shape_cast %8 : vector<1x16x570xf32> to vector<16x570xf32>
    %10 = vector.extract_strided_slice %1 {offsets = [0, 1], sizes = [570, 24], strides = [1, 1]} : vector<570x32xf32> to vector<570x24xf32>
    %cst_8 = arith.constant dense<0.000000e+00> : vector<16x24xf32>
    %11 = tpu.matmul %9, %10, %cst_8 {dimension_numbers = #tpu.dot_dimension_numbers<[1], [0], [0], [1], [0, 0, 1, 1], [], []>} : vector<16x570xf32>, vector<570x24xf32>, vector<16x24xf32> -> vector<16x24xf32>
    %12 = arith.addf %7, %11 : vector<16x24xf32>
    %c2 = arith.constant 2 : index
    %c0_9 = arith.constant 0 : index
    %c0_10 = arith.constant 0 : index
    %13 = vector.load %arg2[%c2, %c0_9, %c0_10] : memref<9x16x570xf32, #tpu.memory_space<vmem>>, vector<1x16x570xf32>
    %14 = vector.shape_cast %13 : vector<1x16x570xf32> to vector<16x570xf32>
    %15 = vector.extract_strided_slice %1 {offsets = [0, 2], sizes = [570, 24], strides = [1, 1]} : vector<570x32xf32> to vector<570x24xf32>
    %cst_11 = arith.constant dense<0.000000e+00> : vector<16x24xf32>
    %16 = tpu.matmul %14, %15, %cst_11 {dimension_numbers = #tpu.dot_dimension_numbers<[1], [0], [0], [1], [0, 0, 1, 1], [], []>} : vector<16x570xf32>, vector<570x24xf32>, vector<16x24xf32> -> vector<16x24xf32>
    %17 = arith.addf %12, %16 : vector<16x24xf32>
    %c3 = arith.constant 3 : index
    %c0_12 = arith.constant 0 : index
    %c0_13 = arith.constant 0 : index
    %18 = vector.load %arg2[%c3, %c0_12, %c0_13] : memref<9x16x570xf32, #tpu.memory_space<vmem>>, vector<1x16x570xf32>
    %19 = vector.shape_cast %18 : vector<1x16x570xf32> to vector<16x570xf32>
    %20 = vector.extract_strided_slice %1 {offsets = [0, 3], sizes = [570, 24], strides = [1, 1]} : vector<570x32xf32> to vector<570x24xf32>
    %cst_14 = arith.constant dense<0.000000e+00> : vector<16x24xf32>
    %21 = tpu.matmul %19, %20, %cst_14 {dimension_numbers = #tpu.dot_dimension_numbers<[1], [0], [0], [1], [0, 0, 1, 1], [], []>} : vector<16x570xf32>, vector<570x24xf32>, vector<16x24xf32> -> vector<16x24xf32>
    %22 = arith.addf %17, %21 : vector<16x24xf32>
    %c4 = arith.constant 4 : index
    %c0_15 = arith.constant 0 : index
    %c0_16 = arith.constant 0 : index
    %23 = vector.load %arg2[%c4, %c0_15, %c0_16] : memref<9x16x570xf32, #tpu.memory_space<vmem>>, vector<1x16x570xf32>
    %24 = vector.shape_cast %23 : vector<1x16x570xf32> to vector<16x570xf32>
    %25 = vector.extract_strided_slice %1 {offsets = [0, 4], sizes = [570, 24], strides = [1, 1]} : vector<570x32xf32> to vector<570x24xf32>
    %cst_17 = arith.constant dense<0.000000e+00> : vector<16x24xf32>
    %26 = tpu.matmul %24, %25, %cst_17 {dimension_numbers = #tpu.dot_dimension_numbers<[1], [0], [0], [1], [0, 0, 1, 1], [], []>} : vector<16x570xf32>, vector<570x24xf32>, vector<16x24xf32> -> vector<16x24xf32>
    %27 = arith.addf %22, %26 : vector<16x24xf32>
    %c5 = arith.constant 5 : index
    %c0_18 = arith.constant 0 : index
    %c0_19 = arith.constant 0 : index
    %28 = vector.load %arg2[%c5, %c0_18, %c0_19] : memref<9x16x570xf32, #tpu.memory_space<vmem>>, vector<1x16x570xf32>
    %29 = vector.shape_cast %28 : vector<1x16x570xf32> to vector<16x570xf32>
    %30 = vector.extract_strided_slice %1 {offsets = [0, 5], sizes = [570, 24], strides = [1, 1]} : vector<570x32xf32> to vector<570x24xf32>
    %cst_20 = arith.constant dense<0.000000e+00> : vector<16x24xf32>
    %31 = tpu.matmul %29, %30, %cst_20 {dimension_numbers = #tpu.dot_dimension_numbers<[1], [0], [0], [1], [0, 0, 1, 1], [], []>} : vector<16x570xf32>, vector<570x24xf32>, vector<16x24xf32> -> vector<16x24xf32>
    %32 = arith.addf %27, %31 : vector<16x24xf32>
    %c6 = arith.constant 6 : index
    %c0_21 = arith.constant 0 : index
    %c0_22 = arith.constant 0 : index
    %33 = vector.load %arg2[%c6, %c0_21, %c0_22] : memref<9x16x570xf32, #tpu.memory_space<vmem>>, vector<1x16x570xf32>
    %34 = vector.shape_cast %33 : vector<1x16x570xf32> to vector<16x570xf32>
    %35 = vector.extract_strided_slice %1 {offsets = [0, 6], sizes = [570, 24], strides = [1, 1]} : vector<570x32xf32> to vector<570x24xf32>
    %cst_23 = arith.constant dense<0.000000e+00> : vector<16x24xf32>
    %36 = tpu.matmul %34, %35, %cst_23 {dimension_numbers = #tpu.dot_dimension_numbers<[1], [0], [0], [1], [0, 0, 1, 1], [], []>} : vector<16x570xf32>, vector<570x24xf32>, vector<16x24xf32> -> vector<16x24xf32>
    %37 = arith.addf %32, %36 : vector<16x24xf32>
    %c7 = arith.constant 7 : index
    %c0_24 = arith.constant 0 : index
    %c0_25 = arith.constant 0 : index
    %38 = vector.load %arg2[%c7, %c0_24, %c0_25] : memref<9x16x570xf32, #tpu.memory_space<vmem>>, vector<1x16x570xf32>
    %39 = vector.shape_cast %38 : vector<1x16x570xf32> to vector<16x570xf32>
    %40 = vector.extract_strided_slice %1 {offsets = [0, 7], sizes = [570, 24], strides = [1, 1]} : vector<570x32xf32> to vector<570x24xf32>
    %cst_26 = arith.constant dense<0.000000e+00> : vector<16x24xf32>
    %41 = tpu.matmul %39, %40, %cst_26 {dimension_numbers = #tpu.dot_dimension_numbers<[1], [0], [0], [1], [0, 0, 1, 1], [], []>} : vector<16x570xf32>, vector<570x24xf32>, vector<16x24xf32> -> vector<16x24xf32>
    %42 = arith.addf %37, %41 : vector<16x24xf32>
    %c8 = arith.constant 8 : index
    %c0_27 = arith.constant 0 : index
    %c0_28 = arith.constant 0 : index
    %43 = vector.load %arg2[%c8, %c0_27, %c0_28] : memref<9x16x570xf32, #tpu.memory_space<vmem>>, vector<1x16x570xf32>
    %44 = vector.shape_cast %43 : vector<1x16x570xf32> to vector<16x570xf32>
    %45 = vector.extract_strided_slice %1 {offsets = [0, 8], sizes = [570, 24], strides = [1, 1]} : vector<570x32xf32> to vector<570x24xf32>
    %cst_29 = arith.constant dense<0.000000e+00> : vector<16x24xf32>
    %46 = tpu.matmul %44, %45, %cst_29 {dimension_numbers = #tpu.dot_dimension_numbers<[1], [0], [0], [1], [0, 0, 1, 1], [], []>} : vector<16x570xf32>, vector<570x24xf32>, vector<16x24xf32> -> vector<16x24xf32>
    %47 = arith.addf %42, %46 : vector<16x24xf32>
    %c0_30 = arith.constant 0 : index
    %c0_31 = arith.constant 0 : index
    %48 = vector.load %arg3[%c0_30, %c0_31] : memref<16x1xf32, #tpu.memory_space<vmem>>, vector<16x1xf32>
    %49 = vector.broadcast %48 : vector<16x1xf32> to vector<16x24xf32>
    %50 = arith.addf %47, %49 : vector<16x24xf32>
    %51 = tpu.iota {dimensions = array<i32: 0>} : vector<24x12xi32>
    %52 = tpu.iota {dimensions = array<i32: 1>} : vector<24x12xi32>
    %c2_i32 = arith.constant 2 : i32
    %53 = vector.broadcast %c2_i32 : i32 to vector<24x12xi32>
    %54 = arith.muli %53, %52 : vector<24x12xi32>
    %55 = arith.cmpi eq, %51, %54 : vector<24x12xi32>
    %56 = arith.extui %55 : vector<24x12xi1> to vector<24x12xi32>
    %57 = arith.sitofp %56 : vector<24x12xi32> to vector<24x12xf32>
    %c2_i32_32 = arith.constant 2 : i32
    %58 = vector.broadcast %c2_i32_32 : i32 to vector<24x12xi32>
    %59 = arith.muli %58, %52 : vector<24x12xi32>
    %c1_i32 = arith.constant 1 : i32
    %60 = vector.broadcast %c1_i32 : i32 to vector<24x12xi32>
    %61 = arith.addi %59, %60 : vector<24x12xi32>
    %62 = arith.cmpi eq, %51, %61 : vector<24x12xi32>
    %63 = arith.extui %62 : vector<24x12xi1> to vector<24x12xi32>
    %64 = arith.sitofp %63 : vector<24x12xi32> to vector<24x12xf32>
    %cst_33 = arith.constant dense<0.000000e+00> : vector<16x12xf32>
    %65 = tpu.matmul %50, %57, %cst_33 {dimension_numbers = #tpu.dot_dimension_numbers<[1], [0], [0], [1], [0, 0, 1, 1], [], []>} : vector<16x24xf32>, vector<24x12xf32>, vector<16x12xf32> -> vector<16x12xf32>
    %cst_34 = arith.constant dense<0.000000e+00> : vector<16x12xf32>
    %66 = tpu.matmul %50, %64, %cst_34 {dimension_numbers = #tpu.dot_dimension_numbers<[1], [0], [0], [1], [0, 0, 1, 1], [], []>} : vector<16x24xf32>, vector<24x12xf32>, vector<16x12xf32> -> vector<16x12xf32>
    %67 = arith.maximumf %65, %66 : vector<16x12xf32>
    %cst_35 = arith.constant 0.000000e+00 : f32
    %68 = vector.broadcast %cst_35 : f32 to vector<16x12xf32>
    %69 = arith.maximumf %67, %68 : vector<16x12xf32>
    %cst_36 = arith.constant 0.000000e+00 : f32
    %70 = vector.broadcast %cst_36 : f32 to vector<32x4xf32>
    %c0_37 = arith.constant 0 : index
    %c0_38 = arith.constant 0 : index
    %c0_39 = arith.constant 0 : index
    %71 = vector.load %arg4[%c0_37, %c0_38, %c0_39] : memref<9x32x16xf32, #tpu.memory_space<vmem>>, vector<1x32x16xf32>
    %72 = vector.shape_cast %71 : vector<1x32x16xf32> to vector<32x16xf32>
    %73 = vector.extract_strided_slice %69 {offsets = [0, 0], sizes = [16, 4], strides = [1, 1]} : vector<16x12xf32> to vector<16x4xf32>
    %cst_40 = arith.constant dense<0.000000e+00> : vector<32x4xf32>
    %74 = tpu.matmul %72, %73, %cst_40 {dimension_numbers = #tpu.dot_dimension_numbers<[1], [0], [0], [1], [0, 0, 1, 1], [], []>} : vector<32x16xf32>, vector<16x4xf32>, vector<32x4xf32> -> vector<32x4xf32>
    %75 = arith.addf %70, %74 : vector<32x4xf32>
    %c1_41 = arith.constant 1 : index
    %c0_42 = arith.constant 0 : index
    %c0_43 = arith.constant 0 : index
    %76 = vector.load %arg4[%c1_41, %c0_42, %c0_43] : memref<9x32x16xf32, #tpu.memory_space<vmem>>, vector<1x32x16xf32>
    %77 = vector.shape_cast %76 : vector<1x32x16xf32> to vector<32x16xf32>
    %78 = vector.extract_strided_slice %69 {offsets = [0, 1], sizes = [16, 4], strides = [1, 1]} : vector<16x12xf32> to vector<16x4xf32>
    %cst_44 = arith.constant dense<0.000000e+00> : vector<32x4xf32>
    %79 = tpu.matmul %77, %78, %cst_44 {dimension_numbers = #tpu.dot_dimension_numbers<[1], [0], [0], [1], [0, 0, 1, 1], [], []>} : vector<32x16xf32>, vector<16x4xf32>, vector<32x4xf32> -> vector<32x4xf32>
    %80 = arith.addf %75, %79 : vector<32x4xf32>
    %c2_45 = arith.constant 2 : index
    %c0_46 = arith.constant 0 : index
    %c0_47 = arith.constant 0 : index
    %81 = vector.load %arg4[%c2_45, %c0_46, %c0_47] : memref<9x32x16xf32, #tpu.memory_space<vmem>>, vector<1x32x16xf32>
    %82 = vector.shape_cast %81 : vector<1x32x16xf32> to vector<32x16xf32>
    %83 = vector.extract_strided_slice %69 {offsets = [0, 2], sizes = [16, 4], strides = [1, 1]} : vector<16x12xf32> to vector<16x4xf32>
    %cst_48 = arith.constant dense<0.000000e+00> : vector<32x4xf32>
    %84 = tpu.matmul %82, %83, %cst_48 {dimension_numbers = #tpu.dot_dimension_numbers<[1], [0], [0], [1], [0, 0, 1, 1], [], []>} : vector<32x16xf32>, vector<16x4xf32>, vector<32x4xf32> -> vector<32x4xf32>
    %85 = arith.addf %80, %84 : vector<32x4xf32>
    %c3_49 = arith.constant 3 : index
    %c0_50 = arith.constant 0 : index
    %c0_51 = arith.constant 0 : index
    %86 = vector.load %arg4[%c3_49, %c0_50, %c0_51] : memref<9x32x16xf32, #tpu.memory_space<vmem>>, vector<1x32x16xf32>
    %87 = vector.shape_cast %86 : vector<1x32x16xf32> to vector<32x16xf32>
    %88 = vector.extract_strided_slice %69 {offsets = [0, 3], sizes = [16, 4], strides = [1, 1]} : vector<16x12xf32> to vector<16x4xf32>
    %cst_52 = arith.constant dense<0.000000e+00> : vector<32x4xf32>
    %89 = tpu.matmul %87, %88, %cst_52 {dimension_numbers = #tpu.dot_dimension_numbers<[1], [0], [0], [1], [0, 0, 1, 1], [], []>} : vector<32x16xf32>, vector<16x4xf32>, vector<32x4xf32> -> vector<32x4xf32>
    %90 = arith.addf %85, %89 : vector<32x4xf32>
    %c4_53 = arith.constant 4 : index
    %c0_54 = arith.constant 0 : index
    %c0_55 = arith.constant 0 : index
    %91 = vector.load %arg4[%c4_53, %c0_54, %c0_55] : memref<9x32x16xf32, #tpu.memory_space<vmem>>, vector<1x32x16xf32>
    %92 = vector.shape_cast %91 : vector<1x32x16xf32> to vector<32x16xf32>
    %93 = vector.extract_strided_slice %69 {offsets = [0, 4], sizes = [16, 4], strides = [1, 1]} : vector<16x12xf32> to vector<16x4xf32>
    %cst_56 = arith.constant dense<0.000000e+00> : vector<32x4xf32>
    %94 = tpu.matmul %92, %93, %cst_56 {dimension_numbers = #tpu.dot_dimension_numbers<[1], [0], [0], [1], [0, 0, 1, 1], [], []>} : vector<32x16xf32>, vector<16x4xf32>, vector<32x4xf32> -> vector<32x4xf32>
    %95 = arith.addf %90, %94 : vector<32x4xf32>
    %c5_57 = arith.constant 5 : index
    %c0_58 = arith.constant 0 : index
    %c0_59 = arith.constant 0 : index
    %96 = vector.load %arg4[%c5_57, %c0_58, %c0_59] : memref<9x32x16xf32, #tpu.memory_space<vmem>>, vector<1x32x16xf32>
    %97 = vector.shape_cast %96 : vector<1x32x16xf32> to vector<32x16xf32>
    %98 = vector.extract_strided_slice %69 {offsets = [0, 5], sizes = [16, 4], strides = [1, 1]} : vector<16x12xf32> to vector<16x4xf32>
    %cst_60 = arith.constant dense<0.000000e+00> : vector<32x4xf32>
    %99 = tpu.matmul %97, %98, %cst_60 {dimension_numbers = #tpu.dot_dimension_numbers<[1], [0], [0], [1], [0, 0, 1, 1], [], []>} : vector<32x16xf32>, vector<16x4xf32>, vector<32x4xf32> -> vector<32x4xf32>
    %100 = arith.addf %95, %99 : vector<32x4xf32>
    %c6_61 = arith.constant 6 : index
    %c0_62 = arith.constant 0 : index
    %c0_63 = arith.constant 0 : index
    %101 = vector.load %arg4[%c6_61, %c0_62, %c0_63] : memref<9x32x16xf32, #tpu.memory_space<vmem>>, vector<1x32x16xf32>
    %102 = vector.shape_cast %101 : vector<1x32x16xf32> to vector<32x16xf32>
    %103 = vector.extract_strided_slice %69 {offsets = [0, 6], sizes = [16, 4], strides = [1, 1]} : vector<16x12xf32> to vector<16x4xf32>
    %cst_64 = arith.constant dense<0.000000e+00> : vector<32x4xf32>
    %104 = tpu.matmul %102, %103, %cst_64 {dimension_numbers = #tpu.dot_dimension_numbers<[1], [0], [0], [1], [0, 0, 1, 1], [], []>} : vector<32x16xf32>, vector<16x4xf32>, vector<32x4xf32> -> vector<32x4xf32>
    %105 = arith.addf %100, %104 : vector<32x4xf32>
    %c7_65 = arith.constant 7 : index
    %c0_66 = arith.constant 0 : index
    %c0_67 = arith.constant 0 : index
    %106 = vector.load %arg4[%c7_65, %c0_66, %c0_67] : memref<9x32x16xf32, #tpu.memory_space<vmem>>, vector<1x32x16xf32>
    %107 = vector.shape_cast %106 : vector<1x32x16xf32> to vector<32x16xf32>
    %108 = vector.extract_strided_slice %69 {offsets = [0, 7], sizes = [16, 4], strides = [1, 1]} : vector<16x12xf32> to vector<16x4xf32>
    %cst_68 = arith.constant dense<0.000000e+00> : vector<32x4xf32>
    %109 = tpu.matmul %107, %108, %cst_68 {dimension_numbers = #tpu.dot_dimension_numbers<[1], [0], [0], [1], [0, 0, 1, 1], [], []>} : vector<32x16xf32>, vector<16x4xf32>, vector<32x4xf32> -> vector<32x4xf32>
    %110 = arith.addf %105, %109 : vector<32x4xf32>
    %c8_69 = arith.constant 8 : index
    %c0_70 = arith.constant 0 : index
    %c0_71 = arith.constant 0 : index
    %111 = vector.load %arg4[%c8_69, %c0_70, %c0_71] : memref<9x32x16xf32, #tpu.memory_space<vmem>>, vector<1x32x16xf32>
    %112 = vector.shape_cast %111 : vector<1x32x16xf32> to vector<32x16xf32>
    %113 = vector.extract_strided_slice %69 {offsets = [0, 8], sizes = [16, 4], strides = [1, 1]} : vector<16x12xf32> to vector<16x4xf32>
    %cst_72 = arith.constant dense<0.000000e+00> : vector<32x4xf32>
    %114 = tpu.matmul %112, %113, %cst_72 {dimension_numbers = #tpu.dot_dimension_numbers<[1], [0], [0], [1], [0, 0, 1, 1], [], []>} : vector<32x16xf32>, vector<16x4xf32>, vector<32x4xf32> -> vector<32x4xf32>
    %115 = arith.addf %110, %114 : vector<32x4xf32>
    %c0_73 = arith.constant 0 : index
    %c0_74 = arith.constant 0 : index
    %116 = vector.load %arg5[%c0_73, %c0_74] : memref<32x1xf32, #tpu.memory_space<vmem>>, vector<32x1xf32>
    %117 = vector.broadcast %116 : vector<32x1xf32> to vector<32x4xf32>
    %118 = arith.addf %115, %117 : vector<32x4xf32>
    %119 = tpu.iota {dimensions = array<i32: 0>} : vector<4x2xi32>
    %120 = tpu.iota {dimensions = array<i32: 1>} : vector<4x2xi32>
    %c2_i32_75 = arith.constant 2 : i32
    %121 = vector.broadcast %c2_i32_75 : i32 to vector<4x2xi32>
    %122 = arith.muli %121, %120 : vector<4x2xi32>
    %123 = arith.cmpi eq, %119, %122 : vector<4x2xi32>
    %124 = arith.extui %123 : vector<4x2xi1> to vector<4x2xi32>
    %125 = arith.sitofp %124 : vector<4x2xi32> to vector<4x2xf32>
    %c2_i32_76 = arith.constant 2 : i32
    %126 = vector.broadcast %c2_i32_76 : i32 to vector<4x2xi32>
    %127 = arith.muli %126, %120 : vector<4x2xi32>
    %c1_i32_77 = arith.constant 1 : i32
    %128 = vector.broadcast %c1_i32_77 : i32 to vector<4x2xi32>
    %129 = arith.addi %127, %128 : vector<4x2xi32>
    %130 = arith.cmpi eq, %119, %129 : vector<4x2xi32>
    %131 = arith.extui %130 : vector<4x2xi1> to vector<4x2xi32>
    %132 = arith.sitofp %131 : vector<4x2xi32> to vector<4x2xf32>
    %cst_78 = arith.constant dense<0.000000e+00> : vector<32x2xf32>
    %133 = tpu.matmul %118, %125, %cst_78 {dimension_numbers = #tpu.dot_dimension_numbers<[1], [0], [0], [1], [0, 0, 1, 1], [], []>} : vector<32x4xf32>, vector<4x2xf32>, vector<32x2xf32> -> vector<32x2xf32>
    %cst_79 = arith.constant dense<0.000000e+00> : vector<32x2xf32>
    %134 = tpu.matmul %118, %132, %cst_79 {dimension_numbers = #tpu.dot_dimension_numbers<[1], [0], [0], [1], [0, 0, 1, 1], [], []>} : vector<32x4xf32>, vector<4x2xf32>, vector<32x2xf32> -> vector<32x2xf32>
    %135 = arith.maximumf %133, %134 : vector<32x2xf32>
    %cst_80 = arith.constant 0.000000e+00 : f32
    %136 = vector.broadcast %cst_80 : f32 to vector<32x2xf32>
    %137 = arith.maximumf %135, %136 : vector<32x2xf32>
    %c0_81 = arith.constant 0 : index
    %c0_82 = arith.constant 0 : index
    %c0_83 = arith.constant 0 : index
    %138 = vector.load %arg6[%c0_81, %c0_82, %c0_83] : memref<1x32x2xf32, #tpu.memory_space<vmem>>, vector<1x32x2xf32>
    %139 = vector.shape_cast %138 : vector<1x32x2xf32> to vector<32x2xf32>
    %140 = vector.shape_cast %137 : vector<32x2xf32> to vector<1x32x2xf32>
    tpu.vector_store %arg6[%c0_81, %c0_82, %c0_83], %140 {strides = array<i32>} : memref<1x32x2xf32, #tpu.memory_space<vmem>>, vector<1x32x2xf32>,
    return
  }
  func.func @transform_0(%arg0: i32) -> (i32, i32, i32) {
    %c0_i32 = arith.constant 0 : i32
    %c0_i32_0 = arith.constant 0 : i32
    %c0_i32_1 = arith.constant 0 : i32
    return %arg0, %c0_i32, %c0_i32_0 : i32, i32, i32
  }
  func.func @transform_1(%arg0: i32) -> (i32, i32, i32) {
    %c0_i32 = arith.constant 0 : i32
    %c0_i32_0 = arith.constant 0 : i32
    %c0_i32_1 = arith.constant 0 : i32
    %c0_i32_2 = arith.constant 0 : i32
    return %c0_i32, %c0_i32_0, %c0_i32_1 : i32, i32, i32
  }
  func.func @transform_2(%arg0: i32) -> (i32, i32) {
    %c0_i32 = arith.constant 0 : i32
    %c0_i32_0 = arith.constant 0 : i32
    %c0_i32_1 = arith.constant 0 : i32
    return %c0_i32, %c0_i32_0 : i32, i32
  }
  func.func @transform_3(%arg0: i32) -> (i32, i32, i32) {
    %c0_i32 = arith.constant 0 : i32
    %c0_i32_0 = arith.constant 0 : i32
    %c0_i32_1 = arith.constant 0 : i32
    %c0_i32_2 = arith.constant 0 : i32
    return %c0_i32, %c0_i32_0, %c0_i32_1 : i32, i32, i32
  }
  func.func @transform_4(%arg0: i32) -> (i32, i32) {
    %c0_i32 = arith.constant 0 : i32
    %c0_i32_0 = arith.constant 0 : i32
    %c0_i32_1 = arith.constant 0 : i32
    return %c0_i32, %c0_i32_0 : i32, i32
  }
  func.func @transform_5(%arg0: i32) -> (i32, i32, i32) {
    %c0_i32 = arith.constant 0 : i32
    %c0_i32_0 = arith.constant 0 : i32
    %c0_i32_1 = arith.constant 0 : i32
    return %arg0, %c0_i32, %c0_i32_0 : i32, i32, i32
  }
}

</mosaic_0001>

<bundles_post_ra>
// kernel: act_network_forward.1
= control target key start
LH: loop header
LB: loop body
LE: loop exit
PB: predicated region body
PF: predicated region fallthrough
CT: control target
= control target key end

     0   :  { %s5978_s18 = smov 0   ;;  %s8927_s0 = inlined_call_operand.vmem [shape: f32[2,570,32], index: 0, kind: input, shape index: {}]   ;;  %s8928_s1 = inlined_call_operand.vmem [shape: f32[9,16,570], index: 1, kind: input, shape index: {}]   ;;  %s8929_s2 = inlined_call_operand.vmem [shape: f32[16,1], index: 2, kind: input, shape index: {}]   ;;  %s8930_s3 = inlined_call_operand.vmem [shape: f32[9,32,16], index: 3, kind: input, shape index: {}]   ;;  %s8931_s4 = inlined_call_operand.vmem [shape: f32[32,1], index: 4, kind: input, shape index: {}]   ;;  %s8932_s5 = inlined_call_operand.vmem [shape: f32[2,32,2], index: 5, kind: output, shape index: {}]  }
   0x1 LB: > { %s4073_s19 = sadd.s32 4294967295, %s5935_s18   ;;  %p4077_p0 = scmp.ge.s32.totalorder %s5935_s18, 1  ;;  %s5935_s18 = sphi %s5978_s18, %s15_s18  }
   0x2   : > { %p187_p1 = scmp.lt.s32.totalorder %s5935_s18, 3 }
   0x4   : > { %p188_p2 = pnand %p4077_p0, %p187_p1 }
   0x6   : > { %191 = sbr.rel (%p188_p2) target bundleno = 1688 (0x698), region = 40 }
   0xb   : > { %p215_p3 = scmp.lt.s32.totalorder %s4073_s19, 1  ;;  %s5937_s24 = smov 127   ;;  %vm612_vm0 = vcmask 1041408   ;;  %vm605_vm1 = vcmask 474112   ;;  %vm3350_vm8 = vcmask 195584   ;;  %vm3424_vm9 = vcmask 130048  }
   0xc   : > { %s5938_s25 = smov 126   ;;  %s5939_s26 = smov 125   ;;  %vm3940_vm10 = vcmask 1043456   ;;  %vm3927_vm11 = vcmask 31744   ;;  %vm4013_vm12 = vcmask 15360  }
   0xd   : > { %s9254_s19 = smov (!%p215_p3, %s4073_s19), 1  ;;  %s5940_s30 = smov 124  }
   0xe   : > { %s4288_s20 = smul.u32 576, %s9254_s19  ;;  %s5941_s8 = smov 123  }
   0xf   : > { %s5942_s29 = smov 122   ;;  %s5943_s15 = smov 121  }
  0x10   : > { %s5992_s23 = scalar_lea.vmem %s8927_s0, %s4288_s20  ;;  %s5944_s28 = smov 120  }
  0x11   : > { %v5995_v0 = vld [vmem:[%s5992_s23 + $0x40] sm:$0xff]  ;;  %v5998_v1 = vld [vmem:[%s5992_s23 + $0x48] sm:$0xff]  ;;  %v6027_v9 = vld [vmem:[%s5992_s23 + $0x50] sm:$0xff]  ;;  %s4284_s27 = sshll.u32 %s9254_s19, 5 }
  0x12   : > { %9040 = vst [vmem:[#allocation2_spill] sm:$0xff] %v5995_v0  ;;  %v6001_v2 = vld [vmem:[%s5992_s23 + $0x20] sm:$0xff]  ;;  %v6005_v3 = vpack.i.bf16 %v5998_v1, %v5995_v0  ;;  %v6008_v4 = vld [vmem:[%s5992_s23 + $0x28] sm:$0xff]  ;;  %v6034_v10 = vld [vmem:[%s5992_s23 + $0x58] sm:$0xff]  ;;  %s224_s9 = scalar_lea.vmem %s8932_s5, %s4284_s27 }
  0x13   : > { %9041 = vst [vmem:[#allocation3_spill] sm:$0xff] %v5998_v1  ;;  %v6011_v5 = vld [vmem:[%s5992_s23] sm:$0xff]  ;;  %v6014_v6 = vld [vmem:[%s5992_s23 + $0x8] sm:$0xff]  ;;  %v6018_v7 = vpack.i.bf16 %v6008_v4, %v6001_v2  ;;  %v6037_v11 = vld [vmem:[%s5992_s23 + $0x30] sm:$0xff]  ;;  %v6050_v15 = vpack.i.bf16 %v6034_v10, %v6027_v9 }
  0x14   : > { %9042 = vst [vmem:[#allocation4_spill] sm:$0xff] %v6001_v2  ;;  %v6022_v8 = vpack.i.bf16 %v6014_v6, %v6011_v5  ;;  %4329 = vrot.lane.b32.xlu2 %v6005_v3, %s5937_s24  ;;  %v6040_v12 = vld [vmem:[%s5992_s23 + $0x38] sm:$0xff]  ;;  %v6043_v13 = vld [vmem:[%s5992_s23 + $0x10] sm:$0xff]  ;;  %v241_v18 = vld [vmem:[%s5992_s23 + $0x80] sm:$0xff] }
  0x15   : > { %9043 = vst [vmem:[#allocation5_spill] sm:$0xff] %v6005_v3  ;;  %4319 = vrot.lane.b32.xlu1 %v6018_v7, %s5937_s24  ;;  %v6046_v14 = vld [vmem:[%s5992_s23 + $0x18] sm:$0xff]  ;;  %v6054_v16 = vpack.i.bf16 %v6040_v12, %v6037_v11  ;;  %v242_v19 = vld [vmem:[%s5992_s23 + $0x88] sm:$0xff]  ;;  %v6069_v20 = vld [vmem:[%s5992_s23 + $0x70] sm:$0xff] }
  0x16   : > { %9044 = vst [vmem:[#allocation6_spill] sm:$0xff] %v6008_v4  ;;  %4309 = vrot.lane.b32.xlu0 %v6022_v8, %s5937_s24  ;;  %v6058_v17 = vpack.i.bf16 %v6046_v14, %v6043_v13  ;;  %v6072_v21 = vld [vmem:[%s5992_s23 + $0x78] sm:$0xff]  ;;  %v6075_v22 = vld [vmem:[%s5992_s23 + $0x60] sm:$0xff]  ;;  %v6078_v23 = vld [vmem:[%s5992_s23 + $0x68] sm:$0xff]  ;;  %v6080_v24 = vpack.i.bf16 %v242_v19, %v241_v18 }
  0x17   : > { %9045 = vst [vmem:[#allocation7_spill] sm:$0xff] %v6011_v5  ;;  %v6084_v25 = vpack.i.bf16 %v6072_v21, %v6069_v20  ;;  %v6088_v26 = vpack.i.bf16 %v6078_v23, %v6075_v22  ;;  %v6093_v27 = vld [vmem:[%s5992_s23 + $0xb0] sm:$0xff]  ;;  %v6100_v28 = vld [vmem:[%s5992_s23 + $0xb8] sm:$0xff]  ;;  %v6103_v29 = vld [vmem:[%s5992_s23 + $0xa0] sm:$0xff] }
  0x18   : > { %9046 = vst [vmem:[#allocation8_spill] sm:$0xff] %v6014_v6  ;;  %v6106_v30 = vld [vmem:[%s5992_s23 + $0xa8] sm:$0xff]  ;;  %v6109_v31 = vld [vmem:[%s5992_s23 + $0x90] sm:$0xff]  ;;  %v6112_v32 = vld [vmem:[%s5992_s23 + $0x98] sm:$0xff]  ;;  %v6116_v33 = vpack.i.bf16 %v6100_v28, %v6093_v27 }
  0x19   : > { %9047 = vst [vmem:[#allocation9_spill] sm:$0xff] %v6027_v9  ;;  %v6120_v34 = vpack.i.bf16 %v6106_v30, %v6103_v29  ;;  %v6124_v35 = vpack.i.bf16 %v6112_v32, %v6109_v31  ;;  %v6129_v36 = vld [vmem:[%s5992_s23 + $0xe0] sm:$0xff]  ;;  %v6136_v37 = vld [vmem:[%s5992_s23 + $0xe8] sm:$0xff]  ;;  %v6139_v38 = vld [vmem:[%s5992_s23 + $0xd0] sm:$0xff] }
  0x1a   : > { %9048 = vst [vmem:[#allocation10_spill] sm:$0xff] %v6037_v11  ;;  %v6142_v39 = vld [vmem:[%s5992_s23 + $0xd8] sm:$0xff]  ;;  %v6145_v40 = vld [vmem:[%s5992_s23 + $0xc0] sm:$0xff]  ;;  %v6148_v41 = vld [vmem:[%s5992_s23 + $0xc8] sm:$0xff]  ;;  %v6152_v42 = vpack.i.bf16 %v6136_v37, %v6129_v36 }
  0x1b   : > { %9049 = vst [vmem:[#allocation11_spill] sm:$0xff] %v6040_v12  ;;  %v6156_v43 = vpack.i.bf16 %v6142_v39, %v6139_v38  ;;  %v6160_v44 = vpack.i.bf16 %v6148_v41, %v6145_v40  ;;  %v6165_v45 = vld [vmem:[%s5992_s23 + $0x110] sm:$0xff]  ;;  %v6172_v46 = vld [vmem:[%s5992_s23 + $0x118] sm:$0xff]  ;;  %v6175_v47 = vld [vmem:[%s5992_s23 + $0x100] sm:$0xff] }
  0x1c   : > { %9050 = vst [vmem:[#allocation12_spill] sm:$0xff] %v6043_v13  ;;  %4334 = vrot.lane.b32.xlu2 %v6050_v15, %s5937_s24  ;;  %v6178_v48 = vld [vmem:[%s5992_s23 + $0x108] sm:$0xff]  ;;  %v6181_v49 = vld [vmem:[%s5992_s23 + $0xf0] sm:$0xff]  ;;  %v6184_v50 = vld [vmem:[%s5992_s23 + $0xf8] sm:$0xff]  ;;  %v6188_v51 = vpack.i.bf16 %v6172_v46, %v6165_v45 }
  0x1d   : > { %9051 = vst [vmem:[#allocation13_spill] sm:$0xff] %v6046_v14  ;;  %4324 = vrot.lane.b32.xlu1 %v6054_v16, %s5937_s24  ;;  %v6192_v52 = vpack.i.bf16 %v6178_v48, %v6175_v47  ;;  %v6196_v53 = vpack.i.bf16 %v6184_v50, %v6181_v49  ;;  %v6201_v54 = vld [vmem:[%s5992_s23 + $0x140] sm:$0xff]  ;;  %v6208_v55 = vld [vmem:[%s5992_s23 + $0x148] sm:$0xff]  ;;  %v6211_v56 = vld [vmem:[%s5992_s23 + $0x130] sm:$0xff] }
  0x1e   : > { %9052 = vst [vmem:[#allocation14_spill] sm:$0xff] %v6050_v15  ;;  %4314 = vrot.lane.b32.xlu0 %v6058_v17, %s5937_s24  ;;  %v6214_v57 = vld [vmem:[%s5992_s23 + $0x138] sm:$0xff]  ;;  %v6217_v58 = vld [vmem:[%s5992_s23 + $0x120] sm:$0xff]  ;;  %v6220_v59 = vld [vmem:[%s5992_s23 + $0x128] sm:$0xff]  ;;  %v6224_v60 = vpack.i.bf16 %v6208_v55, %v6201_v54 }
  0x1f   : > { %9053 = vst [vmem:[#allocation15_spill] sm:$0xff] %v6058_v17  ;;  %v6228_v61 = vpack.i.bf16 %v6214_v57, %v6211_v56  ;;  %v6232_v62 = vpack.i.bf16 %v6220_v59, %v6217_v58  ;;  %v6237_v63 = vld [vmem:[%s5992_s23 + $0x170] sm:$0xff]  ;;  %v6244_v18 = vld [vmem:[%s5992_s23 + $0x178] sm:$0xff]  ;;  %v6247_v19 = vld [vmem:[%s5992_s23 + $0x160] sm:$0xff] }
  0x20   : > { %9054 = vst [vmem:[#allocation16_spill] sm:$0xff] %v6080_v24  ;;  %v6358_v5 = vld [vmem:[%s5992_s23 + $0x1f8] sm:$0xff]  ;;  %v6391_v14 = vld [vmem:[%s5992_s23 + $0x210] sm:$0xff] }
  0x21   : > { %9055 = vst [vmem:[#allocation17_spill] sm:$0xff] %v6084_v25  ;;  %v6394_v2 = vld [vmem:[%s5992_s23 + $0x218] sm:$0xff]  ;;  %v6397_v4 = vld [vmem:[%s5992_s23 + $0x230] sm:$0xff] }
  0x22   : > { %9056 = vst [vmem:[#allocation18_spill] sm:$0xff] %v6088_v26  ;;  %v6405_v12 = vpack.i.bf16 %v6394_v2, %v6391_v14 }
  0x23   : > { %9057 = vst [vmem:[#allocation19_spill] sm:$0xff] %v6093_v27 }
  0x24   : > { %4349 = vrot.lane.b32.xlu2 %v6080_v24, %s5937_s24  ;;  %9058 = vst [vmem:[#allocation20_spill] sm:$0xff] %v6100_v28 }
  0x25   : > { %4344 = vrot.lane.b32.xlu1 %v6084_v25, %s5937_s24  ;;  %9059 = vst [vmem:[#allocation21_spill] sm:$0xff] %v6103_v29  ;;  %v6283_v29 = vld [vmem:[%s5992_s23 + $0x190] sm:$0xff] }
  0x26   : > { %4339 = vrot.lane.b32.xlu0 %v6088_v26, %s5937_s24  ;;  %9060 = vst [vmem:[#allocation22_spill] sm:$0xff] %v6106_v30  ;;  %v6289_v30 = vld [vmem:[%s5992_s23 + $0x180] sm:$0xff] }
  0x27   : > { %9061 = vst [vmem:[#allocation23_spill] sm:$0xff] %v6109_v31 }
  0x28   : > { %9062 = vst [vmem:[#allocation24_spill] sm:$0xff] %v6112_v32  ;;  %v6273_v32 = vld [vmem:[%s5992_s23 + $0x1a0] sm:$0xff] }
  0x29   : > { %9063 = vst [vmem:[#allocation25_spill] sm:$0xff] %v6116_v33 }
  0x2a   : > { %9064 = vst [vmem:[#allocation26_spill] sm:$0xff] %v6120_v34 }
  0x2b   : > { %9065 = vst [vmem:[#allocation27_spill] sm:$0xff] %v6124_v35 }
  0x2c   : > { %4364 = vrot.lane.b32.xlu2 %v6116_v33, %s5937_s24  ;;  %9066 = vst [vmem:[#allocation28_spill] sm:$0xff] %v6129_v36  ;;  %v6345_v36 = vld [vmem:[%s5992_s23 + $0x200] sm:$0xff] }
  0x2d   : > { %4359 = vrot.lane.b32.xlu1 %v6120_v34, %s5937_s24  ;;  %9067 = vst [vmem:[#allocation29_spill] sm:$0xff] %v6136_v37  ;;  %v6352_v37 = vld [vmem:[%s5992_s23 + $0x208] sm:$0xff] }
  0x2e   : > { %4354 = vrot.lane.b32.xlu0 %v6124_v35, %s5937_s24  ;;  %9068 = vst [vmem:[#allocation30_spill] sm:$0xff] %v6139_v38  ;;  %v6328_v38 = vld [vmem:[%s5992_s23 + $0x1b8] sm:$0xff] }
  0x2f   : > { %9069 = vst [vmem:[#allocation31_spill] sm:$0xff] %v6142_v39 }
  0x30   : > { %9070 = vst [vmem:[#allocation32_spill] sm:$0xff] %v6145_v40  ;;  %v6316_v40 = vld [vmem:[%s5992_s23 + $0x1d8] sm:$0xff] }
  0x31   : > { %9071 = vst [vmem:[#allocation33_spill] sm:$0xff] %v6148_v41  ;;  %v6322_v41 = vld [vmem:[%s5992_s23 + $0x1c8] sm:$0xff] }
  0x32   : > { %9072 = vst [vmem:[#allocation34_spill] sm:$0xff] %v6152_v42 }
  0x33   : > { %9073 = vst [vmem:[#allocation35_spill] sm:$0xff] %v6156_v43 }
  0x34   : > { %9074 = vst [vmem:[#allocation36_spill] sm:$0xff] %v6160_v44  ;;  %4379 = vrot.lane.b32.xlu2 %v6152_v42, %s5937_s24 }
  0x35   : > { %9075 = vst [vmem:[#allocation37_spill] sm:$0xff] %v6165_v45  ;;  %4374 = vrot.lane.b32.xlu1 %v6156_v43, %s5937_s24  ;;  %v6256_v45 = vld [vmem:[%s5992_s23 + $0x158] sm:$0xff] }
  0x36   : > { %4369 = vrot.lane.b32.xlu0 %v6160_v44, %s5937_s24  ;;  %9076 = vst [vmem:[#allocation38_spill] sm:$0xff] %v6172_v46  ;;  %v6260_v46 = vpack.i.bf16 %v6244_v18, %v6237_v63 }
  0x37   : > { %9077 = vst [vmem:[#allocation39_spill] sm:$0xff] %v6175_v47  ;;  %v6250_v47 = vld [vmem:[%s5992_s23 + $0x168] sm:$0xff] }
  0x38   : > { %9078 = vst [vmem:[#allocation40_spill] sm:$0xff] %v6178_v48  ;;  %v6253_v48 = vld [vmem:[%s5992_s23 + $0x150] sm:$0xff]  ;;  %v6264_v31 = vpack.i.bf16 %v6250_v47, %v6247_v19 }
  0x39   : > { %9079 = vst [vmem:[#allocation41_spill] sm:$0xff] %v6181_v49  ;;  %v6361_v49 = vld [vmem:[%s5992_s23 + $0x1e0] sm:$0xff] }
  0x3a   : > { %9080 = vst [vmem:[#allocation42_spill] sm:$0xff] %v6184_v50  ;;  %v6368_v50 = vpack.i.bf16 %v6352_v37, %v6345_v36 }
  0x3b   : > { %9081 = vst [vmem:[#allocation43_spill] sm:$0xff] %v6192_v52 }
  0x3c   : > { %9082 = vst [vmem:[#allocation44_spill] sm:$0xff] %v6196_v53  ;;  %4394 = vrot.lane.b32.xlu2 %v6188_v51, %s5937_s24 }
  0x3d   : > { %9083 = vst [vmem:[#allocation45_spill] sm:$0xff] %v6201_v54  ;;  %4389 = vrot.lane.b32.xlu1 %v6192_v52, %s5937_s24 }
  0x3e   : > { %4384 = vrot.lane.b32.xlu0 %v6196_v53, %s5937_s24  ;;  %9084 = vst [vmem:[#allocation46_spill] sm:$0xff] %v6208_v55  ;;  %v6309_v55 = vld [vmem:[%s5992_s23 + $0x1d0] sm:$0xff] }
  0x3f   : > { %9085 = vst [vmem:[#allocation47_spill] sm:$0xff] %v6211_v56  ;;  %v6286_v56 = vld [vmem:[%s5992_s23 + $0x198] sm:$0xff] }
  0x40   : > { %9086 = vst [vmem:[#allocation48_spill] sm:$0xff] %v6214_v57  ;;  %v6292_v57 = vld [vmem:[%s5992_s23 + $0x188] sm:$0xff]  ;;  %v6300_v54 = vpack.i.bf16 %v6286_v56, %v6283_v29 }
  0x41   : > { %9087 = vst [vmem:[#allocation49_spill] sm:$0xff] %v6217_v58  ;;  %v6268_v58 = vpack.i.bf16 %v6256_v45, %v6253_v48  ;;  %v6304_v28 = vpack.i.bf16 %v6292_v57, %v6289_v30 }
  0x42   : > { %9088 = vst [vmem:[#allocation50_spill] sm:$0xff] %v6220_v59  ;;  %v6280_v59 = vld [vmem:[%s5992_s23 + $0x1a8] sm:$0xff] }
  0x43   : > { %9089 = vst [vmem:[#allocation51_spill] sm:$0xff] %v6237_v63  ;;  %v6296_v27 = vpack.i.bf16 %v6280_v59, %v6273_v32  ;;  %v6355_v63 = vld [vmem:[%s5992_s23 + $0x1f0] sm:$0xff] }
  0x44   : > { %4409 = vrot.lane.b32.xlu2 %v6224_v60, %s5937_s24  ;;  %9090 = vst [vmem:[#allocation52_spill] sm:$0xff] %v6244_v18  ;;  %v6364_v18 = vld [vmem:[%s5992_s23 + $0x1e8] sm:$0xff]  ;;  %v6372_v6 = vpack.i.bf16 %v6358_v5, %v6355_v63 }
  0x45   : > { %4404 = vrot.lane.b32.xlu1 %v6228_v61, %s5937_s24  ;;  %9091 = vst [vmem:[#allocation53_spill] sm:$0xff] %v6247_v19  ;;  %v6332_v19 = vpack.i.bf16 %v6316_v40, %v6309_v55  ;;  %v6376_v13 = vpack.i.bf16 %v6364_v18, %v6361_v49 }
  0x46   : > { %4399 = vrot.lane.b32.xlu0 %v6232_v62, %s5937_s24  ;;  %9092 = vst [vmem:[#allocation54_spill] sm:$0xff] %v6250_v47 }
  0x47   : > { %9093 = vst [vmem:[#allocation55_spill] sm:$0xff] %v6253_v48  ;;  %v6319_v48 = vld [vmem:[%s5992_s23 + $0x1c0] sm:$0xff] }
  0x48   : > { %9094 = vst [vmem:[#allocation56_spill] sm:$0xff] %v6256_v45  ;;  %v6325_v45 = vld [vmem:[%s5992_s23 + $0x1b0] sm:$0xff]  ;;  %v6336_v39 = vpack.i.bf16 %v6322_v41, %v6319_v48 }
  0x49   : > { %9095 = vst [vmem:[#allocation57_spill] sm:$0xff] %v6289_v30  ;;  %v6340_v47 = vpack.i.bf16 %v6328_v38, %v6325_v45  ;;  %v6414_v30 = vld [vmem:[%s5992_s23 + $0x238] sm:$0x3] }
  0x4a   : > { %9096 = vst [vmem:[#allocation58_spill] sm:$0xff] %v6292_v57 }
  0x4b   : > { %9097 = vst [vmem:[#allocation59_spill] sm:$0xff] %v6345_v36  ;;  %v6385_v36 = vld [vmem:[%s5992_s23 + $0x220] sm:$0xff] }
  0x4c   : > { %4424 = vrot.lane.b32.xlu2 %v6260_v46, %s5937_s24  ;;  %9098 = vst [vmem:[#allocation60_spill] sm:$0xff] %v6352_v37  ;;  %v6388_v37 = vld [vmem:[%s5992_s23 + $0x228] sm:$0xff] }
  0x4d   : > { %4419 = vrot.lane.b32.xlu1 %v6264_v31, %s5937_s24  ;;  %9099 = vst [vmem:[#allocation61_spill] sm:$0xff] %v6385_v36  ;;  %v6401_v11 = vpack.i.bf16 %v6388_v37, %v6385_v36 }
  0x4e   : > { %4414 = vrot.lane.b32.xlu0 %v6268_v58, %s5937_s24  ;;  %9100 = vst [vmem:[#allocation62_spill] sm:$0xff] %v6388_v37 }
  0x4f   : > { %9101 = vst [vmem:[#allocation63_spill] sm:$0xff] %v6391_v14 }
  0x50   : > { %9102 = vst [vmem:[#allocation64_spill] sm:$0xff] %v6394_v2 }
  0x54   : > { %4439 = vrot.lane.b32.xlu2 %v6296_v27, %s5937_s24 }
  0x55   : > { %4434 = vrot.lane.b32.xlu1 %v6300_v54, %s5937_s24 }
  0x56   : > { %4429 = vrot.lane.b32.xlu0 %v6304_v28, %s5937_s24 }
  0x5c   : > { %4454 = vrot.lane.b32.xlu2 %v6332_v19, %s5937_s24 }
  0x5d   : > { %4449 = vrot.lane.b32.xlu1 %v6336_v39, %s5937_s24 }
  0x5e   : > { %4444 = vrot.lane.b32.xlu0 %v6340_v47, %s5937_s24 }
  0x64   : > { %4469 = vrot.lane.b32.xlu2 %v6368_v50, %s5937_s24 }
  0x65   : > { %4464 = vrot.lane.b32.xlu1 %v6372_v6, %s5937_s24 }
  0x66   : > { %4459 = vrot.lane.b32.xlu0 %v6376_v13, %s5937_s24 }
  0x6c   : > { %530 = vrot.lane.b32.xlu2 %v6397_v4, %s5937_s24 }
  0x6d   : > { %4479 = vrot.lane.b32.xlu1 %v6401_v11, %s5937_s24 }
  0x6e   : > { %4474 = vrot.lane.b32.xlu0 %v6405_v12, %s5937_s24  ;;  %v4330_v0 = vpop.permute.xlu2 %4329 }
  0x74   : > { %4489 = vrot.lane.b32.xlu2 %v6058_v17, %s5938_s25 }
  0x75   : > { %4484 = vrot.lane.b32.xlu1 %v6022_v8, %s5938_s25 }
  0x76   : > { %532 = vrot.lane.b32.xlu0 %v6414_v30, %s5937_s24  ;;  %v4335_v14 = vpop.permute.xlu2 %4334 }
  0x7c   : > { %4504 = vrot.lane.b32.xlu2 %v6005_v3, %s5938_s25 }
  0x7d   : > { %4499 = vrot.lane.b32.xlu1 %v6054_v16, %s5938_s25 }
  0x7e   : > { %4494 = vrot.lane.b32.xlu0 %v6018_v7, %s5938_s25  ;;  %v6428_v2 = vpop.permute.xlu2 %4349 }
  0x84   : > { %4519 = vrot.lane.b32.xlu2 %v6084_v25, %s5938_s25 }
  0x85   : > { %4514 = vrot.lane.b32.xlu1 %v6088_v26, %s5938_s25 }
  0x86   : > { %4509 = vrot.lane.b32.xlu0 %v6050_v15, %s5938_s25  ;;  %v6436_v36 = vpop.permute.xlu2 %4364 }
  0x87   : > { %v4320_v37 = vpop.permute.xlu1 %4319 }
  0x88   : > { %v6438_v3 = vpop.permute.xlu0 %4309 }
  0x8c   : > { %4534 = vrot.lane.b32.xlu2 %v6120_v34, %s5938_s25 }
  0x8d   : > { %4529 = vrot.lane.b32.xlu1 %v6124_v35, %s5938_s25 }
  0x8e   : > { %4524 = vrot.lane.b32.xlu0 %v6080_v24, %s5938_s25  ;;  %v6446_v25 = vpop.permute.xlu2 %4379 }
  0x8f   : > { %v4325_v26 = vpop.permute.xlu1 %4324 }
  0x90   : > { %v4315_v1 = vpop.permute.xlu0 %4314 }
  0x94   : > { %4549 = vrot.lane.b32.xlu2 %v6156_v43, %s5938_s25 }
  0x95   : > { %4544 = vrot.lane.b32.xlu1 %v6160_v44, %s5938_s25 }
  0x96   : > { %4539 = vrot.lane.b32.xlu0 %v6116_v33, %s5938_s25  ;;  %v6454_v34 = vpop.permute.xlu2 %4394 }
  0x97   : > { %v4345_v15 = vpop.permute.xlu1 %4344 }
  0x98   : > { %v4340_v35 = vpop.permute.xlu0 %4339  ;;  %v4347_v57 = vunpack.i.h.bf16 %v4345_v15  ;;  %v4346_v9 = vunpack.i.l.bf16 %v4345_v15  ;;  %v4336_v15 = vunpack.i.l.bf16 %v4335_v14 }
  0x99   : > { %v4342_v24 = vunpack.i.h.bf16 %v4340_v35  ;;  %v4341_v33 = vunpack.i.l.bf16 %v4340_v35  ;;  %v4331_v35 = vunpack.i.l.bf16 %v4330_v0 }
  0x9a   : > { %615 = vmatpush.msra.mxu0 %v4347_v57  ;;  %v4332_v57 = vunpack.i.h.bf16 %v4330_v0 }
  0x9c   : > { %616 = vmatpush.msra.mxu0 %v4346_v9  ;;  %4564 = vrot.lane.b32.xlu2 %v6192_v52, %s5938_s25  ;;  %v4337_v9 = vunpack.i.h.bf16 %v4335_v14  ;;  %v4327_v14 = vunpack.i.h.bf16 %v4325_v26 }
  0x9d   : > { %4559 = vrot.lane.b32.xlu1 %v6196_v53, %s5938_s25 }
  0x9e   : > { %4554 = vrot.lane.b32.xlu0 %v6152_v42, %s5938_s25  ;;  %617 = vmatpush.msra.mxu0 %v4342_v24  ;;  %v6462_v43 = vpop.permute.xlu2 %4409 }
  0x9f   : > { %v6464_v44 = vpop.permute.xlu1 %4359 }
  0xa0   : > { %v6466_v17 = vpop.permute.xlu0 %4354  ;;  %618 = vmatpush.msra.mxu0 %v4341_v33 }
  0xa2   : > { %619 = vmatpush.msra.mxu0 %v4337_v9  ;;  %v4326_v9 = vunpack.i.l.bf16 %v4325_v26  ;;  %v4317_v26 = vunpack.i.h.bf16 %v4315_v1 }
  0xa4   : > { %620 = vmatpush.msra.mxu0 %v4336_v15  ;;  %4579 = vrot.lane.b32.xlu2 %v6228_v61, %s5938_s25  ;;  %v4322_v15 = vunpack.i.h.bf16 %v4320_v37 }
  0xa5   : > { %4574 = vrot.lane.b32.xlu1 %v6232_v62, %s5938_s25 }
  0xa6   : > { %4569 = vrot.lane.b32.xlu0 %v6188_v51, %s5938_s25  ;;  %621 = vmatpush.msra.mxu0 %v4332_v57  ;;  %v4425_v24 = vpop.permute.xlu2 %4424  ;;  %v4321_v57 = vunpack.i.l.bf16 %v4320_v37  ;;  %v4382_v37 = vunpack.i.h.bf16 %v6446_v25 }
  0xa7   : > { %v4375_v52 = vpop.permute.xlu1 %4374  ;;  %v4427_v33 = vunpack.i.h.bf16 %v4425_v24  ;;  %v4426_v53 = vunpack.i.l.bf16 %v4425_v24 }
  0xa8   : > { %v4370_v42 = vpop.permute.xlu0 %4369  ;;  %622 = vmatpush.msra.mxu0 %v4331_v35 }
  0xa9   : > { %661 = vmatpush.msra.mxu2 %v4427_v33  ;;  %v4316_v33 = vunpack.i.l.bf16 %v4315_v1  ;;  %v4311_v1 = vunpack.i.l.bf16 %v6438_v3 }
  0xaa   : > { %623 = vmatpush.msra.mxu0 %v4327_v14 }
  0xab   : > { %662 = vmatpush.msra.mxu2 %v4426_v53 }
  0xac   : > { %624 = vmatpush.msra.mxu0 %v4326_v9  ;;  %4594 = vrot.lane.b32.xlu2 %v6264_v31, %s5938_s25  ;;  %v4312_v9 = vunpack.i.h.bf16 %v6438_v3  ;;  %v4372_v3 = vunpack.i.h.bf16 %v4370_v42 }
  0xad   : > { %4589 = vrot.lane.b32.xlu1 %v6268_v58, %s5938_s25 }
  0xae   : > { %4584 = vrot.lane.b32.xlu0 %v6224_v60, %s5938_s25  ;;  %625 = vmatpush.msra.mxu0 %v4322_v15  ;;  %v6480_v0 = vpop.permute.xlu2 %4439 }
  0xaf   : > { %v6482_v24 = vpop.permute.xlu1 %4389 }
  0xb0   : > { %v4385_v35 = vpop.permute.xlu0 %4384  ;;  %626 = vmatpush.msra.mxu0 %v4321_v57 }
  0xb1   : > { %v4387_v53 = vunpack.i.h.bf16 %v4385_v35  ;;  %v4386_v14 = vunpack.i.l.bf16 %v4385_v35 }
  0xb2   : > { %627 = vmatpush.msra.mxu0 %v4317_v26  ;;  %v4381_v26 = vunpack.i.l.bf16 %v6446_v25 }
  0xb3   : > { %638 = vmatpush.msra.mxu1 %v4387_v53  ;;  %v4377_v53 = vunpack.i.h.bf16 %v4375_v52 }
  0xb4   : > { %628 = vmatpush.msra.mxu0 %v4316_v33  ;;  %4609 = vrot.lane.b32.xlu2 %v6300_v54, %s5938_s25  ;;  %v4376_v33 = vunpack.i.l.bf16 %v4375_v52 }
  0xb5   : > { %639 = vmatpush.msra.mxu1 %v4386_v14  ;;  %4604 = vrot.lane.b32.xlu1 %v6304_v28, %s5938_s25 }
  0xb6   : > { %4599 = vrot.lane.b32.xlu0 %v6260_v46, %s5938_s25  ;;  %629 = vmatpush.msra.mxu0 %v4312_v9  ;;  %v6492_v15 = vpop.permute.xlu2 %4454  ;;  %v4371_v9 = vunpack.i.l.bf16 %v4370_v42  ;;  %v4362_v42 = vunpack.i.h.bf16 %v6464_v44 }
  0xb7   : > { %640 = vmatpush.msra.mxu1 %v4382_v37  ;;  %v6495_v57 = vpop.permute.xlu1 %4404  ;;  %v4367_v37 = vunpack.i.h.bf16 %v6436_v36 }
  0xb8   : > { %v6497_v35 = vpop.permute.xlu0 %4399  ;;  %630 = vmatpush.msra.mxu0 %v4311_v1  ;;  %v4366_v1 = vunpack.i.l.bf16 %v6436_v36 }
  0xb9   : > { %641 = vmatpush.msra.mxu1 %v4381_v26  ;;  %v4361_v26 = vunpack.i.l.bf16 %v6464_v44  ;;  %v4352_v44 = vunpack.i.h.bf16 %v6428_v2 }
  0xba   : > { %807 = vmatpush.msrb.mxu0 %v6358_v5 }
  0xbb   : > { %642 = vmatpush.msra.mxu1 %v4377_v53 }
  0xbc   : > { %808 = vmatpush.msrb.mxu0 %v6355_v63  ;;  %4624 = vrot.lane.b32.xlu2 %v6336_v39, %s5938_s25 }
  0xbd   : > { %643 = vmatpush.msra.mxu1 %v4376_v33  ;;  %4619 = vrot.lane.b32.xlu1 %v6340_v47, %s5938_s25  ;;  %v4357_v33 = vunpack.i.h.bf16 %v6466_v17 }
  0xbe   : > { %4614 = vrot.lane.b32.xlu0 %v6296_v27, %s5938_s25  ;;  %v6508_v25 = vpop.permute.xlu2 %4469  ;;  %809 = vmatpush.msrb.mxu0 %v6364_v18 }
  0xbf   : > { %644 = vmatpush.msra.mxu1 %v4372_v3  ;;  %v4420_v14 = vpop.permute.xlu1 %4419  ;;  %v4412_v3 = vunpack.i.h.bf16 %v6462_v43 }
  0xc0   : > { %v4415_v5 = vpop.permute.xlu0 %4414  ;;  %v4422_v52 = vunpack.i.h.bf16 %v4420_v14  ;;  %v4421_v63 = vunpack.i.l.bf16 %v4420_v14  ;;  %810 = vmatpush.msrb.mxu0 %v6361_v49  ;;  %v4356_v14 = vunpack.i.l.bf16 %v6466_v17 }
  0xc1   : > { %645 = vmatpush.msra.mxu1 %v4371_v9  ;;  %v4417_v18 = vunpack.i.h.bf16 %v4415_v5  ;;  %v4416_v53 = vunpack.i.l.bf16 %v4415_v5  ;;  %v4411_v9 = vunpack.i.l.bf16 %v6462_v43  ;;  %v4402_v5 = vunpack.i.h.bf16 %v6497_v35 }
  0xc2   : > { %663 = vmatpush.msra.mxu2 %v4422_v52  ;;  %811 = vmatpush.msrb.mxu0 %v6316_v40 }
  0xc3   : > { %646 = vmatpush.msra.mxu1 %v4367_v37  ;;  %v9107_v37 = vld [vmem:[#allocation57_spill] sm:$0xff] }
  0xc4   : > { %664 = vmatpush.msra.mxu2 %v4421_v63  ;;  %4639 = vrot.lane.b32.xlu2 %v6372_v6, %s5938_s25  ;;  %v9106_v63 = vld [vmem:[#allocation3_spill] sm:$0xff] }
  0xc5   : > { %647 = vmatpush.msra.mxu1 %v4366_v1  ;;  %4634 = vrot.lane.b32.xlu1 %v6376_v13, %s5938_s25  ;;  %v9108_v1 = vld [vmem:[#allocation2_spill] sm:$0xff] }
  0xc6   : > { %4629 = vrot.lane.b32.xlu0 %v6332_v19, %s5938_s25  ;;  %v6522_v49 = vpop.permute.xlu2 %530  ;;  %665 = vmatpush.msra.mxu2 %v4417_v18 }
  0xc7   : > { %648 = vmatpush.msra.mxu1 %v4362_v42  ;;  %v6524_v36 = vpop.permute.xlu1 %4434  ;;  %812 = vmatpush.msrb.mxu0 %v6309_v55  ;;  %v9109_v42 = vld [vmem:[#allocation18_spill] sm:$0xff] }
  0xc8   : > { %v6526_v40 = vpop.permute.xlu0 %4429  ;;  %666 = vmatpush.msra.mxu2 %v4416_v53  ;;  %v9110_v53 = vld [vmem:[#allocation14_spill] sm:$0xff] }
  0xc9   : > { %649 = vmatpush.msra.mxu1 %v4361_v26  ;;  %813 = vmatpush.msrb.mxu0 %v6322_v41  ;;  %v4407_v41 = vunpack.i.h.bf16 %v6495_v57 }
  0xca   : > { %667 = vmatpush.msra.mxu2 %v4412_v3 }
  0xcb   : > { %650 = vmatpush.msra.mxu1 %v4357_v33  ;;  %814 = vmatpush.msrb.mxu0 %v6319_v48  ;;  %v4351_v48 = vunpack.i.l.bf16 %v6428_v2  ;;  %v4397_v2 = vunpack.i.h.bf16 %v6454_v34  ;;  %v9111_v33 = vld [vmem:[#allocation5_spill] sm:$0xff] }
  0xcc   : > { %668 = vmatpush.msra.mxu2 %v4411_v9  ;;  %4654 = vrot.lane.b32.xlu2 %v6401_v11, %s5938_s25  ;;  %v4406_v11 = vunpack.i.l.bf16 %v6495_v57  ;;  %v9112_v9 = vld [vmem:[#allocation11_spill] sm:$0xff] }
  0xcd   : > { %651 = vmatpush.msra.mxu1 %v4356_v14  ;;  %4649 = vrot.lane.b32.xlu1 %v6405_v12, %s5938_s25 }
  0xce   : > { %v6542_v55 = vpop.permute.xlu2 %4489  ;;  %4644 = vrot.lane.b32.xlu0 %v6368_v50, %s5938_s25  ;;  %669 = vmatpush.msra.mxu2 %v4407_v41  ;;  %v4401_v50 = vunpack.i.l.bf16 %v6497_v35  ;;  %v4391_v35 = vunpack.i.l.bf16 %v6482_v24 }
  0xcf   : > { %652 = vmatpush.msra.mxu1 %v4352_v44  ;;  %v6546_v17 = vpop.permute.xlu1 %4449  ;;  %815 = vmatpush.msrb.mxu0 %v6328_v38 }
  0xd0   : > { %v6548_v43 = vpop.permute.xlu0 %4444  ;;  %670 = vmatpush.msra.mxu2 %v4406_v11  ;;  %v4452_v18 = vunpack.i.h.bf16 %v6546_v17  ;;  %v4451_v14 = vunpack.i.l.bf16 %v6546_v17  ;;  %v9115_v17 = vld [vmem:[#allocation27_spill] sm:$0xff] }
  0xd1   : > { %653 = vmatpush.msra.mxu1 %v4351_v48  ;;  %816 = vmatpush.msrb.mxu0 %v6325_v45  ;;  %v4447_v44 = vunpack.i.h.bf16 %v6548_v43  ;;  %v9113_v48 = vld [vmem:[#allocation10_spill] sm:$0xff]  ;;  %v4446_v11 = vunpack.i.l.bf16 %v6548_v43 }
  0xd2   : > { %671 = vmatpush.msra.mxu2 %v4402_v5  ;;  %v9114_v5 = vld [vmem:[#allocation6_spill] sm:$0xff] }
  0xd3   : > { %738 = vmatpush.msrb.mxu1 %v6072_v21  ;;  %817 = vmatpush.msrb.mxu0 %v6280_v59 }
  0xd4   : > { %672 = vmatpush.msra.mxu2 %v4401_v50  ;;  %4659 = vrot.lane.b32.xlu2 %v6022_v8, %s5939_s26  ;;  %v4392_v8 = vunpack.i.h.bf16 %v6482_v24  ;;  %v4442_v50 = vunpack.i.h.bf16 %v6480_v0 }
  0xd5   : > { %739 = vmatpush.msrb.mxu1 %v6069_v20  ;;  %1006 = vrot.lane.b32.xlu1 %v6414_v30, %s5938_s25  ;;  %v4396_v20 = vunpack.i.l.bf16 %v6454_v34  ;;  %v4083_v34 = vld [vmem:[%s8928_s1 + $0x60] sm:$0xff] }
  0xd6   : > { %v6562_v38 = vpop.permute.xlu2 %4504  ;;  %1004 = vrot.lane.b32.xlu0 %v6397_v4, %s5938_s25  ;;  %673 = vmatpush.msra.mxu2 %v4397_v2 }
  0xd7   : > { %v4465_v21 = vpop.permute.xlu1 %4464  ;;  %740 = vmatpush.msrb.mxu1 %v6078_v23  ;;  %818 = vmatpush.msrb.mxu0 %v6273_v32  ;;  %v9103_v32 = vld [vmem:[#allocation15_spill] sm:$0xff] }
  0xd8   : > { %v4460_v45 = vpop.permute.xlu0 %4459  ;;  %v4467_v59 = vunpack.i.h.bf16 %v4465_v21  ;;  %v4466_v57 = vunpack.i.l.bf16 %v4465_v21  ;;  %674 = vmatpush.msra.mxu2 %v4396_v20 }
  0xd9   : > { %741 = vmatpush.msrb.mxu1 %v6075_v22  ;;  %819 = vmatpush.msrb.mxu0 %v6286_v56  ;;  %v4462_v23 = vunpack.i.h.bf16 %v4460_v45  ;;  %v4461_v52 = vunpack.i.l.bf16 %v4460_v45  ;;  %v9117_v45 = vld [vmem:[#allocation17_spill] sm:$0xff] }
  0xda   : > { %684 = vmatpush.msra.mxu3 %v4467_v59  ;;  %675 = vmatpush.msra.mxu2 %v4392_v8  ;;  %v4441_v59 = vunpack.i.l.bf16 %v6480_v0  ;;  %v9118_v8 = vld [vmem:[#allocation4_spill] sm:$0xff]  ;;  %v4472_v0 = vunpack.i.h.bf16 %v6508_v25 }
  0xdb   : > { %742 = vmatpush.msrb.mxu1 %v6034_v10  ;;  %820 = vmatpush.msrb.mxu0 %v6283_v29  ;;  %v9104_v10 = vld [vmem:[#allocation9_spill] sm:$0xff]  ;;  %v9105_v29 = vld [vmem:[#allocation58_spill] sm:$0xff] }
  0xdc   : > { %685 = vmatpush.msra.mxu3 %v4466_v57  ;;  %676 = vmatpush.msra.mxu2 %v4391_v35  ;;  %v4437_v35 = vunpack.i.h.bf16 %v6524_v36 }
  0xdd   : > { %4674 = vrot.lane.b32.xlu2 %v6054_v16, %s5939_s26  ;;  %4669 = vrot.lane.b32.xlu1 %v6018_v7, %s5939_s26  ;;  %v4457_v16 = vunpack.i.h.bf16 %v6492_v15  ;;  %v4456_v7 = vunpack.i.l.bf16 %v6492_v15 }
  0xde   : > { %v6582_v22 = vpop.permute.xlu2 %4519  ;;  %4664 = vrot.lane.b32.xlu0 %v9103_v32, %s5939_s26  ;;  %686 = vmatpush.msra.mxu3 %v4462_v23  ;;  %v4088_v23 = vld [vmem:[%s8928_s1 + $0x88] sm:$0xff]  ;;  %v9119_v32 = vld [vmem:[#allocation13_spill] sm:$0xff] }
  0xdf   : > { %v4480_v56 = vpop.permute.xlu1 %4479  ;;  %677 = vmatmul.f32.vlgmr.msra.gmra.mxu2 %v4083_v34  ;;  %743 = vmatpush.msrb.mxu1 %v9104_v10  ;;  %v4432_v10 = vunpack.i.h.bf16 %v6526_v40 }
  0xe0   : > { %v4475_v24 = vpop.permute.xlu0 %4474  ;;  %821 = vmatpush.msrb.mxu0 %v9105_v29  ;;  %687 = vmatpush.msra.mxu3 %v4461_v52  ;;  %v4482_v41 = vunpack.i.h.bf16 %v4480_v56  ;;  %v4481_v2 = vunpack.i.l.bf16 %v4480_v56  ;;  %v4436_v56 = vunpack.i.l.bf16 %v6524_v36  ;;  %v9120_v52 = vld [vmem:[#allocation12_spill] sm:$0xff] }
  0xe1   : > { %744 = vmatpush.msrb.mxu1 %v9106_v63  ;;  %v4477_v57 = vunpack.i.h.bf16 %v4475_v24  ;;  %v4476_v34 = vunpack.i.l.bf16 %v4475_v24  ;;  %v9121_v29 = vld [vmem:[#allocation36_spill] sm:$0xff]  ;;  %v4471_v63 = vunpack.i.l.bf16 %v6508_v25 }
  0xe2   : > { %822 = vmatpush.msrb.mxu0 %v9107_v37  ;;  %688 = vmatpush.msra.mxu3 %v4457_v16  ;;  %v9122_v16 = vld [vmem:[#allocation25_spill] sm:$0xff]  ;;  %v4085_v25 = vld [vmem:[%s8928_s1 + $0x70] sm:$0xff] }
  0xe3   : > { %745 = vmatpush.msrb.mxu1 %v9108_v1  ;;  %v4431_v1 = vunpack.i.l.bf16 %v6526_v40  ;;  %v4084_v40 = vld [vmem:[%s8928_s1 + $0x68] sm:$0xff] }
  0xe4   : > { %689 = vmatpush.msra.mxu3 %v4456_v7  ;;  %v9123_v7 = vld [vmem:[#allocation26_spill] sm:$0xff] }
  0xe5   : > { %4689 = vrot.lane.b32.xlu2 %v9109_v42, %s5939_s26  ;;  %4684 = vrot.lane.b32.xlu1 %v9110_v53, %s5939_s26  ;;  %v9124_v42 = vld [vmem:[#allocation8_spill] sm:$0xff] }
  0xe6   : > { %v6598_v26 = vpop.permute.xlu2 %4534  ;;  %4679 = vrot.lane.b32.xlu0 %v9111_v33, %s5939_s26  ;;  %690 = vmatpush.msra.mxu3 %v4452_v18  ;;  %v9125_v18 = vld [vmem:[#allocation42_spill] sm:$0xff]  ;;  %v9126_v53 = vld [vmem:[#allocation52_spill] sm:$0xff]  ;;  %v9127_v33 = vld [vmem:[#allocation41_spill] sm:$0xff] }
  0xe7   : > { %v6604_v3 = vpop.permute.xlu1 %4484  ;;  %746 = vmatpush.msrb.mxu1 %v9112_v9  ;;  %680 = vmatmul.f32.gmra.mxu2 %v4088_v23  ;;  %v9130_v9 = vld [vmem:[#allocation29_spill] sm:$0xff] }
  0xe8   : > { %v533_v15 = vpop.permute.xlu0 %532  ;;  %691 = vmatpush.msra.mxu3 %v4451_v14  ;;  %v9129_v14 = vld [vmem:[#allocation51_spill] sm:$0xff] }
  0xe9   : > { %4091 = vmatpush.msk.msrb.mxu2 %vm612_vm0, %v533_v15  ;;  %747 = vmatpush.msrb.mxu1 %v9113_v48  ;;  %v9128_v15 = vld [vmem:[#allocation7_spill] sm:$0xff]  ;;  %v9132_v48 = vld [vmem:[#allocation34_spill] sm:$0xff] }
  0xea   : > { %692 = vmatpush.msra.mxu3 %v4447_v44 }
  0xeb   : > { %716 = vmatpush.msrb.mxu2 %v6522_v49  ;;  %748 = vmatpush.msrb.mxu1 %v9114_v5  ;;  %v9116_v49 = vld [vmem:[#allocation16_spill] sm:$0xff] }
  0xec   : > { %693 = vmatpush.msra.mxu3 %v4446_v11 }
  0xed   : > { %717 = vmatpush.msrb.mxu2 %v4482_v41  ;;  %4704 = vrot.lane.b32.xlu2 %v9115_v17, %s5939_s26  ;;  %v9131_v41 = vld [vmem:[#allocation44_spill] sm:$0xff]  ;;  %v9133_v17 = vld [vmem:[#allocation35_spill] sm:$0xff] }
  0xee   : > { %v6617_v21 = vpop.permute.xlu2 %4549  ;;  %4699 = vrot.lane.b32.xlu1 %v9116_v49, %s5939_s26  ;;  %4694 = vrot.lane.b32.xlu0 %v9117_v45, %s5939_s26  ;;  %v9136_v49 = vld [vmem:[#allocation31_spill] sm:$0xff]  ;;  %v9137_v45 = vld [vmem:[#allocation53_spill] sm:$0xff] }
  0xef   : > { %v6623_v20 = vpop.permute.xlu1 %4499  ;;  %694 = vmatpush.msra.mxu3 %v4442_v50  ;;  %718 = vmatpush.msrb.mxu2 %v4481_v2  ;;  %v9134_v50 = vld [vmem:[#allocation28_spill] sm:$0xff]  ;;  %v9135_v2 = vld [vmem:[#allocation54_spill] sm:$0xff] }
  0xf0   : > { %v6625_v43 = vpop.permute.xlu0 %4494  ;;  %749 = vmatpush.msrb.mxu1 %v9118_v8  ;;  %v9140_v8 = vld [vmem:[#allocation33_spill] sm:$0xff] }
  0xf1   : > { %695 = vmatpush.msra.mxu3 %v4441_v59  ;;  %719 = vmatpush.msrb.mxu2 %v4477_v57  ;;  %v9138_v59 = vld [vmem:[#allocation30_spill] sm:$0xff]  ;;  %v9139_v57 = vld [vmem:[#allocation56_spill] sm:$0xff] }
  0xf2   : > { %750 = vmatpush.msrb.mxu1 %v9119_v32 }
  0xf3   : > { %696 = vmatpush.msra.mxu3 %v4437_v35  ;;  %720 = vmatpush.msrb.mxu2 %v4476_v34  ;;  %v9141_v34 = vld [vmem:[#allocation55_spill] sm:$0xff] }
  0xf4   : > { %751 = vmatpush.msrb.mxu1 %v9120_v52  ;;  %v9144_v52 = vld [vmem:[#allocation46_spill] sm:$0xff] }
  0xf5   : > { %697 = vmatpush.msra.mxu3 %v4436_v56  ;;  %721 = vmatpush.msrb.mxu2 %v4472_v0  ;;  %v9142_v56 = vld [vmem:[#allocation43_spill] sm:$0xff]  ;;  %v9143_v0 = vld [vmem:[#allocation32_spill] sm:$0xff] }
  0xf6   : > { %v6638_v24 = vpop.permute.xlu2 %4564  ;;  %4719 = vrot.lane.b32.xlu2 %v9121_v29, %s5939_s26  ;;  %4714 = vrot.lane.b32.xlu1 %v9122_v16, %s5939_s26  ;;  %v9145_v29 = vld [vmem:[#allocation20_spill] sm:$0xff]  ;;  %v9147_v16 = vld [vmem:[#allocation19_spill] sm:$0xff] }
  0xf7   : > { %v6645_v37 = vpop.permute.xlu1 %4514  ;;  %4709 = vrot.lane.b32.xlu0 %v9123_v7, %s5939_s26  ;;  %698 = vmatpush.msra.mxu3 %v4432_v10  ;;  %v4082_v10 = vld [vmem:[%s8928_s1 + $0x58] sm:$0xff]  ;;  %v9149_v7 = vld [vmem:[#allocation22_spill] sm:$0xff] }
  0xf8   : > { %v6647_v36 = vpop.permute.xlu0 %4509  ;;  %722 = vmatpush.msrb.mxu2 %v4471_v63  ;;  %752 = vmatpush.msrb.mxu1 %v9124_v42  ;;  %v9148_v63 = vld [vmem:[#allocation48_spill] sm:$0xff] }
  0xf9   : > { %699 = vmatpush.msra.mxu3 %v4431_v1  ;;  %4092 = vmatmul.msk.f32.vlgmr.msrb.gmra.mxu2 %vm605_vm1, %v4085_v25  ;;  %v9150_v1 = vld [vmem:[#allocation47_spill] sm:$0xff] }
  0xfa   : > { %761 = vmatpush.msra.mxu2 %v9125_v18  ;;  %753 = vmatpush.msrb.mxu1 %v9128_v15  ;;  %v9155_v15 = vld [vmem:[#allocation62_spill] sm:$0xff] }
  0xfb   : > { %784 = vmatpush.msrb.mxu3 %v9126_v53  ;;  %654 = vmatmul.f32.vlgmr.msra.gmra.mxu1 %v4082_v10  ;;  %v9152_v53 = vld [vmem:[#allocation50_spill] sm:$0xff]  ;;  %v9164_v10 = vld [vmem:[#allocation60_spill] sm:$0xff] }
  0xfc   : > { %762 = vmatpush.msra.mxu2 %v9127_v33  ;;  %700 = vmatmul.f32.vlgmr.msra.gmra.mxu3 %v4084_v40  ;;  %v4087_v33 = vld [vmem:[%s8928_s1 + $0x80] sm:$0xff]  ;;  %v9153_v40 = vld [vmem:[#allocation24_spill] sm:$0xff] }
  0xfd   : > { %785 = vmatpush.msrb.mxu3 %v9129_v14  ;;  %4094 = vmatpush.msk.msra.mxu1 %vm612_vm0, %v6414_v30  ;;  %v9151_v30 = vld [vmem:[#allocation21_spill] sm:$0xff] }
  0xfe   : > { %763 = vmatpush.msra.mxu2 %v9130_v9  ;;  %v6666_v44 = vpop.permute.xlu2 %4579  ;;  %4734 = vrot.lane.b32.xlu2 %v9131_v41, %s5939_s26  ;;  %v9158_v14 = vld [vmem:[#allocation61_spill] sm:$0xff]  ;;  %v6735_v9 = vld [vmem:[%s5992_s23 + $0x88] sm:$0xff] }
  0xff   : > { %4729 = vrot.lane.b32.xlu1 %v9132_v48, %s5939_s26  ;;  %v6672_v11 = vpop.permute.xlu1 %4529  ;;  %4724 = vrot.lane.b32.xlu0 %v9133_v17, %s5939_s26  ;;  %v9159_v48 = vld [vmem:[#allocation37_spill] sm:$0xff] }
 0x100   : > { %v6674_v5 = vpop.permute.xlu0 %4524  ;;  %764 = vmatpush.msra.mxu2 %v9134_v50  ;;  %786 = vmatpush.msrb.mxu3 %v9135_v2  ;;  %v4522_v50 = vunpack.i.h.bf16 %v6582_v22  ;;  %v6753_v2 = vld [vmem:[%s5992_s23 + $0x80] sm:$0xff] }
 0x101   : > { %839 = vmatpush.msra.mxu1 %v6397_v4 }
 0x102   : > { %765 = vmatpush.msra.mxu2 %v9136_v49  ;;  %787 = vmatpush.msrb.mxu3 %v9137_v45  ;;  %v9160_v49 = vld [vmem:[#allocation40_spill] sm:$0xff]  ;;  %v4521_v45 = vunpack.i.l.bf16 %v6582_v22 }
 0x103   : > { %840 = vmatpush.msra.mxu1 %v9155_v15  ;;  %v4497_v15 = vunpack.i.h.bf16 %v6625_v43 }
 0x104   : > { %766 = vmatpush.msra.mxu2 %v9138_v59  ;;  %788 = vmatpush.msrb.mxu3 %v9139_v57  ;;  %v9162_v57 = vld [vmem:[#allocation39_spill] sm:$0xff] }
 0x105   : > { %657 = vmatmul.f32.gmra.mxu1 %v4087_v33 }
 0x106   : > { %767 = vmatpush.msra.mxu2 %v9140_v8  ;;  %v6685_v35 = vpop.permute.xlu2 %4594  ;;  %789 = vmatpush.msrb.mxu3 %v9141_v34  ;;  %v4517_v8 = vunpack.i.h.bf16 %v6645_v37  ;;  %v4516_v34 = vunpack.i.l.bf16 %v6645_v37  ;;  %v4552_v37 = vunpack.i.h.bf16 %v6617_v21 }
 0x107   : > { %4749 = vrot.lane.b32.xlu2 %v6232_v62, %s5939_s26  ;;  %v6690_v23 = vpop.permute.xlu1 %4544  ;;  %4744 = vrot.lane.b32.xlu1 %v6188_v51, %s5939_s26  ;;  %v9146_v62 = vld [vmem:[#allocation45_spill] sm:$0xff]  ;;  %v4081_v51 = vld [vmem:[%s8928_s1 + $0x50] sm:$0xff] }
 0x108   : > { %v6692_v32 = vpop.permute.xlu0 %4539  ;;  %4739 = vrot.lane.b32.xlu0 %v9142_v56, %s5939_s26  ;;  %768 = vmatpush.msra.mxu2 %v9143_v0  ;;  %v4546_v33 = vunpack.i.l.bf16 %v6690_v23 }
 0x109   : > { %790 = vmatpush.msrb.mxu3 %v9144_v52  ;;  %631 = vmatmul.f32.vlgmr.msra.gmra.mxu0 %v4081_v51 }
 0x10a   : > { %769 = vmatpush.msra.mxu2 %v9145_v29  ;;  %841 = vmatpush.msra.mxu1 %v9158_v14  ;;  %v4512_v29 = vunpack.i.h.bf16 %v6647_v36  ;;  %v4496_v14 = vunpack.i.l.bf16 %v6625_v43  ;;  %v4596_v43 = vunpack.i.l.bf16 %v6685_v35 }
 0x10b   : > { %791 = vmatpush.msrb.mxu3 %v9146_v62 }
 0x10c   : > { %770 = vmatpush.msra.mxu2 %v9147_v16  ;;  %v4511_v16 = vunpack.i.l.bf16 %v6647_v36  ;;  %v4506_v36 = vunpack.i.l.bf16 %v6562_v38 }
 0x10d   : > { %792 = vmatpush.msrb.mxu3 %v9148_v63  ;;  %v4090_v63 = vld [vmem:[%s8928_s1 + $0x98] sm:$0xff] }
 0x10e   : > { %771 = vmatpush.msra.mxu2 %v9149_v7  ;;  %v6714_v42 = vpop.permute.xlu2 %4609  ;;  %v9165_v7 = vld [vmem:[#allocation59_spill] sm:$0xff] }
 0x10f   : > { %793 = vmatpush.msrb.mxu3 %v9150_v1  ;;  %v4560_v18 = vpop.permute.xlu1 %4559  ;;  %4764 = vrot.lane.b32.xlu2 %v6268_v58, %s5939_s26  ;;  %v9154_v58 = vld [vmem:[#allocation49_spill] sm:$0xff]  ;;  %v4547_v1 = vunpack.i.h.bf16 %v6690_v23  ;;  %v298_v23 = vld [vmem:[%s8928_s1 + $0x8] sm:$0xff] }
 0x110   : > { %4759 = vrot.lane.b32.xlu1 %v6224_v60, %s5939_s26  ;;  %v4555_v25 = vpop.permute.xlu0 %4554  ;;  %4754 = vrot.lane.b32.xlu0 %v6228_v61, %s5939_s26  ;;  %v9156_v60 = vld [vmem:[#allocation23_spill] sm:$0xff]  ;;  %v9157_v61 = vld [vmem:[#allocation38_spill] sm:$0xff]  ;;  %v4562_v59 = vunpack.i.h.bf16 %v4560_v18 }
 0x111   : > { %772 = vmatpush.msra.mxu2 %v9151_v30  ;;  %794 = vmatpush.msrb.mxu3 %v9152_v53  ;;  %v4557_v56 = vunpack.i.h.bf16 %v4555_v25  ;;  %v4556_v62 = vunpack.i.l.bf16 %v4555_v25 }
 0x112   : > { %4093 = vmatmul.msk.f32.gmra.mxu2 %vm605_vm1, %v4090_v63 }
 0x113   : > { %773 = vmatpush.msra.mxu2 %v9153_v40  ;;  %795 = vmatpush.msrb.mxu3 %v9154_v58  ;;  %v4542_v40 = vunpack.i.h.bf16 %v6692_v32 }
 0x115   : > { %774 = vmatpush.msra.mxu2 %v9156_v60  ;;  %796 = vmatpush.msrb.mxu3 %v9157_v61  ;;  %v4537_v61 = vunpack.i.h.bf16 %v6598_v26 }
 0x116   : > { %v6738_v4 = vpop.permute.xlu2 %4624 }
 0x117   : > { %775 = vmatpush.msra.mxu2 %v6735_v9  ;;  %v6740_v41 = vpop.permute.xlu1 %4574  ;;  %797 = vmatpush.msrb.mxu3 %v9159_v48 }
 0x118   : > { %4779 = vrot.lane.b32.xlu2 %v6304_v28, %s5939_s26  ;;  %v6745_v17 = vpop.permute.xlu0 %4569  ;;  %4774 = vrot.lane.b32.xlu1 %v6260_v46, %s5939_s26  ;;  %v9161_v28 = vld [vmem:[#allocation64_spill] sm:$0xff]  ;;  %v4561_v46 = vunpack.i.l.bf16 %v4560_v18 }
 0x119   : > { %4769 = vrot.lane.b32.xlu0 %v6264_v31, %s5939_s26  ;;  %776 = vmatpush.msra.mxu2 %v6753_v2  ;;  %v9163_v31 = vld [vmem:[#allocation63_spill] sm:$0xff] }
 0x11a   : > { %798 = vmatpush.msrb.mxu3 %v9160_v49  ;;  %842 = vmatpush.msra.mxu1 %v9161_v28  ;;  %v4536_v49 = vunpack.i.l.bf16 %v6598_v26  ;;  %v4487_v28 = vunpack.i.h.bf16 %v6604_v3 }
 0x11b   : > { %1087 = vmatpush.msrb.mxu2 %v4522_v50  ;;  %v4492_v50 = vunpack.i.h.bf16 %v6542_v55 }
 0x11c   : > { %799 = vmatpush.msrb.mxu3 %v9162_v57  ;;  %843 = vmatpush.msra.mxu1 %v9163_v31  ;;  %v4527_v31 = vunpack.i.h.bf16 %v6674_v5 }
 0x11d   : > { %1088 = vmatpush.msrb.mxu2 %v4521_v45 }
 0x11e   : > { %1110 = vmatpush.msra.mxu3 %v4562_v59  ;;  %v4640_v0 = vpop.permute.xlu2 %4639  ;;  %844 = vmatpush.msra.mxu1 %v9164_v10  ;;  %v4532_v59 = vunpack.i.h.bf16 %v6672_v11 }
 0x11f   : > { %1089 = vmatpush.msrb.mxu2 %v4517_v8  ;;  %v6763_v22 = vpop.permute.xlu1 %4589  ;;  %v4642_v51 = vunpack.i.h.bf16 %v4640_v0  ;;  %v4641_v25 = vunpack.i.l.bf16 %v4640_v0  ;;  %v5755_v8 = vld [vmem:[%s5992_s23 + $0x228] sm:$0xff]  ;;  %v4526_v0 = vunpack.i.l.bf16 %v6674_v5 }
 0x120   : > { %1111 = vmatpush.msra.mxu3 %v4561_v46  ;;  %4794 = vrot.lane.b32.xlu2 %v6340_v47, %s5939_s26  ;;  %v6767_v52 = vpop.permute.xlu0 %4584  ;;  %v297_v47 = vld [vmem:[%s8928_s1] sm:$0xff]  ;;  %v4592_v26 = vunpack.i.h.bf16 %v6763_v22  ;;  %v4591_v57 = vunpack.i.l.bf16 %v6763_v22  ;;  %v4486_v46 = vunpack.i.l.bf16 %v6604_v3 }
 0x121   : > { %1090 = vmatpush.msrb.mxu2 %v4516_v34  ;;  %4789 = vrot.lane.b32.xlu1 %v6296_v27, %s5939_s26  ;;  %v4507_v27 = vunpack.i.h.bf16 %v6562_v38  ;;  %v6843_v34 = vld [vmem:[%s5992_s23 + $0x238] sm:$0x3]  ;;  %v4587_v22 = vunpack.i.h.bf16 %v6767_v52  ;;  %v4586_v5 = vunpack.i.l.bf16 %v6767_v52  ;;  %v5760_v52 = vld [vmem:[%s5992_s23 + $0x10] sm:$0xff] }
 0x122   : > { %1112 = vmatpush.msra.mxu3 %v4557_v56  ;;  %4784 = vrot.lane.b32.xlu0 %v6300_v54, %s5939_s26  ;;  %v4551_v54 = vunpack.i.l.bf16 %v6617_v21  ;;  %v4502_v21 = vunpack.i.h.bf16 %v6623_v20 }
 0x123   : > { %1091 = vmatpush.msrb.mxu2 %v4512_v29  ;;  %845 = vmatpush.msra.mxu1 %v9165_v7  ;;  %v6852_v29 = vld [vmem:[%s5992_s23 + $0x230] sm:$0xff] }
 0x124   : > { %1113 = vmatpush.msra.mxu3 %v4556_v62  ;;  %754 = vmatmul.f32.vlgmr.msrb.gmra.mxu1 %v297_v47  ;;  %v5759_v47 = vld [vmem:[%s5992_s23 + $0x28] sm:$0xff] }
 0x125   : > { %1092 = vmatpush.msrb.mxu2 %v4511_v16  ;;  %1156 = vmatpush.msrb.mxu1 %v4642_v51  ;;  %v5758_v16 = vld [vmem:[%s5992_s23 + $0x20] sm:$0xff]  ;;  %v4582_v51 = vunpack.i.h.bf16 %v6666_v44 }
 0x126   : > { %1114 = vmatpush.msra.mxu3 %v4552_v37  ;;  %v6793_v30 = vpop.permute.xlu2 %4654  ;;  %777 = vmatmul.f32.vlgmr.msra.gmra.mxu2 %v298_v23  ;;  %v4089_v37 = vld [vmem:[%s8928_s1 + $0x90] sm:$0xff]  ;;  %v6864_v63 = vpack.i.bf16 %v5759_v47, %v5758_v16  ;;  %v4576_v23 = vunpack.i.l.bf16 %v6740_v41 }
 0x127   : > { %1093 = vmatpush.msrb.mxu2 %v4507_v27  ;;  %v6789_v18 = vpop.permute.xlu1 %4604  ;;  %1157 = vmatpush.msrb.mxu1 %v4641_v25  ;;  %v5761_v27 = vld [vmem:[%s5992_s23 + $0x18] sm:$0xff] }
 0x128   : > { %1115 = vmatpush.msra.mxu3 %v4551_v54  ;;  %4809 = vrot.lane.b32.xlu2 %v6376_v13, %s5939_s26  ;;  %v4600_v53 = vpop.permute.xlu0 %4599  ;;  %v4501_v13 = vunpack.i.l.bf16 %v6623_v20  ;;  %v6810_v20 = vld [vmem:[%s5992_s23 + $0x200] sm:$0xff]  ;;  %v6869_v54 = vpack.i.bf16 %v5761_v27, %v5760_v52  ;;  %v4606_v27 = vunpack.i.l.bf16 %v6789_v18 }
 0x129   : > { %1094 = vmatpush.msrb.mxu2 %v4506_v36  ;;  %v4602_v38 = vunpack.i.h.bf16 %v4600_v53  ;;  %4804 = vrot.lane.b32.xlu1 %v6332_v19, %s5939_s26  ;;  %v4601_v58 = vunpack.i.l.bf16 %v4600_v53  ;;  %v4541_v19 = vunpack.i.l.bf16 %v6692_v32  ;;  %v4818_v60 = vpack.i.bf16 %v9164_v10, %v6810_v20  ;;  %v5762_v36 = vld [vmem:[%s5992_s23] sm:$0xff] }
 0x12a   : > { %1116 = vmatpush.msra.mxu3 %v4547_v1  ;;  %4799 = vrot.lane.b32.xlu0 %v6336_v39, %s5939_s26  ;;  %v4597_v39 = vunpack.i.h.bf16 %v6685_v35  ;;  %v4531_v35 = vunpack.i.l.bf16 %v6672_v11  ;;  %v5763_v1 = vld [vmem:[%s5992_s23 + $0x8] sm:$0xff]  ;;  %v4581_v53 = vunpack.i.l.bf16 %v6666_v44  ;;  %v4627_v44 = vunpack.i.h.bf16 %v6738_v4 }
 0x12b   : > { %1095 = vmatpush.msrb.mxu2 %v4502_v21  ;;  %1133 = vmatpush.msra.mxu0 %v4602_v38  ;;  %v6873_v25 = vpack.i.bf16 %v5763_v1, %v5762_v36  ;;  %v4577_v38 = vunpack.i.h.bf16 %v6740_v41  ;;  %v4572_v41 = vunpack.i.h.bf16 %v6745_v17  ;;  %v5776_v1 = vld [vmem:[%s5992_s23 + $0xa0] sm:$0xff] }
 0x12c   : > { %1117 = vmatpush.msra.mxu3 %v4546_v33 }
 0x12d   : > { %1096 = vmatpush.msrb.mxu2 %v4501_v13  ;;  %1134 = vmatpush.msra.mxu0 %v4601_v58  ;;  %v299_v58 = vld [vmem:[%s8928_s1 + $0x10] sm:$0xff] }
 0x12e   : > { %1118 = vmatpush.msra.mxu3 %v4542_v40  ;;  %v6818_v32 = vpop.permute.xlu2 %4659 }
 0x12f   : > { %1097 = vmatpush.msrb.mxu2 %v4497_v15  ;;  %1135 = vmatpush.msra.mxu0 %v4597_v39  ;;  %v6820_v48 = vpop.permute.xlu1 %4619  ;;  %v6895_v15 = vld [vmem:[%s5992_s23 + $0x50] sm:$0xff] }
 0x130   : > { %1119 = vmatpush.msra.mxu3 %v4541_v19  ;;  %4824 = vrot.lane.b32.xlu2 %v6405_v12, %s5939_s26  ;;  %v6824_v45 = vpop.permute.xlu0 %4614  ;;  %v4491_v12 = vunpack.i.l.bf16 %v6542_v55  ;;  %9166 = vst [vmem:[#allocation15_spill] sm:$0xff] %v6895_v15  ;;  %v6898_v19 = vld [vmem:[%s5992_s23 + $0x58] sm:$0xff] }
 0x131   : > { %1098 = vmatpush.msrb.mxu2 %v4496_v14  ;;  %4819 = vrot.lane.b32.xlu1 %v4818_v60, %s5939_s26  ;;  %v6902_v39 = vpack.i.bf16 %v6898_v19, %v6895_v15  ;;  %v4626_v60 = vunpack.i.l.bf16 %v6738_v4  ;;  %v5767_v14 = vld [vmem:[%s5992_s23 + $0x48] sm:$0xff]  ;;  %v7172_v15 = vld [vmem:[%s5992_s23 + $0x190] sm:$0xff] }
 0x132   : > { %1120 = vmatpush.msra.mxu3 %v4537_v61  ;;  %4814 = vrot.lane.b32.xlu0 %v6372_v6, %s5939_s26  ;;  %v5754_v6 = vld [vmem:[%s5992_s23 + $0x220] sm:$0xff]  ;;  %9181 = vst [vmem:[#allocation4_spill] sm:$0xff] %v7172_v15 }
 0x133   : > { %1099 = vmatpush.msrb.mxu2 %v4492_v50  ;;  %1136 = vmatpush.msra.mxu0 %v4596_v43  ;;  %v6838_v55 = vpack.i.bf16 %v5755_v8, %v5754_v6  ;;  %v6907_v61 = vld [vmem:[%s5992_s23 + $0x40] sm:$0xff]  ;;  %v5769_v43 = vld [vmem:[%s5992_s23 + $0x38] sm:$0xff]  ;;  %v4566_v8 = vunpack.i.l.bf16 %v6638_v24 }
 0x134   : > { %1121 = vmatpush.msra.mxu3 %v4536_v49  ;;  %9167 = vst [vmem:[#allocation9_spill] sm:$0xff] %v6907_v61  ;;  %v6911_v50 = vpack.i.bf16 %v5767_v14, %v6907_v61  ;;  %v5768_v49 = vld [vmem:[%s5992_s23 + $0x30] sm:$0xff] }
 0x135   : > { %1100 = vmatpush.msrb.mxu2 %v4491_v12  ;;  %1137 = vmatpush.msra.mxu0 %v4592_v26  ;;  %v6915_v12 = vpack.i.bf16 %v5769_v43, %v5768_v49  ;;  %v4622_v26 = vunpack.i.h.bf16 %v6820_v48  ;;  %v7011_v43 = vld [vmem:[%s5992_s23 + $0xe0] sm:$0xff]  ;;  %v303_v61 = vld [vmem:[%s8928_s1 + $0x30] sm:$0xff] }
 0x136   : > { %1122 = vmatpush.msra.mxu3 %v4532_v59  ;;  %v4571_v59 = vunpack.i.l.bf16 %v6745_v17  ;;  %v4086_v17 = vld [vmem:[%s8928_s1 + $0x78] sm:$0xff]  ;;  %9170 = vst [vmem:[#allocation57_spill] sm:$0xff] %v7011_v43  ;;  %780 = vmatmul.f32.gmra.mxu2 %v303_v61 }
 0x137   : > { %1101 = vmatpush.msrb.mxu2 %v4487_v28  ;;  %1138 = vmatpush.msra.mxu0 %v4591_v57  ;;  %v6847_v11 = vpop.permute.xlu2 %4674  ;;  %v4635_v56 = vpop.permute.xlu1 %4634  ;;  %v4567_v28 = vunpack.i.h.bf16 %v6638_v24  ;;  %v6942_v24 = vld [vmem:[%s5992_s23 + $0x70] sm:$0xff] }
 0x138   : > { %1123 = vmatpush.msra.mxu3 %v4531_v35  ;;  %1357 = vrot.lane.b32.xlu2 %v6843_v34, %s5939_s26  ;;  %v4637_v3 = vunpack.i.h.bf16 %v4635_v56  ;;  %v4630_v10 = vpop.permute.xlu0 %4629  ;;  %v4636_v62 = vunpack.i.l.bf16 %v4635_v56  ;;  %v4621_v35 = vunpack.i.l.bf16 %v6820_v48  ;;  %v4617_v48 = vunpack.i.h.bf16 %v6824_v45 }
 0x139   : > { %1102 = vmatpush.msrb.mxu2 %v4486_v46  ;;  %1355 = vrot.lane.b32.xlu1 %v6852_v29, %s5939_s26  ;;  %v4632_v7 = vunpack.i.h.bf16 %v4630_v10  ;;  %v4631_v13 = vunpack.i.l.bf16 %v4630_v10  ;;  %v6937_v46 = vpack.i.bf16 %v6735_v9, %v6753_v2  ;;  %v4657_v56 = vunpack.i.h.bf16 %v6793_v30  ;;  %v6955_v9 = vld [vmem:[%s5992_s23 + $0x68] sm:$0xff] }
 0x13a   : > { %1124 = vmatpush.msra.mxu3 %v4527_v31  ;;  %4829 = vrot.lane.b32.xlu0 %v6838_v55, %s5939_s26  ;;  %v4616_v31 = vunpack.i.l.bf16 %v6824_v45  ;;  %v4612_v45 = vunpack.i.h.bf16 %v6714_v42  ;;  %v4611_v10 = vunpack.i.l.bf16 %v6714_v42  ;;  %v300_v42 = vld [vmem:[%s8928_s1 + $0x18] sm:$0xff] }
 0x13b   : > { %1139 = vmatpush.msra.mxu0 %v4587_v22  ;;  %1158 = vmatpush.msrb.mxu1 %v4637_v3  ;;  %v6952_v3 = vld [vmem:[%s5992_s23 + $0x60] sm:$0xff] }
 0x13c   : > { %1125 = vmatpush.msra.mxu3 %v4526_v0  ;;  %634 = vmatmul.f32.gmra.mxu0 %v4086_v17  ;;  %v6945_v0 = vld [vmem:[%s5992_s23 + $0x78] sm:$0xff]  ;;  %9168 = vst [vmem:[#allocation58_spill] sm:$0xff] %v6952_v3  ;;  %v6959_v2 = vpack.i.bf16 %v6955_v9, %v6952_v3 }
 0x13d   : > { %703 = vmatmul.f32.gmra.mxu3 %v4089_v37  ;;  %1140 = vmatpush.msra.mxu0 %v4586_v5  ;;  %v6949_v22 = vpack.i.bf16 %v6945_v0, %v6942_v24  ;;  %v7253_v3 = vld [vmem:[%s5992_s23 + $0x1f8] sm:$0xff] }
 0x13e   : > { %1159 = vmatpush.msrb.mxu1 %v4636_v62  ;;  %v4656_v62 = vunpack.i.l.bf16 %v6793_v30  ;;  %v4607_v30 = vunpack.i.h.bf16 %v6789_v18 }
 0x13f   : > { %1141 = vmatpush.msra.mxu0 %v4582_v51  ;;  %v6878_v21 = vpop.permute.xlu2 %4689  ;;  %v6880_v33 = vpop.permute.xlu1 %4649  ;;  %v5774_v51 = vld [vmem:[%s5992_s23 + $0xb0] sm:$0xff] }
 0x140   : > { %4844 = vrot.lane.b32.xlu2 %v6864_v63, %s5940_s30  ;;  %1160 = vmatpush.msrb.mxu1 %v4632_v7  ;;  %v6883_v40 = vpop.permute.xlu0 %4644  ;;  %v4652_v47 = vunpack.i.h.bf16 %v6880_v33  ;;  %v6983_v7 = vld [vmem:[%s5992_s23 + $0xb8] sm:$0xff]  ;;  %v4651_v36 = vunpack.i.l.bf16 %v6880_v33 }
 0x141   : > { %1142 = vmatpush.msra.mxu0 %v4581_v53  ;;  %4839 = vrot.lane.b32.xlu1 %v6869_v54, %s5940_s30  ;;  %9169 = vst [vmem:[#allocation3_spill] sm:$0xff] %v6983_v7  ;;  %v6986_v52 = vpack.i.bf16 %v6983_v7, %v5774_v51  ;;  %v5777_v53 = vld [vmem:[%s5992_s23 + $0xa8] sm:$0xff]  ;;  %v4646_v18 = vunpack.i.l.bf16 %v6883_v40  ;;  %v7127_v7 = vld [vmem:[%s5992_s23 + $0x160] sm:$0xff] }
 0x142   : > { %4834 = vrot.lane.b32.xlu0 %v6873_v25, %s5940_s30  ;;  %1161 = vmatpush.msrb.mxu1 %v4631_v13  ;;  %v5778_v13 = vld [vmem:[%s5992_s23 + $0x90] sm:$0xff]  ;;  %v5789_v51 = vld [vmem:[%s5992_s23 + $0x108] sm:$0xff] }
 0x143   : > { %1143 = vmatpush.msra.mxu0 %v4577_v38  ;;  %v6992_v38 = vpack.i.bf16 %v5777_v53, %v5776_v1  ;;  %v7065_v1 = vld [vmem:[%s5992_s23 + $0xf8] sm:$0xff] }
 0x144   : > { %1162 = vmatpush.msrb.mxu1 %v4627_v44  ;;  %823 = vmatmul.f32.vlgmr.msrb.gmra.mxu0 %v300_v42  ;;  %v5779_v44 = vld [vmem:[%s5992_s23 + $0x98] sm:$0xff]  ;;  %v302_v42 = vld [vmem:[%s8928_s1 + $0x28] sm:$0xff] }
 0x145   : > { %800 = vmatmul.f32.vlgmr.msrb.gmra.mxu3 %v299_v58  ;;  %1144 = vmatpush.msra.mxu0 %v4576_v23  ;;  %v6996_v23 = vpack.i.bf16 %v5779_v44, %v5778_v13  ;;  %v4647_v58 = vunpack.i.h.bf16 %v6883_v40  ;;  %v7014_v40 = vld [vmem:[%s5992_s23 + $0xe8] sm:$0xff]  ;;  %v4692_v13 = vunpack.i.h.bf16 %v6878_v21  ;;  %v4691_v44 = vunpack.i.l.bf16 %v6878_v21  ;;  %v5792_v21 = vld [vmem:[%s5992_s23 + $0x140] sm:$0xff] }
 0x146   : > { %1163 = vmatpush.msrb.mxu1 %v4626_v60 }
 0x147   : > { %1145 = vmatpush.msra.mxu0 %v4572_v41  ;;  %v6921_v4 = vpop.permute.xlu2 %4704  ;;  %v1007_v57 = vpop.permute.xlu1 %1006  ;;  %757 = vmatmul.f32.gmra.mxu1 %v302_v42  ;;  %v5795_v42 = vld [vmem:[%s5992_s23 + $0x138] sm:$0xff] }
 0x148   : > { %4859 = vrot.lane.b32.xlu2 %v6902_v39, %s5940_s30  ;;  %1164 = vmatpush.msrb.mxu1 %v4622_v26  ;;  %v1005_v6 = vpop.permute.xlu0 %1004  ;;  %v7021_v26 = vld [vmem:[%s5992_s23 + $0xd0] sm:$0xff] }
 0x149   : > { %1146 = vmatpush.msra.mxu0 %v4571_v59  ;;  %4854 = vrot.lane.b32.xlu1 %v6911_v50, %s5940_s30  ;;  %v7018_v59 = vpack.i.bf16 %v7014_v40, %v7011_v43  ;;  %9171 = vst [vmem:[#allocation2_spill] sm:$0xff] %v7021_v26  ;;  %v7180_v43 = vld [vmem:[%s5992_s23 + $0x180] sm:$0xff] }
 0x14a   : > { %4849 = vrot.lane.b32.xlu0 %v6915_v12, %s5940_s30  ;;  %1165 = vmatpush.msrb.mxu1 %v4621_v35  ;;  %9183 = vst [vmem:[#allocation12_spill] sm:$0xff] %v7180_v43 }
 0x14b   : > { %1147 = vmatpush.msra.mxu0 %v4567_v28  ;;  %4107 = vmatpush.msk.msra.mxu2 %vm612_vm0, %v1007_v57  ;;  %v7024_v28 = vld [vmem:[%s5992_s23 + $0xd8] sm:$0xff]  ;;  %v7031_v57 = vld [vmem:[%s5992_s23 + $0xc0] sm:$0xff] }
 0x14c   : > { %1166 = vmatpush.msrb.mxu1 %v4617_v48  ;;  %9172 = vst [vmem:[#allocation18_spill] sm:$0xff] %v7024_v28  ;;  %v7028_v35 = vpack.i.bf16 %v7024_v28, %v7021_v26  ;;  %v7250_v28 = vld [vmem:[%s5992_s23 + $0x1f0] sm:$0xff] }
 0x14d   : > { %1148 = vmatpush.msra.mxu0 %v4566_v8  ;;  %1188 = vmatpush.msra.mxu2 %v1005_v6  ;;  %9173 = vst [vmem:[#allocation14_spill] sm:$0xff] %v7031_v57  ;;  %v7034_v6 = vld [vmem:[%s5992_s23 + $0xc8] sm:$0xff] }
 0x14e   : > { %1167 = vmatpush.msrb.mxu1 %v4616_v31  ;;  %9174 = vst [vmem:[#allocation5_spill] sm:$0xff] %v7034_v6  ;;  %v7038_v17 = vpack.i.bf16 %v7034_v6, %v7031_v57  ;;  %v7138_v6 = vld [vmem:[%s5992_s23 + $0x158] sm:$0xff] }
 0x14f   : > { %1189 = vmatpush.msra.mxu2 %v4657_v56  ;;  %v6968_v37 = vpop.permute.xlu1 %4669  ;;  %9178 = vst [vmem:[#allocation27_spill] sm:$0xff] %v7138_v6 }
 0x150   : > { %4874 = vrot.lane.b32.xlu2 %v6937_v46, %s5940_s30  ;;  %1168 = vmatpush.msrb.mxu1 %v4612_v45  ;;  %v6966_v5 = vpop.permute.xlu2 %4719  ;;  %v6974_v16 = vpop.permute.xlu0 %4664  ;;  %v5786_v45 = vld [vmem:[%s5992_s23 + $0x110] sm:$0xff] }
 0x151   : > { %4869 = vrot.lane.b32.xlu1 %v6949_v22, %s5940_s30  ;;  %1190 = vmatpush.msra.mxu2 %v4656_v62  ;;  %v4666_v26 = vunpack.i.l.bf16 %v6974_v16 }
 0x152   : > { %4864 = vrot.lane.b32.xlu0 %v6959_v2, %s5940_s30  ;;  %1169 = vmatpush.msrb.mxu1 %v4611_v10  ;;  %v5787_v10 = vld [vmem:[%s5992_s23 + $0x118] sm:$0xff] }
 0x153   : > { %1191 = vmatpush.msra.mxu2 %v4652_v47  ;;  %v7052_v62 = vpack.i.bf16 %v5787_v10, %v5786_v45  ;;  %v5788_v47 = vld [vmem:[%s5992_s23 + $0x100] sm:$0xff]  ;;  %v5794_v10 = vld [vmem:[%s5992_s23 + $0x130] sm:$0xff] }
 0x154   : > { %1170 = vmatpush.msrb.mxu1 %v4607_v30 }
 0x155   : > { %1192 = vmatpush.msra.mxu2 %v4651_v36  ;;  %v7062_v36 = vld [vmem:[%s5992_s23 + $0xf0] sm:$0xff] }
 0x156   : > { %1171 = vmatpush.msrb.mxu1 %v4606_v27  ;;  %v7059_v27 = vpack.i.bf16 %v5789_v51, %v5788_v47  ;;  %9175 = vst [vmem:[#allocation11_spill] sm:$0xff] %v7062_v36  ;;  %v7069_v53 = vpack.i.bf16 %v7065_v1, %v7062_v36  ;;  %v5796_v47 = vld [vmem:[%s5992_s23 + $0x120] sm:$0xff]  ;;  %v5797_v51 = vld [vmem:[%s5992_s23 + $0x128] sm:$0xff]  ;;  %v4988_v36 = vpack.i.bf16 %v7253_v3, %v7250_v28 }
 0x157   : > { %1193 = vmatpush.msra.mxu2 %v4647_v58  ;;  %v7002_v60 = vpop.permute.xlu1 %4684 }
 0x158   : > { %4889 = vrot.lane.b32.xlu2 %v6986_v52, %s5940_s30  ;;  %v4735_v33 = vpop.permute.xlu2 %4734  ;;  %v7008_v49 = vpop.permute.xlu0 %4679  ;;  %v4686_v45 = vunpack.i.l.bf16 %v7002_v60 }
 0x159   : > { %4884 = vrot.lane.b32.xlu1 %v6992_v38, %s5940_s30  ;;  %v4737_v41 = vunpack.i.h.bf16 %v4735_v33  ;;  %v4736_v14 = vunpack.i.l.bf16 %v4735_v33  ;;  %1194 = vmatpush.msra.mxu2 %v4646_v18 }
 0x15a   : > { %4879 = vrot.lane.b32.xlu0 %v6996_v23, %s5940_s30 }
 0x15b   : > { %1461 = vmatpush.msrb.mxu0 %v4737_v41  ;;  %v4687_v41 = vunpack.i.h.bf16 %v7002_v60  ;;  %v4681_v60 = vunpack.i.l.bf16 %v7008_v49 }
 0x15d   : > { %1462 = vmatpush.msrb.mxu0 %v4736_v14  ;;  %v7088_v14 = vld [vmem:[%s5992_s23 + $0x148] sm:$0xff] }
 0x15e   : > { %9176 = vst [vmem:[#allocation10_spill] sm:$0xff] %v7088_v14 }
 0x160   : > { %4904 = vrot.lane.b32.xlu2 %v7018_v59, %s5940_s30  ;;  %v7044_v48 = vpop.permute.xlu1 %4699  ;;  %v4695_v31 = vpop.permute.xlu0 %4694 }
 0x161   : > { %v7042_v8 = vpop.permute.xlu2 %4749  ;;  %4899 = vrot.lane.b32.xlu1 %v7028_v35, %s5940_s30  ;;  %v4697_v56 = vunpack.i.h.bf16 %v4695_v31  ;;  %v4696_v30 = vunpack.i.l.bf16 %v4695_v31  ;;  %v7091_v31 = vpack.i.bf16 %v7088_v14, %v5792_v21 }
 0x162   : > { %4894 = vrot.lane.b32.xlu0 %v7038_v17, %s5940_s30 }
 0x163   : > { %1438 = vmatpush.msrb.mxu3 %v4697_v56  ;;  %v301_v56 = vld [vmem:[%s8928_s1 + $0x20] sm:$0xff] }
 0x164   : > { %4095 = vmatmul.msk.f32.vlgmr.msra.gmra.mxu1 %vm605_vm1, %v301_v56 }
 0x165   : > { %1439 = vmatpush.msrb.mxu3 %v4696_v30  ;;  %v7100_v30 = vpack.i.bf16 %v5795_v42, %v5794_v10  ;;  %v4677_v42 = vunpack.i.h.bf16 %v6847_v11 }
 0x167   : > { %1440 = vmatpush.msrb.mxu3 %v4692_v13  ;;  %v7104_v13 = vpack.i.bf16 %v5797_v51, %v5796_v47  ;;  %v7121_v47 = vld [vmem:[%s5992_s23 + $0x178] sm:$0xff] }
 0x168   : > { %4919 = vrot.lane.b32.xlu2 %v7052_v62, %s5940_s30  ;;  %v7075_v58 = vpop.permute.xlu1 %4714 }
 0x169   : > { %4914 = vrot.lane.b32.xlu1 %v7059_v27, %s5940_s30  ;;  %v7081_v18 = vpop.permute.xlu2 %4764  ;;  %v7083_v33 = vpop.permute.xlu0 %4709  ;;  %1441 = vmatpush.msrb.mxu3 %v4691_v44  ;;  %v4682_v44 = vunpack.i.h.bf16 %v7008_v49  ;;  %v7118_v49 = vld [vmem:[%s5992_s23 + $0x170] sm:$0xff] }
 0x16a   : > { %4909 = vrot.lane.b32.xlu0 %v7069_v53, %s5940_s30  ;;  %v4948_v51 = vpack.i.bf16 %v7121_v47, %v7118_v49 }
 0x16b   : > { %1442 = vmatpush.msrb.mxu3 %v4687_v41 }
 0x16d   : > { %1443 = vmatpush.msrb.mxu3 %v4686_v45 }
 0x16f   : > { %1444 = vmatpush.msrb.mxu3 %v4682_v44  ;;  %v4676_v44 = vunpack.i.l.bf16 %v6847_v11  ;;  %v4672_v11 = vunpack.i.h.bf16 %v6968_v37 }
 0x170   : > { %4934 = vrot.lane.b32.xlu2 %v7091_v31, %s5940_s30 }
 0x171   : > { %v4730_v41 = vpop.permute.xlu1 %4729  ;;  %4929 = vrot.lane.b32.xlu1 %v7100_v30, %s5940_s30  ;;  %v4725_v10 = vpop.permute.xlu0 %4724  ;;  %1445 = vmatpush.msrb.mxu3 %v4681_v60 }
 0x172   : > { %4924 = vrot.lane.b32.xlu0 %v7104_v13, %s5940_s30  ;;  %v7114_v21 = vpop.permute.xlu2 %4779  ;;  %v4732_v56 = vunpack.i.h.bf16 %v4730_v41  ;;  %v4731_v45 = vunpack.i.l.bf16 %v4730_v41  ;;  %v4727_v14 = vunpack.i.h.bf16 %v4725_v10  ;;  %v7130_v41 = vld [vmem:[%s5992_s23 + $0x168] sm:$0xff] }
 0x173   : > { %1446 = vmatpush.msrb.mxu3 %v4677_v42  ;;  %v4943_v60 = vpack.i.bf16 %v7130_v41, %v7127_v7  ;;  %v4726_v42 = vunpack.i.l.bf16 %v4725_v10  ;;  %v7159_v10 = vld [vmem:[%s5992_s23 + $0x1a0] sm:$0xff] }
 0x174   : > { %1463 = vmatpush.msrb.mxu0 %v4732_v56  ;;  %v7135_v56 = vld [vmem:[%s5992_s23 + $0x150] sm:$0xff]  ;;  %9179 = vst [vmem:[#allocation16_spill] sm:$0xff] %v7159_v10 }
 0x175   : > { %9177 = vst [vmem:[#allocation6_spill] sm:$0xff] %v7135_v56  ;;  %v7142_v57 = vpack.i.bf16 %v7138_v6, %v7135_v56  ;;  %1447 = vmatpush.msrb.mxu3 %v4676_v44  ;;  %v4722_v44 = vunpack.i.h.bf16 %v6966_v5 }
 0x176   : > { %1464 = vmatpush.msrb.mxu0 %v4731_v45  ;;  %v4671_v45 = vunpack.i.l.bf16 %v6968_v37 }
 0x177   : > { %1448 = vmatpush.msrb.mxu3 %v4672_v11  ;;  %v4721_v11 = vunpack.i.l.bf16 %v6966_v5 }
 0x178   : > { %4949 = vrot.lane.b32.xlu2 %v4948_v51, %s5940_s30  ;;  %1465 = vmatpush.msrb.mxu0 %v4727_v14  ;;  %v4667_v14 = vunpack.i.h.bf16 %v6974_v16  ;;  %v7162_v51 = vld [vmem:[%s5992_s23 + $0x1a8] sm:$0xff]  ;;  %v4662_v16 = vunpack.i.h.bf16 %v6818_v32 }
 0x179   : > { %4944 = vrot.lane.b32.xlu1 %v4943_v60, %s5940_s30  ;;  %v7152_v6 = vpop.permute.xlu1 %4744  ;;  %1449 = vmatpush.msrb.mxu3 %v4671_v45  ;;  %9180 = vst [vmem:[#allocation17_spill] sm:$0xff] %v7162_v51  ;;  %v4963_v60 = vpack.i.bf16 %v7162_v51, %v7159_v10  ;;  %v7175_v45 = vld [vmem:[%s5992_s23 + $0x198] sm:$0xff]  ;;  %v7183_v10 = vld [vmem:[%s5992_s23 + $0x188] sm:$0xff] }
 0x17a   : > { %4939 = vrot.lane.b32.xlu0 %v7142_v57, %s5940_s30  ;;  %v7150_v56 = vpop.permute.xlu2 %4794  ;;  %v7156_v37 = vpop.permute.xlu0 %4739  ;;  %1466 = vmatpush.msrb.mxu0 %v4726_v42  ;;  %9182 = vst [vmem:[#allocation13_spill] sm:$0xff] %v7175_v45  ;;  %v4958_v42 = vpack.i.bf16 %v7175_v45, %v7172_v15  ;;  %v4953_v5 = vpack.i.bf16 %v7183_v10, %v7180_v43  ;;  %v4716_v15 = vunpack.i.l.bf16 %v7075_v58  ;;  %v7217_v43 = vld [vmem:[%s5992_s23 + $0x1c0] sm:$0xff]  ;;  %v7228_v45 = vld [vmem:[%s5992_s23 + $0x1b8] sm:$0xff] }
 0x17b   : > { %1450 = vmatpush.msrb.mxu3 %v4667_v14  ;;  %9184 = vst [vmem:[#allocation36_spill] sm:$0xff] %v7183_v10  ;;  %v4661_v14 = vunpack.i.l.bf16 %v6818_v32  ;;  %v4712_v32 = vunpack.i.h.bf16 %v7083_v33  ;;  %v7220_v10 = vld [vmem:[%s5992_s23 + $0x1c8] sm:$0xff] }
 0x17c   : > { %1467 = vmatpush.msrb.mxu0 %v4722_v44  ;;  %v4717_v44 = vunpack.i.h.bf16 %v7075_v58  ;;  %9185 = vst [vmem:[#allocation25_spill] sm:$0xff] %v7217_v43 }
 0x17d   : > { %1451 = vmatpush.msrb.mxu3 %v4666_v26  ;;  %9187 = vst [vmem:[#allocation8_spill] sm:$0xff] %v7228_v45 }
 0x17e   : > { %1468 = vmatpush.msrb.mxu0 %v4721_v11  ;;  %v7205_v11 = vld [vmem:[%s5992_s23 + $0x1d0] sm:$0xff] }
 0x17f   : > { %1452 = vmatpush.msrb.mxu3 %v4662_v16  ;;  %v4711_v16 = vunpack.i.l.bf16 %v7083_v33  ;;  %v4707_v33 = vunpack.i.h.bf16 %v6921_v4 }
 0x180   : > { %4964 = vrot.lane.b32.xlu2 %v4963_v60, %s5940_s30  ;;  %1469 = vmatpush.msrb.mxu0 %v4717_v44  ;;  %v304_v60 = vld [vmem:[%s8928_s1 + $0x38] sm:$0xff]  ;;  %v4097_v44 = vld [vmem:[%s8928_s1 + $0xa0] sm:$0xff] }
 0x181   : > { %4959 = vrot.lane.b32.xlu1 %v4958_v42, %s5940_s30  ;;  %1453 = vmatpush.msrb.mxu3 %v4661_v14  ;;  %v7208_v42 = vld [vmem:[%s5992_s23 + $0x1d8] sm:$0xff]  ;;  %v7225_v14 = vld [vmem:[%s5992_s23 + $0x1b0] sm:$0xff] }
 0x182   : > { %4954 = vrot.lane.b32.xlu0 %v4953_v5, %s5940_s30  ;;  %v7194_v61 = vpop.permute.xlu2 %4809  ;;  %v7196_v26 = vpop.permute.xlu1 %4759  ;;  %1470 = vmatpush.msrb.mxu0 %v4716_v15  ;;  %v4978_v5 = vpack.i.bf16 %v7208_v42, %v7205_v11  ;;  %v4973_v15 = vpack.i.bf16 %v7220_v10, %v7217_v43  ;;  %9186 = vst [vmem:[#allocation26_spill] sm:$0xff] %v7225_v14  ;;  %v4767_v43 = vunpack.i.h.bf16 %v7081_v18 }
 0x183   : > { %v7202_v58 = vpop.permute.xlu0 %4754  ;;  %803 = vmatmul.f32.gmra.mxu3 %v304_v60  ;;  %v4968_v60 = vpack.i.bf16 %v7228_v45, %v7225_v14  ;;  %1103 = vmatmul.f32.vlgmr.msrb.gmra.mxu2 %v4097_v44  ;;  %v4098_v44 = vld [vmem:[%s8928_s1 + $0xa8] sm:$0xff]  ;;  %v4701_v45 = vunpack.i.l.bf16 %v7044_v48 }
 0x184   : > { %1471 = vmatpush.msrb.mxu0 %v4712_v32  ;;  %v4706_v32 = vunpack.i.l.bf16 %v6921_v4 }
 0x186   : > { %1472 = vmatpush.msrb.mxu0 %v4711_v16  ;;  %v4702_v16 = vunpack.i.h.bf16 %v7044_v48 }
 0x188   : > { %4979 = vrot.lane.b32.xlu2 %v4978_v5, %s5940_s30  ;;  %1473 = vmatpush.msrb.mxu0 %v4707_v33 }
 0x189   : > { %4974 = vrot.lane.b32.xlu1 %v4973_v15, %s5940_s30  ;;  %v7244_v15 = vld [vmem:[%s5992_s23 + $0x208] sm:$0xff] }
 0x18a   : > { %4969 = vrot.lane.b32.xlu0 %v4968_v60, %s5940_s30  ;;  %v7237_v51 = vpop.permute.xlu2 %4824  ;;  %v4775_v5 = vpop.permute.xlu1 %4774  ;;  %1474 = vmatpush.msrb.mxu0 %v4706_v32  ;;  %9188 = vst [vmem:[#allocation42_spill] sm:$0xff] %v7244_v15  ;;  %v4993_v60 = vpack.i.bf16 %v7244_v15, %v6810_v20  ;;  %v7258_v32 = vld [vmem:[%s5992_s23 + $0x1e0] sm:$0xff] }
 0x18b   : > { %v4770_v14 = vpop.permute.xlu0 %4769  ;;  %v4777_v4 = vunpack.i.h.bf16 %v4775_v5  ;;  %v4776_v33 = vunpack.i.l.bf16 %v4775_v5  ;;  %1126 = vmatmul.f32.vlgmr.msra.gmra.mxu3 %v4098_v44  ;;  %v7261_v5 = vld [vmem:[%s5992_s23 + $0x1e8] sm:$0xff] }
 0x18c   : > { %1475 = vmatpush.msrb.mxu0 %v4702_v16  ;;  %v4983_v20 = vpack.i.bf16 %v7261_v5, %v7258_v32  ;;  %v4772_v48 = vunpack.i.h.bf16 %v4770_v14  ;;  %v4771_v16 = vunpack.i.l.bf16 %v4770_v14  ;;  %v4762_v14 = vunpack.i.h.bf16 %v7196_v26 }
 0x18d   : > { %1484 = vmatpush.msra.mxu1 %v4777_v4 }
 0x18e   : > { %1476 = vmatpush.msrb.mxu0 %v4701_v45  ;;  %v7275_v45 = vld [vmem:[%s5992_s23 + $0x210] sm:$0xff] }
 0x18f   : > { %1485 = vmatpush.msra.mxu1 %v4776_v33  ;;  %v7278_v33 = vld [vmem:[%s5992_s23 + $0x218] sm:$0xff] }
 0x190   : > { %4994 = vrot.lane.b32.xlu2 %v4993_v60, %s5940_s30  ;;  %v4766_v60 = vunpack.i.l.bf16 %v7081_v18  ;;  %v4752_v18 = vunpack.i.h.bf16 %v7042_v8 }
 0x191   : > { %4989 = vrot.lane.b32.xlu1 %v4988_v36, %s5940_s30  ;;  %1486 = vmatpush.msra.mxu1 %v4772_v48  ;;  %v4998_v36 = vpack.i.bf16 %v7278_v33, %v7275_v45  ;;  %v4761_v48 = vunpack.i.l.bf16 %v7196_v26 }
 0x192   : > { %4984 = vrot.lane.b32.xlu0 %v4983_v20, %s5940_s30  ;;  %v1358_v44 = vpop.permute.xlu2 %1357 }
 0x193   : > { %4120 = vmatpush.msk.msra.mxu3 %vm612_vm0, %v1358_v44  ;;  %v7269_v4 = vpop.permute.xlu1 %4789  ;;  %1487 = vmatpush.msra.mxu1 %v4771_v16 }
 0x194   : > { %v7271_v15 = vpop.permute.xlu0 %4784 }
 0x195   : > { %1488 = vmatpush.msra.mxu1 %v4767_v43  ;;  %v4757_v43 = vunpack.i.h.bf16 %v7202_v58 }
 0x197   : > { %1489 = vmatpush.msra.mxu1 %v4766_v60 }
 0x198   : > { %1706 = vrot.lane.b32.xlu2 %v6852_v29, %s5940_s30  ;;  %v305_v29 = vld [vmem:[%s8928_s1 + $0x40] sm:$0xff] }
 0x199   : > { %5004 = vrot.lane.b32.xlu1 %v6838_v55, %s5940_s30  ;;  %1490 = vmatpush.msra.mxu1 %v4762_v14  ;;  %v4756_v55 = vunpack.i.l.bf16 %v7202_v58  ;;  %v4747_v14 = vunpack.i.h.bf16 %v7152_v6 }
 0x19a   : > { %4999 = vrot.lane.b32.xlu0 %v4998_v36, %s5940_s30  ;;  %v7289_v20 = vpop.permute.xlu2 %4844  ;;  %826 = vmatmul.f32.gmra.mxu0 %v305_v29  ;;  %v4751_v36 = vunpack.i.l.bf16 %v7042_v8  ;;  %v4812_v8 = vunpack.i.h.bf16 %v7194_v61 }
 0x19b   : > { %v4805_v44 = vpop.permute.xlu1 %4804  ;;  %1491 = vmatpush.msra.mxu1 %v4761_v48 }
 0x19c   : > { %v7292_v16 = vpop.permute.xlu0 %4799 }
 0x19d   : > { %1492 = vmatpush.msra.mxu1 %v4757_v43 }
 0x19f   : > { %1493 = vmatpush.msra.mxu1 %v4756_v55  ;;  %v4811_v55 = vunpack.i.l.bf16 %v7194_v61 }
 0x1a0   : > { %5014 = vrot.lane.b32.xlu2 %v6869_v54, %s5941_s8  ;;  %v4099_v54 = vld [vmem:[%s8928_s1 + $0xb0] sm:$0xff] }
 0x1a1   : > { %5009 = vrot.lane.b32.xlu1 %v6873_v25, %s5941_s8  ;;  %1494 = vmatpush.msra.mxu1 %v4752_v18  ;;  %v4746_v25 = vunpack.i.l.bf16 %v7152_v6  ;;  %v4741_v6 = vunpack.i.l.bf16 %v7156_v37 }
 0x1a2   : > { %1708 = vrot.lane.b32.xlu0 %v6843_v34, %s5940_s30  ;;  %v7306_v26 = vpop.permute.xlu2 %4859  ;;  %1149 = vmatmul.f32.vlgmr.msra.gmra.mxu0 %v4099_v54  ;;  %v4742_v34 = vunpack.i.h.bf16 %v7156_v37  ;;  %v4827_v37 = vunpack.i.h.bf16 %v7237_v51 }
 0x1a3   : > { %v4820_v58 = vpop.permute.xlu1 %4819  ;;  %1495 = vmatpush.msra.mxu1 %v4751_v36  ;;  %v4807_v36 = vunpack.i.h.bf16 %v4805_v44 }
 0x1a4   : > { %v4815_v60 = vpop.permute.xlu0 %4814 }
 0x1a5   : > { %v4817_v48 = vunpack.i.h.bf16 %v4815_v60  ;;  %v4816_v43 = vunpack.i.l.bf16 %v4815_v60  ;;  %1496 = vmatpush.msra.mxu1 %v4747_v14  ;;  %v4806_v14 = vunpack.i.l.bf16 %v4805_v44  ;;  %v4826_v44 = vunpack.i.l.bf16 %v7237_v51 }
 0x1a6   : > { %v4821_v51 = vunpack.i.l.bf16 %v4820_v58 }
 0x1a7   : > { %1507 = vmatpush.msrb.mxu2 %v4817_v48  ;;  %1497 = vmatpush.msra.mxu1 %v4746_v25  ;;  %v4801_v48 = vunpack.i.l.bf16 %v7292_v16  ;;  %v4797_v25 = vunpack.i.h.bf16 %v7150_v56 }
 0x1a8   : > { %5029 = vrot.lane.b32.xlu2 %v6911_v50, %s5941_s8 }
 0x1a9   : > { %1508 = vmatpush.msrb.mxu2 %v4816_v43  ;;  %5024 = vrot.lane.b32.xlu1 %v6915_v12, %s5941_s8  ;;  %v4822_v43 = vunpack.i.h.bf16 %v4820_v58 }
 0x1aa   : > { %5019 = vrot.lane.b32.xlu0 %v6864_v63, %s5941_s8  ;;  %v7322_v29 = vpop.permute.xlu2 %4874  ;;  %1498 = vmatpush.msra.mxu1 %v4742_v34  ;;  %v4802_v63 = vunpack.i.h.bf16 %v7292_v16  ;;  %v4792_v16 = vunpack.i.h.bf16 %v7269_v4 }
 0x1ab   : > { %1509 = vmatpush.msrb.mxu2 %v4812_v8  ;;  %v1356_v50 = vpop.permute.xlu1 %1355  ;;  %v4791_v8 = vunpack.i.l.bf16 %v7269_v4  ;;  %v4782_v4 = vunpack.i.h.bf16 %v7114_v21 }
 0x1ac   : > { %v4830_v18 = vpop.permute.xlu0 %4829  ;;  %1499 = vmatpush.msra.mxu1 %v4741_v6  ;;  %1539 = vmatpush.msra.mxu3 %v1356_v50  ;;  %v4787_v6 = vunpack.i.h.bf16 %v7271_v15 }
 0x1ad   : > { %v4832_v60 = vunpack.i.h.bf16 %v4830_v18  ;;  %1510 = vmatpush.msrb.mxu2 %v4811_v55  ;;  %v4831_v12 = vunpack.i.l.bf16 %v4830_v18  ;;  %v4781_v55 = vunpack.i.l.bf16 %v7114_v21 }
 0x1af   : > { %1511 = vmatpush.msrb.mxu2 %v4807_v36  ;;  %1540 = vmatpush.msra.mxu3 %v4832_v60  ;;  %v4101_v60 = vld [vmem:[%s8928_s1 + $0xc0] sm:$0xff] }
 0x1b0   : > { %5044 = vrot.lane.b32.xlu2 %v6949_v22, %s5941_s8 }
 0x1b1   : > { %1512 = vmatpush.msrb.mxu2 %v4806_v14  ;;  %1541 = vmatpush.msra.mxu3 %v4831_v12 }
 0x1b2   : > { %5039 = vrot.lane.b32.xlu1 %v6959_v2, %s5941_s8  ;;  %v7332_v61 = vpop.permute.xlu2 %4889  ;;  %5034 = vrot.lane.b32.xlu0 %v6902_v39, %s5941_s8  ;;  %v306_v2 = vld [vmem:[%s8928_s1 + $0x48] sm:$0xff]  ;;  %v4796_v39 = vunpack.i.l.bf16 %v7150_v56 }
 0x1b3   : > { %1513 = vmatpush.msrb.mxu2 %v4802_v63  ;;  %1542 = vmatpush.msra.mxu3 %v4827_v37  ;;  %v7338_v22 = vpop.permute.xlu1 %4839 }
 0x1b4   : > { %v7340_v54 = vpop.permute.xlu0 %4834  ;;  %4096 = vmatmul.msk.f32.gmra.mxu1 %vm605_vm1, %v306_v2 }
 0x1b5   : > { %1514 = vmatpush.msrb.mxu2 %v4801_v48  ;;  %1543 = vmatpush.msra.mxu3 %v4826_v44 }
 0x1b7   : > { %1515 = vmatpush.msrb.mxu2 %v4797_v25  ;;  %1544 = vmatpush.msra.mxu3 %v4822_v43 }
 0x1b8   : > { %5059 = vrot.lane.b32.xlu2 %v6992_v38, %s5941_s8  ;;  %v4100_v38 = vld [vmem:[%s8928_s1 + $0xb8] sm:$0xff] }
 0x1b9   : > { %1516 = vmatpush.msrb.mxu2 %v4796_v39  ;;  %1545 = vmatpush.msra.mxu3 %v4821_v51  ;;  %v4846_v39 = vunpack.i.l.bf16 %v7289_v20 }
 0x1ba   : > { %5054 = vrot.lane.b32.xlu1 %v6996_v23, %s5941_s8  ;;  %v7353_v34 = vpop.permute.xlu2 %4904  ;;  %5049 = vrot.lane.b32.xlu0 %v6937_v46, %s5941_s8  ;;  %v4786_v23 = vunpack.i.l.bf16 %v7271_v15  ;;  %v4102_v15 = vld [vmem:[%s8928_s1 + $0xc8] sm:$0xff] }
 0x1bb   : > { %1517 = vmatpush.msrb.mxu2 %v4792_v16  ;;  %v4855_v56 = vpop.permute.xlu1 %4854 }
 0x1bc   : > { %v4850_v58 = vpop.permute.xlu0 %4849  ;;  %1172 = vmatmul.f32.vlgmr.msrb.gmra.mxu1 %v4100_v38  ;;  %1106 = vmatmul.f32.gmra.mxu2 %v4102_v15  ;;  %v4856_v37 = vunpack.i.l.bf16 %v4855_v56  ;;  %v5123_v38 = vpack.i.bf16 %v7130_v41, %v7118_v49  ;;  %v4906_v15 = vunpack.i.l.bf16 %v7353_v34 }
 0x1bd   : > { %1518 = vmatpush.msrb.mxu2 %v4791_v8  ;;  %v4851_v43 = vunpack.i.l.bf16 %v4850_v58  ;;  %v5133_v8 = vpack.i.bf16 %v7258_v32, %v7261_v5 }
 0x1bf   : > { %1519 = vmatpush.msrb.mxu2 %v4787_v6 }
 0x1c0   : > { %5074 = vrot.lane.b32.xlu2 %v7028_v35, %s5941_s8 }
 0x1c1   : > { %1520 = vmatpush.msrb.mxu2 %v4786_v23  ;;  %v4837_v23 = vunpack.i.h.bf16 %v7340_v54 }
 0x1c2   : > { %5069 = vrot.lane.b32.xlu1 %v7038_v17, %s5941_s8  ;;  %v7368_v46 = vpop.permute.xlu2 %4919  ;;  %5064 = vrot.lane.b32.xlu0 %v6986_v52, %s5941_s8 }
 0x1c3   : > { %1521 = vmatpush.msrb.mxu2 %v4782_v4  ;;  %v4870_v50 = vpop.permute.xlu1 %4869  ;;  %v4907_v4 = vunpack.i.h.bf16 %v7353_v34  ;;  %v5138_v34 = vpack.i.bf16 %v6942_v24, %v6945_v0  ;;  %v5163_v0 = vpack.i.bf16 %v6898_v19, %v7014_v40 }
 0x1c4   : > { %v4865_v35 = vpop.permute.xlu0 %4864  ;;  %v4872_v18 = vunpack.i.h.bf16 %v4870_v50  ;;  %v4871_v36 = vunpack.i.l.bf16 %v4870_v50  ;;  %4108 = vmatmul.msk.f32.vlgmr.msra.gmra.mxu2 %vm605_vm1, %v4101_v60 }
 0x1c5   : > { %1522 = vmatpush.msrb.mxu2 %v4781_v55  ;;  %v4867_v17 = vunpack.i.h.bf16 %v4865_v35  ;;  %v4866_v21 = vunpack.i.l.bf16 %v4865_v35 }
 0x1c6   : > { %1789 = vmatpush.msra.mxu0 %v4872_v18  ;;  %v5148_v18 = vpack.i.bf16 %v6955_v9, %v7065_v1 }
 0x1c8   : > { %5089 = vrot.lane.b32.xlu2 %v7059_v27, %s5941_s8  ;;  %1790 = vmatpush.msra.mxu0 %v4871_v36  ;;  %v4862_v27 = vunpack.i.h.bf16 %v7306_v26 }
 0x1ca   : > { %5084 = vrot.lane.b32.xlu1 %v7069_v53, %s5941_s8  ;;  %v7380_v52 = vpop.permute.xlu2 %4934  ;;  %5079 = vrot.lane.b32.xlu0 %v7018_v59, %s5941_s8  ;;  %v4861_v53 = vunpack.i.l.bf16 %v7306_v26  ;;  %v4857_v59 = vunpack.i.h.bf16 %v4855_v56  ;;  %v5118_v26 = vpack.i.bf16 %v7121_v47, %v7127_v7  ;;  %v4842_v56 = vunpack.i.h.bf16 %v7338_v22 }
 0x1cb   : > { %1791 = vmatpush.msra.mxu0 %v4867_v17  ;;  %v7387_v14 = vpop.permute.xlu1 %4884  ;;  %v5143_v17 = vpack.i.bf16 %v7205_v11, %v7208_v42 }
 0x1cc   : > { %v7389_v12 = vpop.permute.xlu0 %4879  ;;  %v4887_v40 = vunpack.i.h.bf16 %v7387_v14 }
 0x1cd   : > { %1792 = vmatpush.msra.mxu0 %v4866_v21 }
 0x1cf   : > { %1793 = vmatpush.msra.mxu0 %v4862_v27 }
 0x1d0   : > { %5104 = vrot.lane.b32.xlu2 %v7100_v30, %s5941_s8  ;;  %v4852_v30 = vunpack.i.h.bf16 %v4850_v58 }
 0x1d1   : > { %1794 = vmatpush.msra.mxu0 %v4861_v53  ;;  %v4104_v53 = vld [vmem:[%s8928_s1 + $0xd8] sm:$0xff] }
 0x1d2   : > { %5099 = vrot.lane.b32.xlu1 %v7104_v13, %s5941_s8  ;;  %v4950_v63 = vpop.permute.xlu2 %4949  ;;  %5094 = vrot.lane.b32.xlu0 %v7052_v62, %s5941_s8  ;;  %v4847_v13 = vunpack.i.h.bf16 %v7289_v20  ;;  %v4103_v20 = vld [vmem:[%s8928_s1 + $0xd0] sm:$0xff] }
 0x1d3   : > { %1795 = vmatpush.msra.mxu0 %v4857_v59  ;;  %v4952_v48 = vunpack.i.h.bf16 %v4950_v63  ;;  %v4951_v44 = vunpack.i.l.bf16 %v4950_v63  ;;  %v4900_v25 = vpop.permute.xlu1 %4899  ;;  %1129 = vmatmul.f32.gmra.mxu3 %v4103_v20  ;;  %v4892_v59 = vunpack.i.h.bf16 %v7332_v61  ;;  %v9189_v63 = vld [vmem:[#allocation25_spill] sm:$0xff]  ;;  %v4936_v20 = vunpack.i.l.bf16 %v7380_v52 }
 0x1d4   : > { %v7400_v2 = vpop.permute.xlu0 %4894  ;;  %v4902_v36 = vunpack.i.h.bf16 %v4900_v25  ;;  %v4901_v21 = vunpack.i.l.bf16 %v4900_v25  ;;  %1152 = vmatmul.f32.gmra.mxu0 %v4104_v53 }
 0x1d5   : > { %1796 = vmatpush.msra.mxu0 %v4856_v37  ;;  %1835 = vmatpush.msra.mxu2 %v4952_v48  ;;  %v4897_v9 = vunpack.i.h.bf16 %v7400_v2  ;;  %v4896_v11 = vunpack.i.l.bf16 %v7400_v2  ;;  %v5158_v37 = vpack.i.bf16 %v9189_v63, %v7220_v10  ;;  %v9190_v48 = vld [vmem:[#allocation11_spill] sm:$0xff]  ;;  %v4891_v2 = vunpack.i.l.bf16 %v7332_v61 }
 0x1d7   : > { %1797 = vmatpush.msra.mxu0 %v4852_v30  ;;  %1836 = vmatpush.msra.mxu2 %v4951_v44  ;;  %v9191_v44 = vld [vmem:[#allocation58_spill] sm:$0xff]  ;;  %v4886_v30 = vunpack.i.l.bf16 %v7387_v14 }
 0x1d8   : > { %5119 = vrot.lane.b32.xlu2 %v5118_v26, %s5941_s8  ;;  %v5153_v25 = vpack.i.bf16 %v9191_v44, %v9190_v48  ;;  %v9194_v14 = vld [vmem:[#allocation26_spill] sm:$0xff] }
 0x1d9   : > { %1798 = vmatpush.msra.mxu0 %v4851_v43 }
 0x1da   : > { %5114 = vrot.lane.b32.xlu1 %v7142_v57, %s5941_s8  ;;  %v7408_v62 = vpop.permute.xlu2 %4964  ;;  %5109 = vrot.lane.b32.xlu0 %v7091_v31, %s5941_s8  ;;  %v5128_v57 = vpack.i.bf16 %v7250_v28, %v7253_v3  ;;  %v4841_v31 = vunpack.i.l.bf16 %v7338_v22  ;;  %v4836_v22 = vunpack.i.l.bf16 %v7340_v54  ;;  %v4110_v54 = vld [vmem:[%s8928_s1 + $0xf0] sm:$0xff] }
 0x1db   : > { %1799 = vmatpush.msra.mxu0 %v4847_v13  ;;  %v7413_v51 = vpop.permute.xlu1 %4914  ;;  %1454 = vmatmul.f32.vlgmr.msrb.gmra.mxu3 %v4110_v54  ;;  %v9192_v13 = vld [vmem:[#allocation18_spill] sm:$0xff]  ;;  %v9198_v54 = vld [vmem:[#allocation16_spill] sm:$0xff] }
 0x1dc   : > { %v4910_v16 = vpop.permute.xlu0 %4909 }
 0x1dd   : > { %v4912_v58 = vunpack.i.h.bf16 %v4910_v16  ;;  %1800 = vmatpush.msra.mxu0 %v4846_v39  ;;  %v4911_v6 = vunpack.i.l.bf16 %v4910_v16  ;;  %v5178_v39 = vpack.i.bf16 %v7121_v47, %v9192_v13  ;;  %v4937_v16 = vunpack.i.h.bf16 %v7380_v52 }
 0x1df   : > { %1801 = vmatpush.msra.mxu0 %v4842_v56  ;;  %1812 = vmatpush.msrb.mxu1 %v4912_v58  ;;  %v4882_v56 = vunpack.i.h.bf16 %v7389_v12  ;;  %v9193_v58 = vld [vmem:[#allocation8_spill] sm:$0xff] }
 0x1e0   : > { %5134 = vrot.lane.b32.xlu2 %v5133_v8, %s5941_s8  ;;  %v4111_v8 = vld [vmem:[%s8928_s1 + $0xf8] sm:$0xff] }
 0x1e1   : > { %1802 = vmatpush.msra.mxu0 %v4841_v31  ;;  %1813 = vmatpush.msrb.mxu1 %v4911_v6  ;;  %v9195_v31 = vld [vmem:[#allocation57_spill] sm:$0xff]  ;;  %v9196_v6 = vld [vmem:[#allocation15_spill] sm:$0xff] }
 0x1e2   : > { %5129 = vrot.lane.b32.xlu1 %v5128_v57, %s5941_s8  ;;  %v7430_v55 = vpop.permute.xlu2 %4979  ;;  %5124 = vrot.lane.b32.xlu0 %v5123_v38, %s5941_s8  ;;  %v5173_v57 = vpack.i.bf16 %v9194_v14, %v9193_v58  ;;  %v5168_v47 = vpack.i.bf16 %v9196_v6, %v9195_v31  ;;  %v4881_v38 = vunpack.i.l.bf16 %v7389_v12  ;;  %v4105_v12 = vld [vmem:[%s8928_s1 + $0xe0] sm:$0xff]  ;;  %v5827_v58 = vld [vmem:[%s5992_s23 + $0x78] sm:$0xff] }
 0x1e3   : > { %1803 = vmatpush.msra.mxu0 %v4837_v23  ;;  %1814 = vmatpush.msrb.mxu1 %v4907_v4  ;;  %v7435_v50 = vpop.permute.xlu1 %4929  ;;  %v4877_v4 = vunpack.i.h.bf16 %v7322_v29  ;;  %v4982_v14 = vunpack.i.h.bf16 %v7430_v55  ;;  %v4981_v6 = vunpack.i.l.bf16 %v7430_v55 }
 0x1e4   : > { %v7437_v35 = vpop.permute.xlu0 %4924  ;;  %1477 = vmatmul.f32.vlgmr.msrb.gmra.mxu0 %v4111_v8  ;;  %v4932_v23 = vunpack.i.h.bf16 %v7435_v50  ;;  %v4931_v52 = vunpack.i.l.bf16 %v7435_v50  ;;  %1175 = vmatmul.f32.gmra.mxu1 %v4105_v12 }
 0x1e5   : > { %1804 = vmatpush.msra.mxu0 %v4836_v22  ;;  %1815 = vmatpush.msrb.mxu1 %v4906_v15  ;;  %v4876_v15 = vunpack.i.l.bf16 %v7322_v29  ;;  %v4927_v50 = vunpack.i.h.bf16 %v7437_v35  ;;  %v7513_v29 = vld [vmem:[%s5992_s23 + $0x48] sm:$0xff] }
 0x1e7   : > { %1816 = vmatpush.msrb.mxu1 %v4902_v36 }
 0x1e8   : > { %5149 = vrot.lane.b32.xlu2 %v5148_v18, %s5942_s29 }
 0x1e9   : > { %1817 = vmatpush.msrb.mxu1 %v4901_v21  ;;  %v9199_v21 = vld [vmem:[#allocation9_spill] sm:$0xff] }
 0x1ea   : > { %5144 = vrot.lane.b32.xlu1 %v5143_v17, %s5941_s8  ;;  %v7451_v1 = vpop.permute.xlu2 %4994  ;;  %5139 = vrot.lane.b32.xlu0 %v5138_v34, %s5942_s29  ;;  %v9197_v17 = vld [vmem:[#allocation17_spill] sm:$0xff] }
 0x1eb   : > { %1818 = vmatpush.msrb.mxu1 %v4897_v9  ;;  %v4945_v42 = vpop.permute.xlu1 %4944  ;;  %v5193_v34 = vpack.i.bf16 %v9198_v54, %v9197_v17  ;;  %v5188_v9 = vpack.i.bf16 %v9199_v21, %v7118_v49  ;;  %v4921_v49 = vunpack.i.l.bf16 %v7368_v46  ;;  %v9207_v17 = vld [vmem:[#allocation6_spill] sm:$0xff]  ;;  %v7574_v21 = vld [vmem:[%s5992_s23 + $0xb0] sm:$0xff] }
 0x1ec   : > { %v4940_v24 = vpop.permute.xlu0 %4939  ;;  %v4947_v60 = vunpack.i.h.bf16 %v4945_v42  ;;  %v4946_v27 = vunpack.i.l.bf16 %v4945_v42  ;;  %v9200_v42 = vld [vmem:[#allocation2_spill] sm:$0xff]  ;;  %v5233_v54 = vpack.i.bf16 %v7253_v3, %v9207_v17  ;;  %v7659_v17 = vld [vmem:[%s5992_s23 + $0x98] sm:$0xff] }
 0x1ed   : > { %1819 = vmatpush.msrb.mxu1 %v4896_v11  ;;  %v4942_v19 = vunpack.i.h.bf16 %v4940_v24  ;;  %v4941_v10 = vunpack.i.l.bf16 %v4940_v24  ;;  %v4926_v11 = vunpack.i.l.bf16 %v7437_v35  ;;  %v5183_v24 = vpack.i.bf16 %v9200_v42, %v7513_v29  ;;  %v4112_v35 = vld [vmem:[%s8928_s1 + $0x100] sm:$0xff] }
 0x1ee   : > { %1837 = vmatpush.msra.mxu2 %v4947_v60  ;;  %1500 = vmatmul.f32.vlgmr.msra.gmra.mxu1 %v4112_v35  ;;  %v4967_v42 = vunpack.i.h.bf16 %v7408_v62 }
 0x1ef   : > { %1820 = vmatpush.msrb.mxu1 %v4892_v59  ;;  %v7528_v59 = vld [vmem:[%s5992_s23 + $0x30] sm:$0xff] }
 0x1f0   : > { %5164 = vrot.lane.b32.xlu2 %v5163_v0, %s5942_s29  ;;  %1838 = vmatpush.msra.mxu2 %v4946_v27  ;;  %v4922_v0 = vunpack.i.h.bf16 %v7368_v46  ;;  %v5208_v63 = vpack.i.bf16 %v7528_v59, %v7127_v7  ;;  %v7534_v46 = vld [vmem:[%s5992_s23 + $0x38] sm:$0xff] }
 0x1f1   : > { %1821 = vmatpush.msrb.mxu1 %v4891_v2 }
 0x1f2   : > { %5159 = vrot.lane.b32.xlu1 %v5158_v37, %s5941_s8  ;;  %v7469_v26 = vpop.permute.xlu2 %1706  ;;  %5154 = vrot.lane.b32.xlu0 %v5153_v25, %s5942_s29  ;;  %v4917_v37 = vunpack.i.h.bf16 %v7413_v51  ;;  %v9201_v25 = vld [vmem:[#allocation14_spill] sm:$0xff] }
 0x1f3   : > { %1839 = vmatpush.msra.mxu2 %v4942_v19  ;;  %1822 = vmatpush.msrb.mxu1 %v4887_v40  ;;  %v7473_v61 = vpop.permute.xlu1 %4959  ;;  %v5203_v2 = vpack.i.bf16 %v9201_v25, %v7534_v46  ;;  %v4916_v19 = vunpack.i.l.bf16 %v7413_v51  ;;  %v9202_v40 = vld [vmem:[#allocation5_spill] sm:$0xff] }
 0x1f4   : > { %v7475_v43 = vpop.permute.xlu0 %4954  ;;  %v5198_v7 = vpack.i.bf16 %v7130_v41, %v9202_v40  ;;  %v9209_v40 = vld [vmem:[#allocation36_spill] sm:$0xff] }
 0x1f5   : > { %1840 = vmatpush.msra.mxu2 %v4941_v10  ;;  %1823 = vmatpush.msrb.mxu1 %v4886_v30 }
 0x1f7   : > { %1841 = vmatpush.msra.mxu2 %v4937_v16  ;;  %1824 = vmatpush.msrb.mxu1 %v4882_v56  ;;  %v5826_v56 = vld [vmem:[%s5992_s23 + $0x70] sm:$0xff] }
 0x1f8   : > { %5179 = vrot.lane.b32.xlu2 %v5178_v39, %s5942_s29  ;;  %v7548_v41 = vpack.i.bf16 %v5826_v56, %v5827_v58 }
 0x1f9   : > { %1842 = vmatpush.msra.mxu2 %v4936_v20  ;;  %1825 = vmatpush.msrb.mxu1 %v4881_v38  ;;  %v9204_v20 = vld [vmem:[#allocation27_spill] sm:$0xff]  ;;  %v9206_v38 = vld [vmem:[#allocation4_spill] sm:$0xff] }
 0x1fa   : > { %5174 = vrot.lane.b32.xlu1 %v5173_v57, %s5941_s8  ;;  %v7494_v22 = vpop.permute.xlu2 %5014  ;;  %5169 = vrot.lane.b32.xlu0 %v5168_v47, %s5942_s29  ;;  %v9203_v57 = vld [vmem:[#allocation3_spill] sm:$0xff]  ;;  %v9205_v47 = vld [vmem:[#allocation13_spill] sm:$0xff] }
 0x1fb   : > { %1843 = vmatpush.msra.mxu2 %v4932_v23  ;;  %1826 = vmatpush.msrb.mxu1 %v4877_v4  ;;  %v7502_v18 = vpop.permute.xlu1 %4974  ;;  %v5218_v31 = vpack.i.bf16 %v9204_v20, %v9203_v57  ;;  %v5213_v23 = vpack.i.bf16 %v9206_v38, %v9205_v47  ;;  %v7639_v57 = vld [vmem:[%s5992_s23 + $0x228] sm:$0xff] }
 0x1fc   : > { %v7504_v36 = vpop.permute.xlu0 %4969  ;;  %v4977_v4 = vunpack.i.h.bf16 %v7502_v18  ;;  %v4976_v55 = vunpack.i.l.bf16 %v7502_v18 }
 0x1fd   : > { %1844 = vmatpush.msra.mxu2 %v4931_v52  ;;  %1827 = vmatpush.msrb.mxu1 %v4876_v15 }
 0x1ff   : > { %1845 = vmatpush.msra.mxu2 %v4927_v50  ;;  %v7571_v50 = vld [vmem:[%s5992_s23 + $0x28] sm:$0xff] }
 0x200   : > { %5194 = vrot.lane.b32.xlu2 %v5193_v34, %s5941_s8  ;;  %v4972_v34 = vunpack.i.h.bf16 %v7504_v36  ;;  %v5228_v18 = vpack.i.bf16 %v7574_v21, %v7571_v50 }
 0x201   : > { %1846 = vmatpush.msra.mxu2 %v4926_v11  ;;  %v4971_v11 = vunpack.i.l.bf16 %v7504_v36  ;;  %v4966_v36 = vunpack.i.l.bf16 %v7408_v62 }
 0x202   : > { %5189 = vrot.lane.b32.xlu1 %v5188_v9, %s5942_s29  ;;  %v7520_v60 = vpop.permute.xlu2 %5029  ;;  %5184 = vrot.lane.b32.xlu0 %v5183_v24, %s5942_s29  ;;  %v4106_v9 = vld [vmem:[%s8928_s1 + $0xe8] sm:$0xff] }
 0x203   : > { %1847 = vmatpush.msra.mxu2 %v4922_v0  ;;  %v4990_v27 = vpop.permute.xlu1 %4989 }
 0x204   : > { %v4985_v53 = vpop.permute.xlu0 %4984  ;;  %v4992_v48 = vunpack.i.h.bf16 %v4990_v27  ;;  %v4991_v44 = vunpack.i.l.bf16 %v4990_v27  ;;  %4109 = vmatmul.msk.f32.gmra.mxu2 %vm605_vm1, %v4106_v9  ;;  %v4115_v9 = vld [vmem:[%s8928_s1 + $0x118] sm:$0xff] }
 0x205   : > { %1848 = vmatpush.msra.mxu2 %v4921_v49  ;;  %v4987_v10 = vunpack.i.h.bf16 %v4985_v53  ;;  %v4986_v13 = vunpack.i.l.bf16 %v4985_v53  ;;  %v7591_v49 = vld [vmem:[%s5992_s23 + $0x238] sm:$0x3]  ;;  %v9208_v53 = vld [vmem:[#allocation10_spill] sm:$0xff]  ;;  %1457 = vmatmul.f32.gmra.mxu3 %v4115_v9 }
 0x206   : > { %1858 = vmatpush.msrb.mxu3 %v4992_v48  ;;  %v7605_v48 = vld [vmem:[%s5992_s23 + $0x20] sm:$0xff] }
 0x207   : > { %1849 = vmatpush.msra.mxu2 %v4917_v37  ;;  %v4962_v37 = vunpack.i.h.bf16 %v7473_v61 }
 0x208   : > { %5209 = vrot.lane.b32.xlu2 %v5208_v63, %s5942_s29  ;;  %1859 = vmatpush.msrb.mxu3 %v4991_v44  ;;  %v5248_v63 = vpack.i.bf16 %v7250_v28, %v9208_v53  ;;  %v7608_v44 = vld [vmem:[%s5992_s23 + $0xa8] sm:$0xff]  ;;  %v7617_v28 = vld [vmem:[%s5992_s23 + $0x230] sm:$0xff] }
 0x209   : > { %1850 = vmatpush.msra.mxu2 %v4916_v19  ;;  %v5243_v25 = vpack.i.bf16 %v7608_v44, %v7605_v48  ;;  %v4961_v19 = vunpack.i.l.bf16 %v7473_v61 }
 0x20a   : > { %5204 = vrot.lane.b32.xlu1 %v5203_v2, %s5942_s29  ;;  %v5045_v30 = vpop.permute.xlu2 %5044  ;;  %5199 = vrot.lane.b32.xlu0 %v5198_v7, %s5942_s29  ;;  %v4113_v2 = vld [vmem:[%s8928_s1 + $0x108] sm:$0xff]  ;;  %v5238_v7 = vpack.i.bf16 %v7617_v28, %v9209_v40  ;;  %v7708_v40 = vld [vmem:[%s5992_s23 + $0x58] sm:$0xff] }
 0x20b   : > { %1860 = vmatpush.msrb.mxu3 %v4987_v10  ;;  %v5047_v51 = vunpack.i.h.bf16 %v5045_v30  ;;  %v5046_v39 = vunpack.i.l.bf16 %v5045_v30  ;;  %v5005_v16 = vpop.permute.xlu1 %5004  ;;  %v4997_v10 = vunpack.i.h.bf16 %v7451_v1  ;;  %v4957_v30 = vunpack.i.h.bf16 %v7475_v43 }
 0x20c   : > { %v7544_v8 = vpop.permute.xlu0 %4999  ;;  %v5007_v3 = vunpack.i.h.bf16 %v5005_v16  ;;  %v5006_v24 = vunpack.i.l.bf16 %v5005_v16  ;;  %1523 = vmatmul.f32.vlgmr.msrb.gmra.mxu2 %v4113_v2  ;;  %v7631_v16 = vld [vmem:[%s5992_s23 + $0x18] sm:$0xff] }
 0x20d   : > { %1861 = vmatpush.msrb.mxu3 %v4986_v13  ;;  %2140 = vmatpush.msra.mxu1 %v5047_v51  ;;  %v5001_v62 = vunpack.i.l.bf16 %v7544_v8  ;;  %v4996_v13 = vunpack.i.l.bf16 %v7451_v1  ;;  %v4956_v51 = vunpack.i.l.bf16 %v7475_v43  ;;  %v9210_v43 = vld [vmem:[#allocation12_spill] sm:$0xff] }
 0x20e   : > { %v5258_v20 = vpack.i.bf16 %v7639_v57, %v9210_v43 }
 0x20f   : > { %1862 = vmatpush.msrb.mxu3 %v4982_v14  ;;  %2141 = vmatpush.msra.mxu1 %v5046_v39 }
 0x210   : > { %5224 = vrot.lane.b32.xlu2 %v7548_v41, %s5943_s15 }
 0x211   : > { %1863 = vmatpush.msrb.mxu3 %v4981_v6  ;;  %v5838_v6 = vld [vmem:[%s5992_s23 + $0x68] sm:$0xff] }
 0x212   : > { %5219 = vrot.lane.b32.xlu1 %v5218_v31, %s5942_s29  ;;  %v7560_v52 = vpop.permute.xlu2 %5059  ;;  %5214 = vrot.lane.b32.xlu0 %v5213_v23, %s5941_s8  ;;  %v5837_v31 = vld [vmem:[%s5992_s23 + $0x60] sm:$0xff] }
 0x213   : > { %1864 = vmatpush.msrb.mxu3 %v4977_v4  ;;  %v7564_v12 = vpop.permute.xlu1 %5009  ;;  %v7645_v47 = vpack.i.bf16 %v5837_v31, %v5838_v6 }
 0x214   : > { %v1709_v15 = vpop.permute.xlu0 %1708  ;;  %v5011_v9 = vunpack.i.l.bf16 %v7564_v12 }
 0x215   : > { %1865 = vmatpush.msrb.mxu3 %v4976_v55  ;;  %4133 = vmatpush.msk.msrb.mxu0 %vm612_vm0, %v1709_v15  ;;  %v7656_v15 = vld [vmem:[%s5992_s23 + $0x10] sm:$0xff] }
 0x217   : > { %1866 = vmatpush.msrb.mxu3 %v4972_v34  ;;  %1890 = vmatpush.msrb.mxu0 %v7469_v26  ;;  %v5002_v26 = vunpack.i.h.bf16 %v7544_v8  ;;  %v7634_v8 = vld [vmem:[%s5992_s23 + $0xa0] sm:$0xff]  ;;  %v5032_v34 = vunpack.i.h.bf16 %v7520_v60 }
 0x218   : > { %5234 = vrot.lane.b32.xlu2 %v5233_v54, %s5942_s29  ;;  %v5263_v1 = vpack.i.bf16 %v7634_v8, %v7631_v16  ;;  %v5278_v54 = vpack.i.bf16 %v7659_v17, %v7656_v15 }
 0x219   : > { %1867 = vmatpush.msrb.mxu3 %v4971_v11  ;;  %1891 = vmatpush.msrb.mxu0 %v5007_v3  ;;  %v7670_v11 = vld [vmem:[%s5992_s23 + $0x220] sm:$0xff] }
 0x21a   : > { %5229 = vrot.lane.b32.xlu1 %v5228_v18, %s5942_s29  ;;  %v7587_v0 = vpop.permute.xlu2 %5074  ;;  %2059 = vrot.lane.b32.xlu0 %v7591_v49, %s5941_s8  ;;  %v5273_v3 = vpack.i.bf16 %v7278_v33, %v7670_v11 }
 0x21b   : > { %1868 = vmatpush.msrb.mxu3 %v4967_v42  ;;  %1892 = vmatpush.msrb.mxu0 %v5006_v24  ;;  %v7596_v35 = vpop.permute.xlu1 %5024  ;;  %v4116_v42 = vld [vmem:[%s8928_s1 + $0x120] sm:$0xff]  ;;  %v5031_v24 = vunpack.i.l.bf16 %v7520_v60 }
 0x21c   : > { %v7598_v27 = vpop.permute.xlu0 %5019  ;;  %1480 = vmatmul.f32.gmra.mxu0 %v4116_v42  ;;  %v5027_v33 = vunpack.i.h.bf16 %v7596_v35  ;;  %v5026_v60 = vunpack.i.l.bf16 %v7596_v35  ;;  %v4114_v35 = vld [vmem:[%s8928_s1 + $0x110] sm:$0xff] }
 0x21d   : > { %1869 = vmatpush.msrb.mxu3 %v4966_v36  ;;  %1893 = vmatpush.msrb.mxu0 %v5002_v26  ;;  %v7679_v36 = vld [vmem:[%s5992_s23 + $0x140] sm:$0xff]  ;;  %v5022_v2 = vunpack.i.h.bf16 %v7598_v27 }
 0x21e   : > { %v5268_v26 = vpack.i.bf16 %v7261_v5, %v7679_v36  ;;  %4121 = vmatmul.msk.f32.vlgmr.msra.gmra.mxu3 %vm605_vm1, %v4114_v35  ;;  %v7774_v35 = vld [vmem:[%s5992_s23 + $0x128] sm:$0xff] }
 0x21f   : > { %1870 = vmatpush.msrb.mxu3 %v4962_v37  ;;  %1894 = vmatpush.msrb.mxu0 %v5001_v62  ;;  %v7694_v37 = vld [vmem:[%s5992_s23 + $0x8] sm:$0xff]  ;;  %v7697_v62 = vld [vmem:[%s5992_s23 + $0x90] sm:$0xff] }
 0x220   : > { %5249 = vrot.lane.b32.xlu2 %v5248_v63, %s5942_s29 }
 0x221   : > { %1871 = vmatpush.msrb.mxu3 %v4961_v19  ;;  %1895 = vmatpush.msrb.mxu0 %v4997_v10 }
 0x222   : > { %5244 = vrot.lane.b32.xlu1 %v5243_v25, %s5942_s29  ;;  %v7626_v61 = vpop.permute.xlu2 %5089  ;;  %5239 = vrot.lane.b32.xlu0 %v5238_v7, %s5941_s8  ;;  %v5293_v25 = vpack.i.bf16 %v7697_v62, %v7694_v37  ;;  %v7711_v7 = vld [vmem:[%s5992_s23 + $0xf8] sm:$0xff] }
 0x223   : > { %1872 = vmatpush.msrb.mxu3 %v4957_v30  ;;  %1896 = vmatpush.msrb.mxu0 %v4996_v13  ;;  %v5288_v10 = vpack.i.bf16 %v7711_v7, %v7708_v40  ;;  %v4118_v30 = vld [vmem:[%s8928_s1 + $0x130] sm:$0xff]  ;;  %v4123_v13 = vld [vmem:[%s8928_s1 + $0x140] sm:$0xff] }
 0x224   : > { %v5040_v39 = vpop.permute.xlu1 %5039  ;;  %v5035_v14 = vpop.permute.xlu0 %5034  ;;  %1526 = vmatmul.f32.gmra.mxu2 %v4118_v30  ;;  %1805 = vmatmul.f32.vlgmr.msra.gmra.mxu0 %v4123_v13  ;;  %v5076_v13 = vunpack.i.l.bf16 %v7587_v0 }
 0x225   : > { %v5042_v56 = vunpack.i.h.bf16 %v5040_v39  ;;  %v5041_v58 = vunpack.i.l.bf16 %v5040_v39  ;;  %1873 = vmatpush.msrb.mxu3 %v4956_v51  ;;  %v5037_v38 = vunpack.i.h.bf16 %v5035_v14  ;;  %v5036_v4 = vunpack.i.l.bf16 %v5035_v14  ;;  %v7724_v39 = vld [vmem:[%s5992_s23 + $0x138] sm:$0xff]  ;;  %v9211_v14 = vld [vmem:[#allocation42_spill] sm:$0xff] }
 0x226   : > { %v5021_v51 = vunpack.i.l.bf16 %v7598_v27  ;;  %v5016_v27 = vunpack.i.l.bf16 %v7494_v22  ;;  %v5308_v43 = vpack.i.bf16 %v9211_v14, %v7275_v45  ;;  %v7751_v45 = vld [vmem:[%s5992_s23 + $0x130] sm:$0xff]  ;;  %v4119_v14 = vld [vmem:[%s8928_s1 + $0x138] sm:$0xff] }
 0x227   : > { %2142 = vmatpush.msra.mxu1 %v5042_v56  ;;  %v5017_v56 = vunpack.i.h.bf16 %v7494_v22  ;;  %4122 = vmatmul.msk.f32.gmra.mxu3 %vm605_vm1, %v4119_v14 }
 0x228   : > { %5264 = vrot.lane.b32.xlu2 %v5263_v1, %s5942_s29  ;;  %v5283_v1 = vpack.i.bf16 %v7258_v32, %v7724_v39 }
 0x229   : > { %2143 = vmatpush.msra.mxu1 %v5041_v58 }
 0x22a   : > { %5259 = vrot.lane.b32.xlu1 %v5258_v20, %s5941_s8  ;;  %v7649_v23 = vpop.permute.xlu2 %5104  ;;  %5254 = vrot.lane.b32.xlu0 %v7645_v47, %s5943_s15  ;;  %v5012_v20 = vunpack.i.h.bf16 %v7564_v12 }
 0x22b   : > { %2144 = vmatpush.msra.mxu1 %v5037_v38 }
 0x22c   : > { %v7653_v55 = vpop.permute.xlu1 %5054  ;;  %v7664_v18 = vpop.permute.xlu0 %5049 }
 0x22d   : > { %2145 = vmatpush.msra.mxu1 %v5036_v4  ;;  %v7739_v4 = vld [vmem:[%s5992_s23 + $0x50] sm:$0xff]  ;;  %v5056_v14 = vunpack.i.l.bf16 %v7653_v55 }
 0x22f   : > { %2146 = vmatpush.msra.mxu1 %v5032_v34  ;;  %v4125_v34 = vld [vmem:[%s8928_s1 + $0x150] sm:$0xff] }
 0x230   : > { %5279 = vrot.lane.b32.xlu2 %v5278_v54, %s5942_s29  ;;  %v7742_v54 = vld [vmem:[%s5992_s23 + $0xf0] sm:$0xff]  ;;  %1851 = vmatmul.f32.vlgmr.msra.gmra.mxu2 %v4125_v34  ;;  %v7819_v34 = vld [vmem:[%s5992_s23 + $0x120] sm:$0xff] }
 0x231   : > { %2147 = vmatpush.msra.mxu1 %v5031_v24  ;;  %v5303_v22 = vpack.i.bf16 %v7742_v54, %v7739_v4 }
 0x232   : > { %5274 = vrot.lane.b32.xlu1 %v5273_v3, %s5941_s8  ;;  %v7686_v53 = vpop.permute.xlu2 %5119  ;;  %5269 = vrot.lane.b32.xlu0 %v5268_v26, %s5942_s29  ;;  %v7754_v3 = vld [vmem:[%s5992_s23 + $0x1d8] sm:$0xff] }
 0x233   : > { %2148 = vmatpush.msra.mxu1 %v5027_v33  ;;  %v5122_v63 = vunpack.i.h.bf16 %v7686_v53  ;;  %9212 = vst [vmem:[#allocation52_spill] sm:$0xff] %v7754_v3  ;;  %v5298_v42 = vpack.i.bf16 %v7754_v3, %v7751_v45 }
 0x234   : > { %v7691_v5 = vpop.permute.xlu1 %5069  ;;  %v7702_v19 = vpop.permute.xlu0 %5064 }
 0x235   : > { %2149 = vmatpush.msra.mxu1 %v5026_v60  ;;  %2186 = vmatpush.msra.mxu3 %v5122_v63  ;;  %v7766_v60 = vld [vmem:[%s5992_s23 + $0xe8] sm:$0xff] }
 0x236   : > { %9213 = vst [vmem:[#allocation41_spill] sm:$0xff] %v7766_v60  ;;  %v5323_v63 = vpack.i.bf16 %v7766_v60, %v7513_v29 }
 0x237   : > { %2150 = vmatpush.msra.mxu1 %v5022_v2 }
 0x238   : > { %5294 = vrot.lane.b32.xlu2 %v5293_v25, %s5942_s29  ;;  %v5077_v25 = vunpack.i.h.bf16 %v7587_v0  ;;  %v5071_v0 = vunpack.i.l.bf16 %v7691_v5 }
 0x239   : > { %2151 = vmatpush.msra.mxu1 %v5021_v51  ;;  %v7783_v51 = vld [vmem:[%s5992_s23] sm:$0xff] }
 0x23a   : > { %5289 = vrot.lane.b32.xlu1 %v5288_v10, %s5943_s15  ;;  %v7731_v58 = vpop.permute.xlu2 %5134  ;;  %5284 = vrot.lane.b32.xlu0 %v5283_v1, %s5942_s29  ;;  %v7777_v10 = vld [vmem:[%s5992_s23 + $0x1d0] sm:$0xff]  ;;  %v7786_v1 = vld [vmem:[%s5992_s23 + $0x88] sm:$0xff] }
 0x23b   : > { %2152 = vmatpush.msra.mxu1 %v5017_v56  ;;  %9214 = vst [vmem:[#allocation7_spill] sm:$0xff] %v7777_v10  ;;  %v5318_v30 = vpack.i.bf16 %v7777_v10, %v7774_v35  ;;  %v5313_v29 = vpack.i.bf16 %v7786_v1, %v7783_v51  ;;  %v5072_v56 = vunpack.i.h.bf16 %v7691_v5 }
 0x23c   : > { %v5085_v32 = vpop.permute.xlu1 %5084  ;;  %v5080_v38 = vpop.permute.xlu0 %5079 }
 0x23d   : > { %v5087_v31 = vunpack.i.h.bf16 %v5085_v32  ;;  %v5086_v6 = vunpack.i.l.bf16 %v5085_v32  ;;  %2153 = vmatpush.msra.mxu1 %v5016_v27  ;;  %v5082_v24 = vunpack.i.h.bf16 %v5080_v38  ;;  %v5081_v26 = vunpack.i.l.bf16 %v5080_v38 }
 0x23e   : > { %v5066_v38 = vunpack.i.l.bf16 %v7702_v19 }
 0x23f   : > { %2154 = vmatpush.msra.mxu1 %v5012_v20  ;;  %2163 = vmatpush.msrb.mxu2 %v5087_v31  ;;  %v7807_v31 = vld [vmem:[%s5992_s23 + $0x118] sm:$0xff] }
 0x240   : > { %5309 = vrot.lane.b32.xlu2 %v5308_v43, %s5941_s8  ;;  %v5067_v43 = vunpack.i.h.bf16 %v7702_v19  ;;  %9215 = vst [vmem:[#allocation51_spill] sm:$0xff] %v7807_v31  ;;  %v5061_v19 = vunpack.i.l.bf16 %v7560_v52 }
 0x241   : > { %2155 = vmatpush.msra.mxu1 %v5011_v9  ;;  %2164 = vmatpush.msrb.mxu2 %v5086_v6  ;;  %v7810_v6 = vld [vmem:[%s5992_s23 + $0x1c8] sm:$0xff] }
 0x242   : > { %5304 = vrot.lane.b32.xlu1 %v5303_v22, %s5943_s15  ;;  %v7760_v12 = vpop.permute.xlu2 %5149  ;;  %5299 = vrot.lane.b32.xlu0 %v5298_v42, %s5942_s29  ;;  %9216 = vst [vmem:[#allocation29_spill] sm:$0xff] %v7810_v6  ;;  %v5333_v5 = vpack.i.bf16 %v7807_v31, %v7810_v6  ;;  %v7816_v22 = vld [vmem:[%s5992_s23 + $0x80] sm:$0xff]  ;;  %v5062_v42 = vunpack.i.h.bf16 %v7560_v52  ;;  %v7836_v52 = vld [vmem:[%s5992_s23 + $0x1f8] sm:$0xff] }
 0x243   : > { %2165 = vmatpush.msrb.mxu2 %v5082_v24  ;;  %v5328_v9 = vpack.i.bf16 %v7819_v34, %v7816_v22 }
 0x244   : > { %v7763_v33 = vpop.permute.xlu1 %5099  ;;  %v7771_v2 = vpop.permute.xlu0 %5094 }
 0x245   : > { %2166 = vmatpush.msrb.mxu2 %v5081_v26 }
 0x247   : > { %2167 = vmatpush.msrb.mxu2 %v5077_v25  ;;  %v5057_v25 = vunpack.i.h.bf16 %v7653_v55  ;;  %v5121_v55 = vunpack.i.l.bf16 %v7686_v53 }
 0x248   : > { %5324 = vrot.lane.b32.xlu2 %v5323_v63, %s5943_s15  ;;  %v4126_v63 = vld [vmem:[%s8928_s1 + $0x158] sm:$0xff] }
 0x249   : > { %2168 = vmatpush.msrb.mxu2 %v5076_v13  ;;  %1874 = vmatmul.f32.vlgmr.msrb.gmra.mxu3 %v4126_v63 }
 0x24a   : > { %5319 = vrot.lane.b32.xlu1 %v5318_v30, %s5942_s29  ;;  %v7793_v27 = vpop.permute.xlu2 %5164  ;;  %5314 = vrot.lane.b32.xlu0 %v5313_v29, %s5942_s29 }
 0x24b   : > { %2169 = vmatpush.msrb.mxu2 %v5072_v56 }
 0x24c   : > { %v7797_v32 = vpop.permute.xlu1 %5114  ;;  %v7803_v20 = vpop.permute.xlu0 %5109 }
 0x24d   : > { %2170 = vmatpush.msrb.mxu2 %v5071_v0  ;;  %v5343_v0 = vpack.i.bf16 %v7534_v46, %v7836_v52  ;;  %v5052_v46 = vunpack.i.h.bf16 %v7664_v18 }
 0x24f   : > { %2171 = vmatpush.msrb.mxu2 %v5067_v43  ;;  %v7842_v43 = vld [vmem:[%s5992_s23 + $0x40] sm:$0xff] }
 0x250   : > { %2410 = vrot.lane.b32.xlu2 %v7591_v49, %s5942_s29  ;;  %9217 = vst [vmem:[#allocation44_spill] sm:$0xff] %v7842_v43 }
 0x251   : > { %2172 = vmatpush.msrb.mxu2 %v5066_v38 }
 0x252   : > { %5334 = vrot.lane.b32.xlu1 %v5333_v5, %s5942_s29  ;;  %v7827_v24 = vpop.permute.xlu2 %5179  ;;  %5329 = vrot.lane.b32.xlu0 %v5328_v9, %s5942_s29  ;;  %v7845_v5 = vld [vmem:[%s5992_s23 + $0xe0] sm:$0xff]  ;;  %v5136_v9 = vunpack.i.l.bf16 %v7731_v58 }
 0x253   : > { %2173 = vmatpush.msrb.mxu2 %v5062_v42  ;;  %9218 = vst [vmem:[#allocation34_spill] sm:$0xff] %v7845_v5  ;;  %v5338_v38 = vpack.i.bf16 %v7845_v5, %v7842_v43  ;;  %v5092_v5 = vunpack.i.h.bf16 %v7626_v61 }
 0x254   : > { %v5130_v26 = vpop.permute.xlu1 %5129  ;;  %v5125_v29 = vpop.permute.xlu0 %5124 }
 0x255   : > { %v5132_v30 = vunpack.i.h.bf16 %v5130_v26  ;;  %v5131_v13 = vunpack.i.l.bf16 %v5130_v26  ;;  %2174 = vmatpush.msrb.mxu2 %v5061_v19  ;;  %v5126_v56 = vunpack.i.l.bf16 %v5125_v29  ;;  %v5127_v42 = vunpack.i.h.bf16 %v5125_v29  ;;  %v7851_v19 = vld [vmem:[%s5992_s23 + $0x200] sm:$0xff]  ;;  %v7865_v29 = vld [vmem:[%s5992_s23 + $0x110] sm:$0xff] }
 0x256   : > { %9219 = vst [vmem:[#allocation35_spill] sm:$0xff] %v7851_v19  ;;  %v5137_v26 = vunpack.i.h.bf16 %v7731_v58 }
 0x257   : > { %2175 = vmatpush.msrb.mxu2 %v5057_v25  ;;  %2209 = vmatpush.msra.mxu0 %v5131_v13  ;;  %v5051_v25 = vunpack.i.l.bf16 %v7664_v18  ;;  %9220 = vst [vmem:[#allocation28_spill] sm:$0xff] %v7865_v29 }
 0x258   : > { %2187 = vmatpush.msra.mxu3 %v5126_v56  ;;  %2045 = vrot.lane.b32.xlu2 %v7851_v19, %s5941_s8  ;;  %v7868_v56 = vld [vmem:[%s5992_s23 + $0x1b8] sm:$0xff] }
 0x259   : > { %2176 = vmatpush.msrb.mxu2 %v5056_v14  ;;  %2210 = vmatpush.msra.mxu0 %v5132_v30  ;;  %v5117_v30 = vunpack.i.h.bf16 %v7797_v32  ;;  %v5358_v18 = vpack.i.bf16 %v7868_v56, %v7865_v29 }
 0x25a   : > { %2188 = vmatpush.msra.mxu3 %v5127_v42  ;;  %5344 = vrot.lane.b32.xlu1 %v5343_v0, %s5943_s15  ;;  %v7859_v63 = vpop.permute.xlu2 %5194  ;;  %v5116_v0 = vunpack.i.l.bf16 %v7797_v32  ;;  %v7877_v42 = vld [vmem:[%s5992_s23 + $0x1f0] sm:$0xff]  ;;  %v5152_v32 = vunpack.i.h.bf16 %v7760_v12 }
 0x25b   : > { %5339 = vrot.lane.b32.xlu0 %v5338_v38, %s5943_s15  ;;  %2177 = vmatpush.msrb.mxu2 %v5052_v46  ;;  %v7874_v38 = vld [vmem:[%s5992_s23 + $0xd8] sm:$0xff]  ;;  %v7882_v46 = vld [vmem:[%s5992_s23 + $0x1c0] sm:$0xff]  ;;  %v5196_v60 = vunpack.i.l.bf16 %v7859_v63 }
 0x25c   : > { %2189 = vmatpush.msra.mxu3 %v5121_v55  ;;  %2211 = vmatpush.msra.mxu0 %v5136_v9  ;;  %v5145_v53 = vpop.permute.xlu1 %5144  ;;  %v5140_v58 = vpop.permute.xlu0 %5139  ;;  %9221 = vst [vmem:[#allocation54_spill] sm:$0xff] %v7874_v38  ;;  %v5353_v9 = vpack.i.bf16 %v7877_v42, %v7874_v38  ;;  %v5348_v55 = vpack.i.bf16 %v7617_v28, %v7882_v46  ;;  %v5102_v38 = vunpack.i.h.bf16 %v7763_v33 }
 0x25d   : > { %v5146_v13 = vunpack.i.l.bf16 %v5145_v53  ;;  %2178 = vmatpush.msrb.mxu2 %v5051_v25  ;;  %v5141_v14 = vunpack.i.l.bf16 %v5140_v58  ;;  %v5112_v25 = vunpack.i.h.bf16 %v7803_v20  ;;  %v5147_v29 = vunpack.i.h.bf16 %v5145_v53 }
 0x25e   : > { %2190 = vmatpush.msra.mxu3 %v5117_v30  ;;  %2212 = vmatpush.msra.mxu0 %v5137_v26  ;;  %v5142_v31 = vunpack.i.h.bf16 %v5140_v58  ;;  %v5111_v26 = vunpack.i.l.bf16 %v7803_v20  ;;  %v5107_v53 = vunpack.i.h.bf16 %v7649_v23  ;;  %v7898_v20 = vld [vmem:[%s5992_s23 + $0x178] sm:$0xff] }
 0x25f   : > { %2491 = vmatpush.msra.mxu2 %v5141_v14 }
 0x260   : > { %2191 = vmatpush.msra.mxu3 %v5116_v0  ;;  %2213 = vmatpush.msra.mxu0 %v5146_v13 }
 0x261   : > { %5359 = vrot.lane.b32.xlu2 %v5358_v18, %s5942_s29  ;;  %2492 = vmatpush.msra.mxu2 %v5142_v31  ;;  %v7901_v31 = vld [vmem:[%s5992_s23 + $0x1e8] sm:$0xff] }
 0x262   : > { %2192 = vmatpush.msra.mxu3 %v5112_v25  ;;  %v7890_v30 = vpop.permute.xlu2 %5209  ;;  %5354 = vrot.lane.b32.xlu1 %v5353_v9, %s5943_s15  ;;  %v5373_v14 = vpack.i.bf16 %v7901_v31, %v7898_v20  ;;  %v5106_v9 = vunpack.i.l.bf16 %v7649_v23  ;;  %v4117_v25 = vld [vmem:[%s8928_s1 + $0x128] sm:$0xff] }
 0x263   : > { %5349 = vrot.lane.b32.xlu0 %v5348_v55, %s5942_s29  ;;  %2214 = vmatpush.msra.mxu0 %v5147_v29  ;;  %v5167_v55 = vunpack.i.h.bf16 %v7793_v27 }
 0x264   : > { %2193 = vmatpush.msra.mxu3 %v5111_v26  ;;  %v5160_v13 = vpop.permute.xlu1 %5159  ;;  %v7895_v0 = vpop.permute.xlu0 %5154  ;;  %2493 = vmatpush.msra.mxu2 %v5152_v32  ;;  %v7912_v32 = vld [vmem:[%s5992_s23 + $0xd0] sm:$0xff] }
 0x265   : > { %v5162_v58 = vunpack.i.h.bf16 %v5160_v13  ;;  %v5161_v18 = vunpack.i.l.bf16 %v5160_v13  ;;  %v5157_v29 = vunpack.i.h.bf16 %v7895_v0  ;;  %9222 = vst [vmem:[#allocation31_spill] sm:$0xff] %v7912_v32  ;;  %v5368_v26 = vpack.i.bf16 %v7912_v32, %v7528_v59  ;;  %v7917_v13 = vld [vmem:[%s5992_s23 + $0x108] sm:$0xff]  ;;  %1503 = vmatmul.f32.gmra.mxu1 %v4117_v25 }
 0x266   : > { %2194 = vmatpush.msra.mxu3 %v5107_v53  ;;  %9223 = vst [vmem:[#allocation53_spill] sm:$0xff] %v7917_v13  ;;  %v5363_v23 = vpack.i.bf16 %v7917_v13, %v7639_v57  ;;  %v5101_v53 = vunpack.i.l.bf16 %v7763_v33  ;;  %v5097_v59 = vunpack.i.h.bf16 %v7771_v2  ;;  %v7933_v33 = vld [vmem:[%s5992_s23 + $0x1e0] sm:$0xff]  ;;  %v7947_v13 = vld [vmem:[%s5992_s23 + $0x1b0] sm:$0xff] }
 0x267   : > { %2215 = vmatpush.msra.mxu0 %v5161_v18  ;;  %2494 = vmatpush.msra.mxu2 %v5157_v29  ;;  %v5378_v32 = vpack.i.bf16 %v7670_v11, %v7947_v13 }
 0x268   : > { %2195 = vmatpush.msra.mxu3 %v5106_v9 }
 0x269   : > { %2216 = vmatpush.msra.mxu0 %v5162_v58  ;;  %5374 = vrot.lane.b32.xlu2 %v5373_v14, %s5943_s15  ;;  %v7930_v14 = vld [vmem:[%s5992_s23 + $0x170] sm:$0xff] }
 0x26a   : > { %2196 = vmatpush.msra.mxu3 %v5102_v38  ;;  %v7924_v18 = vpop.permute.xlu2 %5224  ;;  %2495 = vmatpush.msra.mxu2 %v5167_v55  ;;  %v5388_v38 = vpack.i.bf16 %v7933_v33, %v7930_v14  ;;  %v4124_v55 = vld [vmem:[%s8928_s1 + $0x148] sm:$0xff] }
 0x26b   : > { %5369 = vrot.lane.b32.xlu1 %v5368_v26, %s5943_s15  ;;  %5364 = vrot.lane.b32.xlu0 %v5363_v23, %s5942_s29  ;;  %v5096_v26 = vunpack.i.l.bf16 %v7771_v2  ;;  %v5091_v2 = vunpack.i.l.bf16 %v7626_v61  ;;  %v5156_v61 = vunpack.i.l.bf16 %v7895_v0  ;;  %v7978_v0 = vld [vmem:[%s5992_s23 + $0x218] sm:$0xff] }
 0x26c   : > { %2197 = vmatpush.msra.mxu3 %v5101_v53  ;;  %v5175_v9 = vpop.permute.xlu1 %5174  ;;  %v5170_v25 = vpop.permute.xlu0 %5169  ;;  %v7942_v53 = vld [vmem:[%s5992_s23 + $0xc8] sm:$0xff] }
 0x26d   : > { %v5177_v29 = vunpack.i.h.bf16 %v5175_v9  ;;  %v5176_v58 = vunpack.i.l.bf16 %v5175_v9  ;;  %v5172_v23 = vunpack.i.h.bf16 %v5170_v25  ;;  %9224 = vst [vmem:[#allocation30_spill] sm:$0xff] %v7942_v53  ;;  %v5383_v9 = vpack.i.bf16 %v7942_v53, %v7571_v50  ;;  %1828 = vmatmul.f32.vlgmr.msrb.gmra.mxu1 %v4124_v55 }
 0x26e   : > { %2198 = vmatpush.msra.mxu3 %v5097_v59  ;;  %v5197_v50 = vunpack.i.h.bf16 %v7859_v63 }
 0x26f   : > { %2217 = vmatpush.msra.mxu0 %v5176_v58  ;;  %2496 = vmatpush.msra.mxu2 %v5172_v23  ;;  %v5151_v58 = vunpack.i.l.bf16 %v7760_v12 }
 0x270   : > { %2199 = vmatpush.msra.mxu3 %v5096_v26  ;;  %v7975_v26 = vld [vmem:[%s5992_s23 + $0x1a0] sm:$0xff] }
 0x271   : > { %2218 = vmatpush.msra.mxu0 %v5177_v29  ;;  %5389 = vrot.lane.b32.xlu2 %v5388_v38, %s5943_s15  ;;  %v5398_v23 = vpack.i.bf16 %v7975_v26, %v7978_v0 }
 0x272   : > { %2200 = vmatpush.msra.mxu3 %v5092_v5  ;;  %v7956_v59 = vpop.permute.xlu2 %5234  ;;  %v7965_v5 = vld [vmem:[%s5992_s23 + $0xc0] sm:$0xff] }
 0x273   : > { %5384 = vrot.lane.b32.xlu1 %v5383_v9, %s5943_s15  ;;  %5379 = vrot.lane.b32.xlu0 %v5378_v32, %s5942_s29  ;;  %9225 = vst [vmem:[#allocation56_spill] sm:$0xff] %v7965_v5  ;;  %v5403_v12 = vpack.i.bf16 %v7965_v5, %v7605_v48  ;;  %v4128_v32 = vld [vmem:[%s8928_s1 + $0x168] sm:$0xff]  ;;  %v7983_v9 = vld [vmem:[%s5992_s23 + $0x100] sm:$0xff] }
 0x274   : > { %2201 = vmatpush.msra.mxu3 %v5091_v2  ;;  %v7961_v55 = vpop.permute.xlu1 %5189  ;;  %2219 = vmatpush.msra.mxu0 %v5196_v60  ;;  %v5185_v63 = vpop.permute.xlu0 %5184  ;;  %v5166_v60 = vunpack.i.l.bf16 %v7793_v27  ;;  %9226 = vst [vmem:[#allocation33_spill] sm:$0xff] %v7983_v9  ;;  %v7986_v48 = vld [vmem:[%s5992_s23 + $0x1a8] sm:$0xff]  ;;  %v5171_v27 = vunpack.i.l.bf16 %v5170_v25  ;;  %v8000_v25 = vld [vmem:[%s5992_s23 + $0xb8] sm:$0xff]  ;;  %v8015_v5 = vld [vmem:[%s5992_s23 + $0x210] sm:$0xff] }
 0x275   : > { %v5192_v29 = vunpack.i.h.bf16 %v7961_v55  ;;  %v5186_v38 = vunpack.i.l.bf16 %v5185_v63  ;;  %v5393_v2 = vpack.i.bf16 %v7986_v48, %v7983_v9  ;;  %1808 = vmatmul.f32.gmra.mxu0 %v4128_v32  ;;  %v5212_v32 = vunpack.i.h.bf16 %v7890_v30  ;;  %9227 = vst [vmem:[#allocation55_spill] sm:$0xff] %v8000_v25  ;;  %v8012_v9 = vld [vmem:[%s5992_s23 + $0x198] sm:$0xff] }
 0x276   : > { %2514 = vmatpush.msrb.mxu3 %v5151_v58  ;;  %2220 = vmatpush.msra.mxu0 %v5197_v50  ;;  %v5181_v58 = vunpack.i.l.bf16 %v7827_v24  ;;  %9228 = vst [vmem:[#allocation43_spill] sm:$0xff] %v8015_v5  ;;  %v5413_v53 = vpack.i.bf16 %v8012_v9, %v8015_v5 }
 0x277   : > { %2497 = vmatpush.msra.mxu2 %v5186_v38 }
 0x278   : > { %2515 = vmatpush.msrb.mxu3 %v5156_v61 }
 0x279   : > { %5404 = vrot.lane.b32.xlu2 %v5403_v12, %s5943_s15  ;;  %2498 = vmatpush.msra.mxu2 %v5192_v29  ;;  %v5418_v12 = vpack.i.bf16 %v8000_v25, %v7631_v16  ;;  %v4127_v29 = vld [vmem:[%s8928_s1 + $0x160] sm:$0xff]  ;;  %v8020_v16 = vld [vmem:[%s5992_s23 + $0x168] sm:$0xff] }
 0x27a   : > { %2516 = vmatpush.msrb.mxu3 %v5166_v60  ;;  %v7991_v50 = vpop.permute.xlu2 %5249  ;;  %v5408_v25 = vpack.i.bf16 %v7754_v3, %v8020_v16  ;;  %v5453_v3 = vpack.i.bf16 %v7608_v44, %v7694_v37 }
 0x27b   : > { %5399 = vrot.lane.b32.xlu1 %v5398_v23, %s5942_s29  ;;  %5394 = vrot.lane.b32.xlu0 %v5393_v2, %s5942_s29  ;;  %v5187_v23 = vunpack.i.h.bf16 %v5185_v63 }
 0x27c   : > { %2517 = vmatpush.msrb.mxu3 %v5171_v27  ;;  %v5205_v61 = vpop.permute.xlu1 %5204  ;;  %v7997_v60 = vpop.permute.xlu0 %5199  ;;  %v4129_v27 = vld [vmem:[%s8928_s1 + $0x170] sm:$0xff] }
 0x27d   : > { %v5206_v38 = vunpack.i.l.bf16 %v5205_v61  ;;  %v5201_v2 = vunpack.i.l.bf16 %v7997_v60  ;;  %4134 = vmatmul.msk.f32.vlgmr.msrb.gmra.mxu0 %vm605_vm1, %v4127_v29  ;;  %v5207_v63 = vunpack.i.h.bf16 %v5205_v61  ;;  %1831 = vmatmul.f32.gmra.mxu1 %v4129_v27  ;;  %v4136_v27 = vld [vmem:[%s8928_s1 + $0x190] sm:$0xff] }
 0x27e   : > { %2518 = vmatpush.msrb.mxu3 %v5181_v58 }
 0x27f   : > { %2499 = vmatpush.msra.mxu2 %v5206_v38  ;;  %v4130_v38 = vld [vmem:[%s8928_s1 + $0x178] sm:$0xff] }
 0x280   : > { %2519 = vmatpush.msrb.mxu3 %v5187_v23  ;;  %1854 = vmatmul.f32.gmra.mxu2 %v4130_v38  ;;  %v8040_v23 = vld [vmem:[%s5992_s23 + $0x208] sm:$0xff] }
 0x281   : > { %2500 = vmatpush.msra.mxu2 %v5212_v32  ;;  %5419 = vrot.lane.b32.xlu2 %v5418_v12, %s5943_s15  ;;  %v8037_v12 = vld [vmem:[%s5992_s23 + $0x190] sm:$0xff]  ;;  %9229 = vst [vmem:[#allocation32_spill] sm:$0xff] %v8040_v23 }
 0x282   : > { %2520 = vmatpush.msrb.mxu3 %v5201_v2  ;;  %v8026_v58 = vpop.permute.xlu2 %5264 }
 0x283   : > { %5414 = vrot.lane.b32.xlu1 %v5413_v53, %s5942_s29  ;;  %5409 = vrot.lane.b32.xlu0 %v5408_v25, %s5943_s15  ;;  %v5433_v53 = vpack.i.bf16 %v8037_v12, %v8040_v23  ;;  %v4131_v25 = vld [vmem:[%s8928_s1 + $0x180] sm:$0xff] }
 0x284   : > { %2521 = vmatpush.msrb.mxu3 %v5207_v63  ;;  %v8033_v61 = vpop.permute.xlu1 %5219  ;;  %v5215_v29 = vpop.permute.xlu0 %5214  ;;  %v8051_v63 = vld [vmem:[%s5992_s23 + $0x160] sm:$0xff] }
 0x285   : > { %v5221_v32 = vunpack.i.l.bf16 %v8033_v61  ;;  %v5216_v2 = vunpack.i.l.bf16 %v5215_v29  ;;  %1877 = vmatmul.f32.gmra.mxu3 %v4131_v25  ;;  %v5423_v38 = vpack.i.bf16 %v7777_v10, %v8051_v63  ;;  %v5217_v5 = vunpack.i.h.bf16 %v5215_v29  ;;  %2156 = vmatmul.f32.vlgmr.msra.gmra.mxu1 %v4136_v27  ;;  %v4137_v25 = vld [vmem:[%s8928_s1 + $0x198] sm:$0xff]  ;;  %v8063_v10 = vld [vmem:[%s5992_s23 + $0x188] sm:$0xff] }
 0x286   : > { %9230 = vst [vmem:[#allocation46_spill] sm:$0xff] %v8063_v10 }
 0x287   : > { %2522 = vmatpush.msrb.mxu3 %v5221_v32  ;;  %2221 = vmatpush.msra.mxu0 %v5216_v2 }
 0x288   : > { %2179 = vmatmul.f32.vlgmr.msrb.gmra.mxu2 %v4137_v25  ;;  %v8079_v25 = vld [vmem:[%s5992_s23 + $0x158] sm:$0xff] }
 0x289   : > { %5434 = vrot.lane.b32.xlu2 %v5433_v53, %s5942_s29  ;;  %2222 = vmatpush.msra.mxu0 %v5217_v5  ;;  %v5448_v5 = vpack.i.bf16 %v8063_v10, %v7851_v19  ;;  %v4138_v53 = vld [vmem:[%s8928_s1 + $0x1a0] sm:$0xff]  ;;  %v5438_v19 = vpack.i.bf16 %v7574_v21, %v7656_v15  ;;  %v5267_v21 = vunpack.i.h.bf16 %v8026_v58  ;;  %v5266_v15 = vunpack.i.l.bf16 %v8026_v58  ;;  %v8093_v10 = vpop.f32.mrf.mxu2  ;;  %v4143_v58 = vld [vmem:[%s8928_s1 + $0x1c8] sm:$0xff] }
 0x28a   : > { %v5280_v23 = vpop.permute.xlu2 %5279  ;;  %9231 = vst [vmem:[#allocation20_spill] sm:$0xff] %v8093_v10 }
 0x28b   : > { %5429 = vrot.lane.b32.xlu1 %v7548_v41, %s5944_s28  ;;  %5424 = vrot.lane.b32.xlu0 %v5423_v38, %s5943_s15  ;;  %v4132_v41 = vld [vmem:[%s8928_s1 + $0x188] sm:$0xff]  ;;  %v4141_v38 = vld [vmem:[%s8928_s1 + $0x1b8] sm:$0xff] }
 0x28c   : > { %v5230_v32 = vpop.permute.xlu1 %5229  ;;  %v2060_v27 = vpop.permute.xlu0 %2059  ;;  %4135 = vmatmul.msk.f32.gmra.mxu0 %vm605_vm1, %v4132_v41  ;;  %v4142_v41 = vld [vmem:[%s8928_s1 + $0x1c0] sm:$0xff] }
 0x28d   : > { %v5232_v29 = vunpack.i.h.bf16 %v5230_v32  ;;  %v5231_v2 = vunpack.i.l.bf16 %v5230_v32  ;;  %4146 = vmatpush.msk.msrb.mxu1 %vm612_vm0, %v2060_v27  ;;  %v5443_v32 = vpack.i.bf16 %v7810_v6, %v8079_v25  ;;  %2202 = vmatmul.f32.vlgmr.msra.gmra.mxu3 %v4138_v53 }
 0x28e   : > { %2159 = vmatmul.f32.gmra.mxu1 %v4141_v38 }
 0x28f   : > { %2501 = vmatpush.msra.mxu2 %v5231_v2  ;;  %2523 = vmatpush.msrb.mxu3 %v5232_v29 }
 0x290   : > { %2182 = vmatmul.f32.gmra.mxu2 %v4142_v41  ;;  %v5281_v41 = vunpack.i.l.bf16 %v5280_v23 }
 0x291   : > { %5449 = vrot.lane.b32.xlu2 %v5448_v5, %s5942_s29 }
 0x292   : > { %v5295_v27 = vpop.permute.xlu2 %5294 }
 0x293   : > { %5444 = vrot.lane.b32.xlu1 %v5443_v32, %s5943_s15  ;;  %5439 = vrot.lane.b32.xlu0 %v5438_v19, %s5943_s15  ;;  %v8096_v32 = vld [vmem:[%s5992_s23 + $0x150] sm:$0xff]  ;;  %v5296_v10 = vunpack.i.l.bf16 %v5295_v27 }
 0x294   : > { %v5245_v6 = vpop.permute.xlu1 %5244  ;;  %v5240_v53 = vpop.permute.xlu0 %5239  ;;  %v5458_v19 = vpack.i.bf16 %v7882_v46, %v8096_v32 }
 0x295   : > { %v5247_v29 = vunpack.i.h.bf16 %v5245_v6  ;;  %v5246_v2 = vunpack.i.l.bf16 %v5245_v6  ;;  %v5242_v38 = vunpack.i.h.bf16 %v5240_v53  ;;  %v5241_v5 = vunpack.i.l.bf16 %v5240_v53  ;;  %2205 = vmatmul.f32.gmra.mxu3 %v4143_v58 }
 0x296   : > { %v5282_v6 = vunpack.i.h.bf16 %v5280_v23  ;;  %v5297_v53 = vunpack.i.h.bf16 %v5295_v27  ;;  %v5182_v27 = vunpack.i.h.bf16 %v7827_v24  ;;  %v5468_v24 = vpack.i.bf16 %v7634_v8, %v7783_v51 }
 0x297   : > { %2502 = vmatpush.msra.mxu2 %v5246_v2  ;;  %2524 = vmatpush.msrb.mxu3 %v5247_v29  ;;  %v8119_v29 = vpop.f32.mrf.mxu2  ;;  %v5211_v8 = vunpack.i.l.bf16 %v7890_v30  ;;  %v5488_v58 = vpack.i.bf16 %v7697_v62, %v7947_v13  ;;  %v5483_v30 = vpack.i.bf16 %v7679_v36, %v7659_v17  ;;  %v5251_v62 = vunpack.i.l.bf16 %v7991_v50  ;;  %v8161_v17 = vld [vmem:[%s5992_s23 + $0x180] sm:$0xff] }
 0x298   : > { %2223 = vmatpush.msra.mxu0 %v5241_v5  ;;  %2241 = vmatpush.msrb.mxu1 %v5242_v38  ;;  %v5191_v38 = vunpack.i.l.bf16 %v7961_v55 }
 0x299   : > { %2503 = vmatpush.msra.mxu2 %v5266_v15  ;;  %2525 = vmatpush.msrb.mxu3 %v5267_v21  ;;  %v4139_v21 = vld [vmem:[%s8928_s1 + $0x1a8] sm:$0xff] }
 0x29a   : > { %v8105_v43 = vpop.permute.xlu2 %5309  ;;  %5464 = vrot.lane.b32.xlu2 %v7645_v47, %s5944_s28  ;;  %v5478_v47 = vpack.i.bf16 %v7708_v40, %v7898_v20 }
 0x29b   : > { %5459 = vrot.lane.b32.xlu1 %v5458_v19, %s5943_s15  ;;  %5454 = vrot.lane.b32.xlu0 %v5453_v3, %s5943_s15  ;;  %v8122_v3 = vld [vmem:[%s5992_s23 + $0x148] sm:$0xff]  ;;  %v4144_v19 = vld [vmem:[%s8928_s1 + $0x1d0] sm:$0xff] }
 0x29c   : > { %v5260_v44 = vpop.permute.xlu1 %5259  ;;  %2504 = vmatpush.msra.mxu2 %v5281_v41  ;;  %2526 = vmatpush.msrb.mxu3 %v5282_v6  ;;  %v8111_v15 = vpop.permute.xlu0 %5254  ;;  %v5473_v2 = vpack.i.bf16 %v7868_v56, %v8122_v3 }
 0x29d   : > { %v5262_v37 = vunpack.i.h.bf16 %v5260_v44  ;;  %v5261_v23 = vunpack.i.l.bf16 %v5260_v44  ;;  %v8135_v56 = vpop.f32.mrf.mxu1  ;;  %v8146_v41 = vpop.f32.mrf.mxu3 }
 0x29e   : > { %2505 = vmatpush.msra.mxu2 %v5296_v10  ;;  %2527 = vmatpush.msrb.mxu3 %v5297_v53  ;;  %v5202_v10 = vunpack.i.h.bf16 %v7997_v60  ;;  %v5222_v60 = vunpack.i.h.bf16 %v8033_v61  ;;  %v5236_v53 = vunpack.i.l.bf16 %v7956_v59  ;;  %v5311_v61 = vunpack.i.l.bf16 %v8105_v43  ;;  %v8152_v44 = vpop.f32.mrf.mxu0 }
 0x29f   : > { %2224 = vmatpush.msra.mxu0 %v5261_v23  ;;  %2242 = vmatpush.msrb.mxu1 %v5262_v37  ;;  %v8144_v6 = vpop.f32.mrf.mxu2  ;;  %v5312_v37 = vunpack.i.h.bf16 %v8105_v43 }
 0x2a0   : > { %2225 = vmatmul.f32.vlgmr.msra.gmra.mxu0 %v4139_v21 }
 0x2a1   : > { %2537 = vmatpush.msrb.mxu0 %v5182_v27 }
 0x2a2   : > { %v8130_v40 = vpop.permute.xlu2 %5324  ;;  %5479 = vrot.lane.b32.xlu2 %v5478_v47, %s5944_s28 }
 0x2a3   : > { %2538 = vmatpush.msrb.mxu0 %v5191_v38  ;;  %5474 = vrot.lane.b32.xlu1 %v5473_v2, %s5943_s15  ;;  %v5498_v2 = vpack.i.bf16 %v7986_v48, %v7724_v39  ;;  %v5493_v38 = vpack.i.bf16 %v7836_v52, %v7930_v14  ;;  %v5237_v39 = vunpack.i.h.bf16 %v7956_v59  ;;  %v5503_v59 = vpack.i.bf16 %v7786_v1, %v7617_v28 }
 0x2a4   : > { %5469 = vrot.lane.b32.xlu0 %v5468_v24, %s5943_s15  ;;  %v5275_v51 = vpop.permute.xlu1 %5274  ;;  %v5270_v5 = vpop.permute.xlu0 %5269 }
 0x2a5   : > { %2539 = vmatpush.msrb.mxu0 %v5202_v10  ;;  %v5277_v20 = vunpack.i.h.bf16 %v5275_v51  ;;  %v5276_v55 = vunpack.i.l.bf16 %v5275_v51  ;;  %v5271_v36 = vunpack.i.l.bf16 %v5270_v5  ;;  %v8167_v21 = vpop.f32.mrf.mxu1  ;;  %v8175_v10 = vpop.f32.mrf.mxu3  ;;  %v4140_v51 = vld [vmem:[%s8928_s1 + $0x1b0] sm:$0xff] }
 0x2a7   : > { %2540 = vmatpush.msrb.mxu0 %v5211_v8  ;;  %2243 = vmatpush.msrb.mxu1 %v5276_v55  ;;  %v8171_v24 = vpop.f32.mrf.mxu2 }
 0x2a8   : > { %2228 = vmatmul.f32.gmra.mxu0 %v4144_v19 }
 0x2a9   : > { %2541 = vmatpush.msrb.mxu0 %v5222_v60  ;;  %2244 = vmatpush.msrb.mxu1 %v5277_v20  ;;  %v8181_v20 = vpop.f32.mrf.mxu0  ;;  %v5252_v60 = vunpack.i.h.bf16 %v7991_v50  ;;  %v4145_v50 = vld [vmem:[%s8928_s1 + $0x1d8] sm:$0xff] }
 0x2aa   : > { %v8156_v23 = vpop.permute.xlu2 %2410  ;;  %5489 = vrot.lane.b32.xlu2 %v5488_v58, %s5943_s15  ;;  %v5513_v58 = vpack.i.bf16 %v7877_v42, %v8020_v16 }
 0x2ab   : > { %2542 = vmatpush.msrb.mxu0 %v5236_v53  ;;  %5484 = vrot.lane.b32.xlu1 %v5483_v30, %s5943_s15  ;;  %v5272_v53 = vunpack.i.h.bf16 %v5270_v5 }
 0x2ac   : > { %2364 = vrot.lane.b32.xlu0 %v8161_v17, %s5942_s29  ;;  %v8165_v27 = vpop.permute.xlu1 %5289  ;;  %2245 = vmatpush.msrb.mxu1 %v5311_v61  ;;  %v5285_v43 = vpop.permute.xlu0 %5284 }
 0x2ad   : > { %2543 = vmatpush.msrb.mxu0 %v5251_v62  ;;  %v5286_v47 = vunpack.i.l.bf16 %v5285_v43  ;;  %v8189_v14 = vpop.f32.mrf.mxu1  ;;  %v8201_v61 = vpop.f32.mrf.mxu3  ;;  %v5287_v62 = vunpack.i.h.bf16 %v5285_v43 }
 0x2ae   : > { %2246 = vmatpush.msrb.mxu1 %v5312_v37 }
 0x2af   : > { %2544 = vmatpush.msrb.mxu0 %v5271_v36  ;;  %v8195_v30 = vpop.f32.mrf.mxu2 }
 0x2b1   : > { %2545 = vmatpush.msrb.mxu0 %v5286_v47  ;;  %v8207_v42 = vpop.f32.mrf.mxu0  ;;  %v5895_v47 = vld [vmem:[%s5992_s23 + $0x48] sm:$0xff] }
 0x2b2   : > { %v2046_v8 = vpop.permute.xlu2 %2045  ;;  %5499 = vrot.lane.b32.xlu2 %v5498_v2, %s5943_s15  ;;  %v5528_v2 = vpack.i.bf16 %v7742_v54, %v5895_v47  ;;  %v9232_v47 = vld [vmem:[#allocation44_spill] sm:$0xff] }
 0x2b3   : > { %5494 = vrot.lane.b32.xlu1 %v5493_v38, %s5944_s28  ;;  %2247 = vmatpush.msrb.mxu1 %v2046_v8  ;;  %v5523_v8 = vpack.i.bf16 %v7816_v22, %v7639_v57 }
 0x2b4   : > { %2761 = vrot.lane.b32.xlu0 %v7591_v49, %s5943_s15  ;;  %v8187_v52 = vpop.permute.xlu1 %5304  ;;  %v5300_v55 = vpop.permute.xlu0 %5299  ;;  %4147 = vmatmul.msk.f32.vlgmr.msrb.gmra.mxu1 %vm605_vm1, %v4140_v51  ;;  %v5508_v49 = vpack.i.bf16 %v7711_v7, %v7739_v4  ;;  %v5518_v51 = vpack.i.bf16 %v7975_v26, %v7751_v45 }
 0x2b5   : > { %v5301_v19 = vunpack.i.l.bf16 %v5300_v55  ;;  %2560 = vmatpush.msra.mxu1 %v5237_v39  ;;  %v5302_v7 = vunpack.i.h.bf16 %v5300_v55  ;;  %v8213_v1 = vpop.f32.mrf.mxu1  ;;  %v8224_v39 = vpop.f32.mrf.mxu3 }
 0x2b7   : > { %2546 = vmatpush.msrb.mxu0 %v5301_v19  ;;  %2561 = vmatpush.msra.mxu1 %v5252_v60  ;;  %v8218_v38 = vpop.f32.mrf.mxu2 }
 0x2b9   : > { %2562 = vmatpush.msra.mxu1 %v5272_v53  ;;  %v8229_v54 = vpop.f32.mrf.mxu0  ;;  %v5226_v53 = vunpack.i.l.bf16 %v7924_v18 }
 0x2ba   : > { %5514 = vrot.lane.b32.xlu2 %v5513_v58, %s5944_s28 }
 0x2bb   : > { %5509 = vrot.lane.b32.xlu1 %v5508_v49, %s5944_s28  ;;  %v8211_v28 = vpop.permute.xlu2 %5359  ;;  %2563 = vmatpush.msra.mxu1 %v5287_v62  ;;  %v5538_v62 = vpack.i.bf16 %v8012_v9, %v7774_v35 }
 0x2bc   : > { %5504 = vrot.lane.b32.xlu0 %v5503_v59, %s5943_s15  ;;  %v5320_v4 = vpop.permute.xlu1 %5319  ;;  %v5315_v37 = vpop.permute.xlu0 %5314  ;;  %4148 = vmatmul.msk.f32.gmra.mxu1 %vm605_vm1, %v4145_v50  ;;  %v5533_v50 = vpack.i.bf16 %v7901_v31, %v8051_v63  ;;  %v5256_v31 = vunpack.i.l.bf16 %v8111_v15 }
 0x2bd   : > { %v5322_v16 = vunpack.i.h.bf16 %v5320_v4  ;;  %v5321_v5 = vunpack.i.l.bf16 %v5320_v4  ;;  %v5317_v36 = vunpack.i.h.bf16 %v5315_v37  ;;  %v5316_v43 = vunpack.i.l.bf16 %v5315_v37  ;;  %2564 = vmatpush.msra.mxu1 %v5302_v7  ;;  %v8235_v22 = vpop.f32.mrf.mxu1  ;;  %v8247_v4 = vpop.f32.mrf.mxu3 }
 0x2be   : > { %v5361_v7 = vunpack.i.l.bf16 %v8211_v28  ;;  %v5558_v37 = vpack.i.bf16 %v7978_v0, %v8037_v12 }
 0x2bf   : > { %2547 = vmatpush.msrb.mxu0 %v5321_v5  ;;  %2506 = vmatpush.msra.mxu2 %v5316_v43  ;;  %v8239_v59 = vpop.f32.mrf.mxu2  ;;  %v5257_v5 = vunpack.i.h.bf16 %v8111_v15  ;;  %v5553_v43 = vpack.i.bf16 %v7933_v33, %v8079_v25  ;;  %v656_v15 = vadd.f32 %v8135_v56, %v8152_v44  ;;  %v5326_v25 = vunpack.i.l.bf16 %v8130_v40  ;;  %v9234_v56 = vld [vmem:[#allocation20_spill] sm:$0xff] }
 0x2c0   : > { %2528 = vmatpush.msrb.mxu3 %v5317_v36  ;;  %2565 = vmatpush.msra.mxu1 %v5322_v16 }
 0x2c1   : > { %4159 = vmatpush.msk.msrb.mxu2 %vm612_vm0, %v8156_v23  ;;  %v5543_v23 = vpack.i.bf16 %v7819_v34, %v7670_v11  ;;  %v5227_v11 = vunpack.i.h.bf16 %v7924_v18  ;;  %v8251_v34 = vpop.f32.mrf.mxu0  ;;  %v679_v44 = vadd.f32 %v9234_v56, %v656_v15 }
 0x2c2   : > { %5529 = vrot.lane.b32.xlu2 %v5528_v2, %s5944_s28  ;;  %v9233_v2 = vld [vmem:[#allocation41_spill] sm:$0xff] }
 0x2c3   : > { %5524 = vrot.lane.b32.xlu1 %v5523_v8, %s5943_s15  ;;  %v8233_v57 = vpop.permute.xlu2 %5374  ;;  %v5548_v8 = vpack.i.bf16 %v9233_v2, %v9232_v47  ;;  %v9237_v47 = vld [vmem:[#allocation51_spill] sm:$0xff]  ;;  %v9238_v2 = vld [vmem:[#allocation46_spill] sm:$0xff] }
 0x2c4   : > { %5519 = vrot.lane.b32.xlu0 %v5518_v51, %s5943_s15  ;;  %v5335_v45 = vpop.permute.xlu1 %5334  ;;  %v5330_v60 = vpop.permute.xlu0 %5329  ;;  %v5291_v51 = vunpack.i.l.bf16 %v8165_v27 }
 0x2c5   : > { %v5336_v55 = vunpack.i.l.bf16 %v5335_v45  ;;  %v5337_v19 = vunpack.i.h.bf16 %v5335_v45  ;;  %v5332_v58 = vunpack.i.h.bf16 %v5330_v60  ;;  %v5331_v49 = vunpack.i.l.bf16 %v5330_v60  ;;  %v8260_v16 = vpop.f32.mrf.mxu1  ;;  %v8274_v45 = vpop.f32.mrf.mxu3 }
 0x2c7   : > { %2566 = vmatpush.msra.mxu1 %v5336_v55  ;;  %2529 = vmatpush.msrb.mxu3 %v5331_v49  ;;  %v8267_v36 = vpop.f32.mrf.mxu2  ;;  %v5306_v55 = vunpack.i.l.bf16 %v8187_v52  ;;  %v5362_v49 = vunpack.i.h.bf16 %v8211_v28  ;;  %v5573_v28 = vpack.i.bf16 %v9238_v2, %v9237_v47 }
 0x2c8   : > { %2548 = vmatpush.msrb.mxu0 %v5332_v58 }
 0x2c9   : > { %2842 = vmatpush.msra.mxu3 %v5226_v53  ;;  %v8280_v0 = vpop.f32.mrf.mxu0 }
 0x2ca   : > { %2549 = vmatpush.msrb.mxu0 %v5337_v19  ;;  %5544 = vrot.lane.b32.xlu2 %v5543_v23, %s5943_s15 }
 0x2cb   : > { %5539 = vrot.lane.b32.xlu1 %v5538_v62, %s5943_s15  ;;  %v8255_v35 = vpop.permute.xlu2 %5389  ;;  %2843 = vmatpush.msra.mxu3 %v5227_v11 }
 0x2cc   : > { %5534 = vrot.lane.b32.xlu0 %v5533_v50, %s5944_s28  ;;  %v8258_v63 = vpop.permute.xlu1 %5344  ;;  %2550 = vmatpush.msrb.mxu0 %v5361_v7  ;;  %v9235_v7 = vld [vmem:[#allocation52_spill] sm:$0xff] }
 0x2cd   : > { %v8262_v18 = vpop.permute.xlu0 %5339  ;;  %2844 = vmatpush.msra.mxu3 %v5256_v31  ;;  %v8287_v60 = vpop.f32.mrf.mxu1  ;;  %v5568_v11 = vpack.i.bf16 %v9235_v7, %v8096_v32  ;;  %v5896_v31 = vld [vmem:[%s5992_s23 + $0x38] sm:$0xff]  ;;  %v9239_v7 = vld [vmem:[#allocation54_spill] sm:$0xff] }
 0x2ce   : > { %v5341_v23 = vunpack.i.l.bf16 %v8262_v18 }
 0x2cf   : > { %2845 = vmatpush.msra.mxu3 %v5257_v5  ;;  %v8294_v50 = vpop.f32.mrf.mxu2  ;;  %v9236_v5 = vld [vmem:[#allocation34_spill] sm:$0xff] }
 0x2d1   : > { %2846 = vmatpush.msra.mxu3 %v5291_v51  ;;  %v702_v51 = vadd.f32 %v8146_v41, %v679_v44  ;;  %v1478_v15 = vpop.f32.mrf.mxu0  ;;  %v4149_v44 = vld [vmem:[%s8928_s1 + $0x1e0] sm:$0xff] }
 0x2d2   : > { %5559 = vrot.lane.b32.xlu2 %v5558_v37, %s5943_s15  ;;  %v5563_v37 = vpack.i.bf16 %v9236_v5, %v5896_v31  ;;  %2507 = vmatmul.f32.vlgmr.msra.gmra.mxu2 %v4149_v44  ;;  %v9240_v31 = vld [vmem:[#allocation43_spill] sm:$0xff]  ;;  %v9241_v5 = vld [vmem:[#allocation28_spill] sm:$0xff] }
 0x2d3   : > { %5554 = vrot.lane.b32.xlu1 %v5553_v43, %s5944_s28  ;;  %v8284_v33 = vpop.permute.xlu2 %5404  ;;  %2847 = vmatpush.msra.mxu3 %v5306_v55  ;;  %v5347_v43 = vunpack.i.h.bf16 %v8258_v63 }
 0x2d4   : > { %5549 = vrot.lane.b32.xlu0 %v5548_v8, %s5944_s28  ;;  %v8290_v19 = vpop.permute.xlu1 %5354  ;;  %v1455_v8 = vpop.f32.mrf.mxu3 }
 0x2d5   : > { %v5350_v58 = vpop.permute.xlu0 %5349  ;;  %2848 = vmatpush.msra.mxu3 %v5326_v25  ;;  %v8309_v55 = vpop.f32.mrf.mxu1  ;;  %v725_v25 = vadd.f32 %v8144_v6, %v702_v51  ;;  %v5578_v6 = vpack.i.bf16 %v9241_v5, %v9240_v31  ;;  %v9243_v31 = vld [vmem:[#allocation31_spill] sm:$0xff] }
 0x2d6   : > { %v5352_v53 = vunpack.i.h.bf16 %v5350_v58  ;;  %v5351_v62 = vunpack.i.l.bf16 %v5350_v58 }
 0x2d7   : > { %2849 = vmatpush.msra.mxu3 %v5341_v23  ;;  %v756_v51 = vadd.f32 %v8189_v14, %v725_v25 }
 0x2d8   : > { %2567 = vmatpush.msra.mxu1 %v5351_v62  ;;  %2592 = vmatpush.msrb.mxu2 %v5352_v53  ;;  %v8318_v53 = vpop.f32.mrf.mxu2  ;;  %v5897_v62 = vld [vmem:[%s5992_s23 + $0x30] sm:$0xff] }
 0x2d9   : > { %2850 = vmatpush.msra.mxu3 %v5347_v43 }
 0x2da   : > { %2568 = vmatpush.msra.mxu1 %v5362_v49  ;;  %5574 = vrot.lane.b32.xlu2 %v5573_v28, %s5943_s15  ;;  %v659_v28 = vadd.f32 %v8167_v21, %v8181_v20  ;;  %v779_v21 = vadd.f32 %v8195_v30, %v756_v51  ;;  %v5899_v30 = vld [vmem:[%s5992_s23 + $0x140] sm:$0xff] }
 0x2db   : > { %5569 = vrot.lane.b32.xlu1 %v5568_v11, %s5944_s28  ;;  %v8306_v32 = vpop.permute.xlu2 %5419  ;;  %v5583_v11 = vpack.i.bf16 %v9239_v7, %v5897_v62  ;;  %v1128_v7 = vadd.f32 %v8247_v4, %v8239_v59 }
 0x2dc   : > { %5564 = vrot.lane.b32.xlu0 %v5563_v37, %s5944_s28  ;;  %v9242_v37 = vld [vmem:[#allocation7_spill] sm:$0xff]  ;;  %v8326_v47 = vpop.f32.mrf.mxu3  ;;  %v5421_v59 = vunpack.i.l.bf16 %v8306_v32 }
 0x2dd   : > { %v8312_v56 = vpop.permute.xlu1 %5369  ;;  %v5365_v41 = vpop.permute.xlu0 %5364  ;;  %v5588_v43 = vpack.i.bf16 %v9242_v37, %v8122_v3 }
 0x2de   : > { %v5371_v58 = vunpack.i.l.bf16 %v8312_v56  ;;  %v5367_v49 = vunpack.i.h.bf16 %v5365_v41  ;;  %v5366_v23 = vunpack.i.l.bf16 %v5365_v41  ;;  %v8331_v41 = vpop.f32.mrf.mxu0  ;;  %v1501_v3 = vpop.f32.mrf.mxu1 }
 0x2e0   : > { %2551 = vmatpush.msrb.mxu0 %v5367_v49  ;;  %2593 = vmatpush.msrb.mxu2 %v5366_v23  ;;  %v682_v49 = vadd.f32 %v8119_v29, %v659_v28  ;;  %v1524_v62 = vpop.f32.mrf.mxu2  ;;  %v5406_v29 = vunpack.i.l.bf16 %v8284_v33 }
 0x2e1   : > { %2851 = vmatpush.msra.mxu3 %v5371_v58 }
 0x2e2   : > { %5589 = vrot.lane.b32.xlu2 %v5588_v43, %s5944_s28  ;;  %v9245_v43 = vld [vmem:[#allocation29_spill] sm:$0xff]  ;;  %v705_v2 = vadd.f32 %v8175_v10, %v682_v49  ;;  %v5292_v10 = vunpack.i.h.bf16 %v8165_v27 }
 0x2e3   : > { %5584 = vrot.lane.b32.xlu1 %v5583_v11, %s5944_s28  ;;  %v8335_v44 = vpop.permute.xlu2 %5434  ;;  %v5898_v11 = vld [vmem:[%s5992_s23 + $0x28] sm:$0xff]  ;;  %v5603_v28 = vpack.i.bf16 %v9245_v43, %v5899_v30  ;;  %v9247_v30 = vld [vmem:[#allocation53_spill] sm:$0xff] }
 0x2e4   : > { %5579 = vrot.lane.b32.xlu0 %v5578_v6, %s5943_s15  ;;  %v5598_v5 = vpack.i.bf16 %v9243_v31, %v5898_v11  ;;  %v9244_v6 = vld [vmem:[#allocation32_spill] sm:$0xff]  ;;  %v8352_v51 = vpop.f32.mrf.mxu3  ;;  %v1151_v11 = vadd.f32 %v8251_v34, %v1128_v7  ;;  %v9248_v43 = vld [vmem:[#allocation35_spill] sm:$0xff] }
 0x2e5   : > { %v8340_v20 = vpop.permute.xlu1 %5384  ;;  %v5380_v14 = vpop.permute.xlu0 %5379  ;;  %v5593_v37 = vpack.i.bf16 %v9244_v6, %v8161_v17  ;;  %v5900_v6 = vld [vmem:[%s5992_s23 + $0x20] sm:$0xff]  ;;  %v5608_v27 = vpack.i.bf16 %v9248_v43, %v9247_v30 }
 0x2e6   : > { %v5386_v25 = vunpack.i.l.bf16 %v8340_v20  ;;  %v5382_v58 = vunpack.i.h.bf16 %v5380_v14  ;;  %v5381_v23 = vunpack.i.l.bf16 %v5380_v14  ;;  %v802_v14 = vadd.f32 %v8201_v61, %v779_v21  ;;  %v8357_v4 = vpop.f32.mrf.mxu0  ;;  %v8365_v61 = vpop.f32.mrf.mxu1 }
 0x2e7   : > { %v728_v21 = vadd.f32 %v8171_v24, %v705_v2  ;;  %v5901_v24 = vld [vmem:[%s5992_s23 + $0x138] sm:$0xff] }
 0x2e8   : > { %2569 = vmatpush.msra.mxu1 %v5381_v23  ;;  %2594 = vmatpush.msrb.mxu2 %v5382_v58  ;;  %v1479_v58 = vadd.f32 %v1478_v15, %v1455_v8  ;;  %v825_v49 = vadd.f32 %v8207_v42, %v802_v14  ;;  %v1174_v42 = vadd.f32 %v8287_v60, %v1151_v11 }
 0x2e9   : > { %2852 = vmatpush.msra.mxu3 %v5386_v25  ;;  %v5618_v2 = vpack.i.bf16 %v7882_v46, %v5901_v24  ;;  %v4154_v46 = vld [vmem:[%s8928_s1 + $0x208] sm:$0xff]  ;;  %v5903_v24 = vld [vmem:[%s5992_s23 + $0x130] sm:$0xff] }
 0x2ea   : > { %5604 = vrot.lane.b32.xlu2 %v5603_v28, %s5944_s28  ;;  %v1502_v28 = vadd.f32 %v1501_v3, %v1479_v58  ;;  %v1197_v60 = vadd.f32 %v8294_v50, %v1174_v42  ;;  %2510 = vmatmul.f32.gmra.mxu2 %v4154_v46 }
 0x2eb   : > { %5599 = vrot.lane.b32.xlu1 %v5598_v5, %s5944_s28  ;;  %2853 = vmatpush.msra.mxu3 %v5406_v29  ;;  %v8362_v23 = vpop.permute.xlu2 %5449  ;;  %v8370_v5 = vpop.f32.mrf.mxu2 }
 0x2ec   : > { %5594 = vrot.lane.b32.xlu0 %v5593_v37, %s5943_s15  ;;  %v9246_v37 = vld [vmem:[#allocation30_spill] sm:$0xff]  ;;  %v8379_v14 = vpop.f32.mrf.mxu3  ;;  %v1525_v3 = vadd.f32 %v1524_v62, %v1502_v28  ;;  %v5346_v28 = vunpack.i.l.bf16 %v8258_v63 }
 0x2ed   : > { %v5400_v34 = vpop.permute.xlu1 %5399  ;;  %v5395_v25 = vpop.permute.xlu0 %5394  ;;  %2854 = vmatpush.msra.mxu3 %v5421_v59  ;;  %v5613_v29 = vpack.i.bf16 %v9246_v37, %v5900_v6  ;;  %v759_v59 = vadd.f32 %v8213_v1, %v728_v21  ;;  %v5327_v1 = vunpack.i.h.bf16 %v8130_v40  ;;  %v4150_v40 = vld [vmem:[%s8928_s1 + $0x1e8] sm:$0xff] }
 0x2ee   : > { %v5402_v7 = vunpack.i.h.bf16 %v5400_v34  ;;  %v5401_v31 = vunpack.i.l.bf16 %v5400_v34  ;;  %v5397_v8 = vunpack.i.h.bf16 %v5395_v25  ;;  %v5396_v15 = vunpack.i.l.bf16 %v5395_v25  ;;  %2530 = vmatmul.f32.vlgmr.msrb.gmra.mxu3 %v4150_v40 }
 0x2ef   : > { %v5307_v34 = vunpack.i.h.bf16 %v8187_v52  ;;  %v848_v25 = vadd.f32 %v8235_v22, %v825_v49  ;;  %v5342_v22 = vunpack.i.h.bf16 %v8262_v18  ;;  %v782_v58 = vadd.f32 %v8218_v38, %v759_v59 }
 0x2f0   : > { %2552 = vmatpush.msrb.mxu0 %v5396_v15  ;;  %2570 = vmatpush.msra.mxu1 %v5397_v8  ;;  %v5436_v49 = vunpack.i.l.bf16 %v8335_v44  ;;  %v5902_v8 = vld [vmem:[%s5992_s23 + $0x18] sm:$0xff]  ;;  %v9249_v15 = vld [vmem:[#allocation56_spill] sm:$0xff]  ;;  %v1548_v37 = vadd.f32 %v8352_v51, %v1525_v3  ;;  %v5372_v51 = vunpack.i.h.bf16 %v8312_v56  ;;  %v5387_v56 = vunpack.i.h.bf16 %v8340_v20 }
 0x2f1   : > { %2595 = vmatpush.msrb.mxu2 %v5401_v31  ;;  %v1829_v31 = vpop.f32.mrf.mxu1  ;;  %v1202_v38 = vadd.f32 %v1197_v60, %v848_v25  ;;  %v5623_v6 = vpack.i.bf16 %v9249_v15, %v5902_v8  ;;  %v805_v43 = vadd.f32 %v8224_v39, %v782_v58  ;;  %v9250_v39 = vld [vmem:[#allocation33_spill] sm:$0xff]  ;;  %v5407_v20 = vunpack.i.h.bf16 %v8284_v33  ;;  %v5906_v33 = vld [vmem:[%s5992_s23 + $0x10] sm:$0xff] }
 0x2f2   : > { %2865 = vmatpush.msra.mxu0 %v5292_v10  ;;  %2571 = vmatpush.msra.mxu1 %v5402_v7  ;;  %v8394_v11 = vpop.f32.mrf.mxu0  ;;  %v1131_v10 = vadd.f32 %v8274_v45, %v8267_v36  ;;  %v5356_v36 = vunpack.i.l.bf16 %v8290_v19  ;;  %v5451_v45 = vunpack.i.l.bf16 %v8362_v23  ;;  %v5377_v40 = vunpack.i.h.bf16 %v8233_v57 }
 0x2f3   : > { %5614 = vrot.lane.b32.xlu1 %v5613_v29, %s5944_s28  ;;  %5619 = vrot.lane.b32.xlu2 %v5618_v2, %s5944_s28  ;;  %v1852_v18 = vpop.f32.mrf.mxu2  ;;  %v1830_v29 = vadd.f32 %v1829_v31, %v8357_v4  ;;  %v5904_v2 = vld [vmem:[%s5992_s23 + $0x1b8] sm:$0xff]  ;;  %v1553_v63 = vadd.f32 %v1548_v37, %v1202_v38  ;;  %v5907_v31 = vld [vmem:[%s5992_s23 + $0x8] sm:$0xff] }
 0x2f4   : > { %5609 = vrot.lane.b32.xlu0 %v5608_v27, %s5943_s15  ;;  %2866 = vmatpush.msra.mxu0 %v5307_v34  ;;  %v8392_v52 = vpop.permute.xlu2 %5464  ;;  %v1875_v30 = vpop.f32.mrf.mxu3  ;;  %v5437_v27 = vunpack.i.h.bf16 %v8335_v44  ;;  %v1154_v4 = vadd.f32 %v8280_v0, %v1131_v10  ;;  %v5628_v59 = vpack.i.bf16 %v5904_v2, %v5903_v24  ;;  %v5452_v34 = vunpack.i.h.bf16 %v8362_v23  ;;  %v9251_v10 = vld [vmem:[#allocation55_spill] sm:$0xff] }
 0x2f5   : > { %v5415_v50 = vpop.permute.xlu1 %5414  ;;  %v8398_v62 = vpop.permute.xlu0 %5409  ;;  %v1853_v42 = vadd.f32 %v1852_v18, %v1830_v29  ;;  %v1482_v44 = vadd.f32 %v8331_v41, %v8326_v47  ;;  %v5357_v23 = vunpack.i.h.bf16 %v8290_v19  ;;  %v4153_v41 = vld [vmem:[%s8928_s1 + $0x200] sm:$0xff]  ;;  %v5905_v19 = vld [vmem:[%s5992_s23 + $0x128] sm:$0xff]  ;;  %v5908_v18 = vld [vmem:[%s5992_s23 + $0xb0] sm:$0xff] }
 0x2f6   : > { %v5417_v21 = vunpack.i.h.bf16 %v5415_v50  ;;  %v5416_v7 = vunpack.i.l.bf16 %v5415_v50  ;;  %2867 = vmatpush.msra.mxu0 %v5327_v1  ;;  %v828_v1 = vadd.f32 %v8229_v54, %v805_v43  ;;  %v5638_v58 = vpack.i.bf16 %v7947_v13, %v5905_v19  ;;  %v4155_v50 = vld [vmem:[%s8928_s1 + $0x210] sm:$0xff]  ;;  %v5914_v19 = vld [vmem:[%s5992_s23 + $0xa0] sm:$0xff] }
 0x2f7   : > { %v1876_v25 = vadd.f32 %v1875_v30, %v1853_v42  ;;  %v5633_v54 = vpack.i.bf16 %v9251_v10, %v5906_v33  ;;  %v5422_v13 = vunpack.i.h.bf16 %v8306_v32  ;;  %2533 = vmatmul.f32.gmra.mxu3 %v4155_v50  ;;  %v5910_v42 = vld [vmem:[%s5992_s23 + $0xa8] sm:$0xff] }
 0x2f8   : > { %2868 = vmatpush.msra.mxu0 %v5342_v22  ;;  %2596 = vmatpush.msrb.mxu2 %v5416_v7  ;;  %v1177_v22 = vadd.f32 %v8309_v55, %v1154_v4  ;;  %v1505_v55 = vadd.f32 %v8365_v61, %v1482_v44  ;;  %v5392_v7 = vunpack.i.h.bf16 %v8255_v35  ;;  %v5643_v61 = vpack.i.bf16 %v5908_v18, %v5907_v31  ;;  %v5912_v44 = vld [vmem:[%s5992_s23 + $0x118] sm:$0xff]  ;;  %v5918_v31 = vld [vmem:[%s5992_s23 + $0x230] sm:$0xff] }
 0x2f9   : > { %2572 = vmatpush.msra.mxu1 %v5417_v21  ;;  %v4151_v21 = vld [vmem:[%s8928_s1 + $0x1f0] sm:$0xff]  ;;  %v851_v38 = vadd.f32 %v8260_v16, %v828_v1  ;;  %v5913_v1 = vld [vmem:[%s5992_s23 + $0x98] sm:$0xff] }
 0x2fa   : > { %2869 = vmatpush.msra.mxu0 %v5356_v36  ;;  %2597 = vmatpush.msrb.mxu2 %v5436_v49  ;;  %v1898_v60 = vpop.f32.mrf.mxu0  ;;  %v1200_v8 = vadd.f32 %v8318_v53, %v1177_v22  ;;  %v1528_v32 = vadd.f32 %v8370_v5, %v1505_v55  ;;  %v1832_v15 = vpop.f32.mrf.mxu1  ;;  %v5668_v22 = vpack.i.bf16 %v5913_v1, %v8012_v9 }
 0x2fb   : > { %5624 = vrot.lane.b32.xlu1 %v5623_v6, %s5944_s28  ;;  %2573 = vmatpush.msra.mxu1 %v5437_v27  ;;  %v1899_v47 = vadd.f32 %v1898_v60, %v1876_v25  ;;  %v5412_v6 = vunpack.i.h.bf16 %v8398_v62  ;;  %v1833_v37 = vadd.f32 %v1832_v15, %v8394_v11  ;;  %v4158_v11 = vld [vmem:[%s8928_s1 + $0x228] sm:$0xff]  ;;  %v5909_v27 = vld [vmem:[%s5992_s23] sm:$0xff] }
 0x2fc   : > { %2683 = vrot.lane.b32.xlu0 %v9250_v39, %s5943_s15  ;;  %2870 = vmatpush.msra.mxu0 %v5372_v51  ;;  %v8426_v0 = vpop.permute.xlu2 %5479  ;;  %v1203_v43 = vadd.f32 %v1200_v8, %v851_v38  ;;  %v5911_v51 = vld [vmem:[%s5992_s23 + $0x120] sm:$0xff]  ;;  %v1551_v24 = vadd.f32 %v8379_v14, %v1528_v32 }
 0x2fd   : > { %2598 = vmatpush.msrb.mxu2 %v5451_v45  ;;  %v8429_v3 = vpop.permute.xlu1 %5429  ;;  %v8431_v46 = vpop.permute.xlu0 %5424  ;;  %5629 = vrot.lane.b32.xlu2 %v5628_v59, %s5944_s28  ;;  %v8449_v49 = vadd.f32 %v1899_v47, %v1553_v63  ;;  %v5648_v4 = vpack.i.bf16 %v7986_v48, %v5911_v51  ;;  %v5658_v63 = vpack.i.bf16 %v7975_v26, %v5912_v44  ;;  %v5920_v15 = vld [vmem:[%s5992_s23 + $0x100] sm:$0xff]  ;;  %v5926_v44 = vld [vmem:[%s5992_s23 + $0x208] sm:$0xff] }
 0x2fe   : > { %2871 = vmatpush.msra.mxu0 %v5387_v56  ;;  %2574 = vmatpush.msra.mxu1 %v5452_v34  ;;  %v5427_v36 = vunpack.i.h.bf16 %v8431_v46  ;;  %v4156_v34 = vld [vmem:[%s8928_s1 + $0x218] sm:$0xff]  ;;  %v1554_v14 = vadd.f32 %v1551_v24, %v1203_v43  ;;  %v5921_v43 = vld [vmem:[%s5992_s23 + $0x220] sm:$0xff] }
 0x2ff   : > { %2911 = vmatpush.msra.mxu2 %v5346_v28  ;;  %2553 = vmatmul.f32.vlgmr.msrb.gmra.mxu0 %v4151_v21  ;;  %v5653_v28 = vpack.i.bf16 %v5910_v42, %v5909_v27  ;;  %v5916_v21 = vld [vmem:[%s5992_s23 + $0x238] sm:$0x3]  ;;  %v5693_v27 = vpack.i.bf16 %v5921_v43, %v8161_v17  ;;  %v5922_v42 = vld [vmem:[%s5992_s23 + $0x88] sm:$0xff]  ;;  %v5924_v17 = vld [vmem:[%s5992_s23 + $0x80] sm:$0xff] }
 0x300   : > { %2872 = vmatpush.msra.mxu0 %v5407_v20  ;;  %4160 = vmatmul.msk.f32.vlgmr.msrb.gmra.mxu2 %vm605_vm1, %v4153_v41 }
 0x301   : > { %2912 = vmatpush.msra.mxu2 %v5357_v23 }
 0x302   : > { %2873 = vmatpush.msra.mxu0 %v5422_v13 }
 0x303   : > { %2913 = vmatpush.msra.mxu2 %v5377_v40  ;;  %5639 = vrot.lane.b32.xlu1 %v5638_v58, %s5944_s28  ;;  %v1855_v2 = vpop.f32.mrf.mxu2  ;;  %v5915_v58 = vld [vmem:[%s5992_s23 + $0x110] sm:$0xff] }
 0x304   : > { %5634 = vrot.lane.b32.xlu0 %v5633_v54, %s5944_s28  ;;  %v8466_v29 = vpop.permute.xlu2 %5489  ;;  %v1856_v59 = vadd.f32 %v1855_v2, %v1833_v37  ;;  %v5663_v50 = vpack.i.bf16 %v5915_v58, %v5914_v19  ;;  %v5426_v2 = vunpack.i.l.bf16 %v8431_v46 }
 0x305   : > { %2914 = vmatpush.msra.mxu2 %v5392_v7  ;;  %v8468_v16 = vpop.permute.xlu1 %5444  ;;  %v5440_v53 = vpop.permute.xlu0 %5439  ;;  %5644 = vrot.lane.b32.xlu2 %v5643_v61, %s5944_s28  ;;  %v5917_v7 = vld [vmem:[%s5992_s23 + $0x90] sm:$0xff]  ;;  %v5919_v61 = vld [vmem:[%s5992_s23 + $0x108] sm:$0xff]  ;;  %v5491_v8 = vunpack.i.l.bf16 %v8466_v29 }
 0x306   : > { %v5447_v45 = vunpack.i.h.bf16 %v8468_v16  ;;  %v5442_v5 = vunpack.i.h.bf16 %v5440_v53  ;;  %v5441_v30 = vunpack.i.l.bf16 %v5440_v53  ;;  %v5678_v18 = vpack.i.bf16 %v5917_v7, %v5918_v31 }
 0x307   : > { %2915 = vmatpush.msra.mxu2 %v5412_v6  ;;  %2556 = vmatmul.f32.gmra.mxu0 %v4156_v34  ;;  %v5673_v38 = vpack.i.bf16 %v8037_v12, %v5919_v61  ;;  %v9252_v6 = vld [vmem:[#allocation46_spill] sm:$0xff]  ;;  %v4152_v12 = vld [vmem:[%s8928_s1 + $0x1f8] sm:$0xff]  ;;  %v5467_v7 = vunpack.i.h.bf16 %v8392_v52  ;;  %v4162_v61 = vld [vmem:[%s8928_s1 + $0x230] sm:$0xff] }
 0x308   : > { %2855 = vmatpush.msra.mxu3 %v5441_v30  ;;  %2874 = vmatpush.msra.mxu0 %v5442_v5  ;;  %v1878_v39 = vpop.f32.mrf.mxu3  ;;  %v5683_v37 = vpack.i.bf16 %v9252_v6, %v5920_v15  ;;  %v5376_v5 = vunpack.i.l.bf16 %v8233_v57  ;;  %v5411_v57 = vunpack.i.l.bf16 %v8398_v62  ;;  %v5482_v15 = vunpack.i.h.bf16 %v8426_v0 }
 0x309   : > { %2916 = vmatpush.msra.mxu2 %v5427_v36  ;;  %v1879_v48 = vadd.f32 %v1878_v39, %v1856_v59  ;;  %v1901_v25 = vpop.f32.mrf.mxu0  ;;  %v5446_v39 = vunpack.i.l.bf16 %v8468_v16 }
 0x30a   : > { %4161 = vmatmul.msk.f32.gmra.mxu2 %vm605_vm1, %v4158_v11  ;;  %v5492_v11 = vunpack.i.h.bf16 %v8466_v29  ;;  %v5925_v29 = vld [vmem:[%s5992_s23 + $0x218] sm:$0xff] }
 0x30b   : > { %2917 = vmatpush.msra.mxu2 %v5447_v45  ;;  %5654 = vrot.lane.b32.xlu1 %v5653_v28, %s5944_s28  ;;  %v1902_v60 = vadd.f32 %v1901_v25, %v1879_v48  ;;  %v5923_v28 = vld [vmem:[%s5992_s23 + $0x228] sm:$0xff]  ;;  %v5698_v24 = vpack.i.bf16 %v5925_v29, %v5924_v17  ;;  %v5928_v25 = vld [vmem:[%s5992_s23 + $0x200] sm:$0xff] }
 0x30c   : > { %5649 = vrot.lane.b32.xlu0 %v5648_v4, %s5944_s28  ;;  %v8489_v56 = vpop.permute.xlu2 %5499  ;;  %v5688_v51 = vpack.i.bf16 %v5922_v42, %v5923_v28  ;;  %v5391_v4 = vunpack.i.l.bf16 %v8255_v35  ;;  %v4157_v35 = vld [vmem:[%s8928_s1 + $0x220] sm:$0xff]  ;;  %v4163_v28 = vld [vmem:[%s8928_s1 + $0x238] sm:$0xff] }
 0x30d   : > { %v8491_v23 = vpop.permute.xlu1 %5459  ;;  %v5455_v47 = vpop.permute.xlu0 %5454  ;;  %5659 = vrot.lane.b32.xlu2 %v5658_v63, %s5944_s28  ;;  %v8499_v40 = vadd.f32 %v1902_v60, %v1554_v14  ;;  %v5502_v32 = vunpack.i.h.bf16 %v8489_v56  ;;  %v5927_v63 = vld [vmem:[%s5992_s23 + $0x210] sm:$0xff]  ;;  %v5501_v60 = vunpack.i.l.bf16 %v8489_v56  ;;  %v4168_v17 = vld [vmem:[%s8928_s1 + $0x260] sm:$0xff] }
 0x30e   : > { %v5462_v41 = vunpack.i.h.bf16 %v8491_v23  ;;  %v5457_v20 = vunpack.i.h.bf16 %v5455_v47  ;;  %v5456_v26 = vunpack.i.l.bf16 %v5455_v47  ;;  %v5703_v46 = vpack.i.bf16 %v5926_v44, %v5927_v63 }
 0x30f   : > { %v5461_v48 = vunpack.i.l.bf16 %v8491_v23 }
 0x310   : > { %2856 = vmatpush.msra.mxu3 %v5456_v26  ;;  %2875 = vmatpush.msra.mxu0 %v5457_v20 }
 0x311   : > { %2918 = vmatpush.msra.mxu2 %v5462_v41 }
 0x313   : > { %5669 = vrot.lane.b32.xlu1 %v5668_v22, %s5944_s28 }
 0x314   : > { %5664 = vrot.lane.b32.xlu0 %v5663_v50, %s5944_s28  ;;  %v8503_v33 = vpop.permute.xlu2 %5514 }
 0x315   : > { %v8505_v10 = vpop.permute.xlu1 %5474  ;;  %3112 = vrot.lane.b32.xlu2 %v5916_v21, %s5944_s28  ;;  %v5466_v21 = vunpack.i.l.bf16 %v8392_v52 }
 0x316   : > { %v5470_v9 = vpop.permute.xlu0 %5469  ;;  %v5477_v54 = vunpack.i.h.bf16 %v8505_v10  ;;  %v5476_v14 = vunpack.i.l.bf16 %v8505_v10 }
 0x317   : > { %v5472_v55 = vunpack.i.h.bf16 %v5470_v9  ;;  %v5471_v13 = vunpack.i.l.bf16 %v5470_v9  ;;  %v5431_v9 = vunpack.i.l.bf16 %v8429_v3 }
 0x318   : > { %2919 = vmatpush.msra.mxu2 %v5477_v54 }
 0x319   : > { %2857 = vmatpush.msra.mxu3 %v5471_v13  ;;  %2876 = vmatpush.msra.mxu0 %v5472_v55  ;;  %v5432_v55 = vunpack.i.h.bf16 %v8429_v3 }
 0x31a   : > { %2920 = vmatpush.msra.mxu2 %v5491_v8  ;;  %2858 = vmatmul.f32.vlgmr.msra.gmra.mxu3 %v4162_v61 }
 0x31b   : > { %5679 = vrot.lane.b32.xlu1 %v5678_v18, %s5944_s28 }
 0x31c   : > { %5674 = vrot.lane.b32.xlu0 %v5673_v38, %s5944_s28  ;;  %v8523_v53 = vpop.permute.xlu2 %5529  ;;  %2921 = vmatpush.msra.mxu2 %v5502_v32 }
 0x31d   : > { %v5485_v36 = vpop.permute.xlu1 %5484  ;;  %5684 = vrot.lane.b32.xlu2 %v5683_v37, %s5944_s28 }
 0x31e   : > { %v2365_v45 = vpop.permute.xlu0 %2364  ;;  %v5486_v30 = vunpack.i.l.bf16 %v5485_v36  ;;  %v5487_v16 = vunpack.i.h.bf16 %v5485_v36  ;;  %v5531_v36 = vunpack.i.l.bf16 %v8523_v53 }
 0x31f   : > { %2575 = vmatpush.msra.mxu1 %v2365_v45 }
 0x320   : > { %2576 = vmatmul.f32.vlgmr.msra.gmra.mxu1 %v4152_v12  ;;  %2877 = vmatpush.msra.mxu0 %v5486_v30  ;;  %v4167_v30 = vld [vmem:[%s8928_s1 + $0x258] sm:$0xff] }
 0x321   : > { %2888 = vmatpush.msrb.mxu1 %v5376_v5 }
 0x322   : > { %2878 = vmatpush.msra.mxu0 %v5492_v11  ;;  %2861 = vmatmul.f32.gmra.mxu3 %v4167_v30 }
 0x323   : > { %2889 = vmatpush.msrb.mxu1 %v5391_v4  ;;  %5694 = vrot.lane.b32.xlu1 %v5693_v27, %s5944_s28 }
 0x324   : > { %5689 = vrot.lane.b32.xlu0 %v5688_v51, %s5944_s28  ;;  %v8542_v59 = vpop.permute.xlu2 %5544 }
 0x325   : > { %2890 = vmatpush.msrb.mxu1 %v5411_v57  ;;  %v8544_v62 = vpop.permute.xlu1 %5494  ;;  %5699 = vrot.lane.b32.xlu2 %v5698_v24, %s5944_s28  ;;  %v5546_v56 = vunpack.i.l.bf16 %v8542_v59  ;;  %v5547_v8 = vunpack.i.h.bf16 %v8542_v59 }
 0x326   : > { %v2762_v34 = vpop.permute.xlu0 %2761 }
 0x327   : > { %2891 = vmatpush.msrb.mxu1 %v5426_v2  ;;  %4172 = vmatpush.msk.msrb.mxu3 %vm612_vm0, %v2762_v34 }
 0x328   : > { %2579 = vmatmul.f32.gmra.mxu1 %v4157_v35 }
 0x329   : > { %2892 = vmatpush.msrb.mxu1 %v5446_v39 }
 0x32b   : > { %2893 = vmatpush.msrb.mxu1 %v5461_v48  ;;  %3098 = vrot.lane.b32.xlu1 %v5928_v25, %s5944_s28  ;;  %v4165_v48 = vld [vmem:[%s8928_s1 + $0x248] sm:$0xff]  ;;  %v5496_v25 = vunpack.i.l.bf16 %v8544_v62 }
 0x32c   : > { %5704 = vrot.lane.b32.xlu0 %v5703_v46, %s5944_s28  ;;  %v5560_v23 = vpop.permute.xlu2 %5559  ;;  %v5481_v46 = vunpack.i.l.bf16 %v8426_v0 }
 0x32d   : > { %2894 = vmatpush.msrb.mxu1 %v5476_v14  ;;  %v8557_v47 = vpop.permute.xlu1 %5509  ;;  %v5562_v13 = vunpack.i.h.bf16 %v5560_v23  ;;  %v5561_v32 = vunpack.i.l.bf16 %v5560_v23 }
 0x32e   : > { %v5505_v41 = vpop.permute.xlu0 %5504  ;;  %v5511_v37 = vunpack.i.l.bf16 %v8557_v47 }
 0x32f   : > { %v5507_v20 = vunpack.i.h.bf16 %v5505_v41  ;;  %v5506_v26 = vunpack.i.l.bf16 %v5505_v41  ;;  %2895 = vmatpush.msrb.mxu1 %v5487_v16  ;;  %v5516_v16 = vunpack.i.l.bf16 %v8503_v33 }
 0x331   : > { %2896 = vmatpush.msrb.mxu1 %v5501_v60  ;;  %2879 = vmatpush.msra.mxu0 %v5507_v20 }
 0x332   : > { %2943 = vmatpush.msrb.mxu3 %v5506_v26 }
 0x334   : > { %v5575_v54 = vpop.permute.xlu2 %5574 }
 0x335   : > { %v5525_v1 = vpop.permute.xlu1 %5524  ;;  %v5577_v52 = vunpack.i.h.bf16 %v5575_v54  ;;  %v5576_v6 = vunpack.i.l.bf16 %v5575_v54 }
 0x336   : > { %v5520_v22 = vpop.permute.xlu0 %5519  ;;  %v5527_v19 = vunpack.i.h.bf16 %v5525_v1  ;;  %v5526_v58 = vunpack.i.l.bf16 %v5525_v1  ;;  %v5497_v1 = vunpack.i.h.bf16 %v8544_v62 }
 0x337   : > { %v5522_v50 = vunpack.i.h.bf16 %v5520_v22  ;;  %v5521_v10 = vunpack.i.l.bf16 %v5520_v22 }
 0x338   : > { %2880 = vmatpush.msra.mxu0 %v5527_v19  ;;  %2944 = vmatpush.msrb.mxu3 %v5526_v58  ;;  %v4166_v19 = vld [vmem:[%s8928_s1 + $0x250] sm:$0xff]  ;;  %v5517_v58 = vunpack.i.h.bf16 %v8503_v33  ;;  %v4164_v33 = vld [vmem:[%s8928_s1 + $0x240] sm:$0xff] }
 0x339   : > { %2897 = vmatpush.msrb.mxu1 %v5521_v10  ;;  %2922 = vmatpush.msra.mxu2 %v5522_v50  ;;  %v4170_v10 = vld [vmem:[%s8928_s1 + $0x270] sm:$0xff] }
 0x33a   : > { %3193 = vmatpush.msrb.mxu0 %v5431_v9  ;;  %2945 = vmatpush.msrb.mxu3 %v5546_v56 }
 0x33b   : > { %2881 = vmatmul.f32.vlgmr.msra.gmra.mxu0 %v4163_v28 }
 0x33c   : > { %3194 = vmatpush.msrb.mxu0 %v5432_v55  ;;  %2946 = vmatpush.msrb.mxu3 %v5562_v13  ;;  %v8572_v12 = vpop.permute.xlu2 %5589 }
 0x33d   : > { %v5540_v31 = vpop.permute.xlu1 %5539  ;;  %v5591_v56 = vunpack.i.l.bf16 %v8572_v12 }
 0x33e   : > { %v8564_v18 = vpop.permute.xlu0 %5534  ;;  %3195 = vmatpush.msrb.mxu0 %v5466_v21  ;;  %v5542_v38 = vunpack.i.h.bf16 %v5540_v31  ;;  %v5541_v3 = vunpack.i.l.bf16 %v5540_v31  ;;  %v5512_v21 = vunpack.i.h.bf16 %v8557_v47  ;;  %v4171_v47 = vld [vmem:[%s8928_s1 + $0x278] sm:$0xff] }
 0x33f   : > { %v5536_v60 = vunpack.i.l.bf16 %v8564_v18  ;;  %v5537_v9 = vunpack.i.h.bf16 %v8564_v18 }
 0x340   : > { %3196 = vmatpush.msrb.mxu0 %v5467_v7  ;;  %2898 = vmatpush.msrb.mxu1 %v5541_v3 }
 0x341   : > { %2923 = vmatpush.msra.mxu2 %v5542_v38  ;;  %v5532_v38 = vunpack.i.h.bf16 %v8523_v53 }
 0x342   : > { %3197 = vmatpush.msrb.mxu0 %v5482_v15  ;;  %2899 = vmatpush.msrb.mxu1 %v5547_v8 }
 0x343   : > { %2924 = vmatpush.msra.mxu2 %v5561_v32  ;;  %2884 = vmatmul.f32.gmra.mxu0 %v4168_v17  ;;  %v5592_v32 = vunpack.i.h.bf16 %v8572_v12 }
 0x344   : > { %3198 = vmatpush.msrb.mxu0 %v5511_v37  ;;  %2900 = vmatpush.msrb.mxu1 %v5576_v6  ;;  %v8583_v43 = vpop.permute.xlu2 %5604 }
 0x345   : > { %2925 = vmatpush.msra.mxu2 %v5577_v52  ;;  %v8575_v45 = vpop.permute.xlu1 %5554  ;;  %v5606_v54 = vunpack.i.l.bf16 %v8583_v43  ;;  %v5607_v15 = vunpack.i.h.bf16 %v8583_v43  ;;  %v4169_v52 = vld [vmem:[%s8928_s1 + $0x268] sm:$0xff] }
 0x346   : > { %v8577_v5 = vpop.permute.xlu0 %5549  ;;  %3199 = vmatpush.msrb.mxu0 %v5531_v36  ;;  %v5556_v22 = vunpack.i.l.bf16 %v8575_v45  ;;  %v5557_v7 = vunpack.i.h.bf16 %v8575_v45 }
 0x347   : > { %v5551_v11 = vunpack.i.l.bf16 %v8577_v5  ;;  %v5552_v8 = vunpack.i.h.bf16 %v8577_v5 }
 0x349   : > { %3200 = vmatpush.msrb.mxu0 %v5551_v11 }
 0x34d   : > { %v8585_v27 = vpop.permute.xlu1 %5569  ;;  %v8599_v35 = vpop.permute.xlu2 %5619 }
 0x34e   : > { %v8587_v42 = vpop.permute.xlu0 %5564  ;;  %v5571_v50 = vunpack.i.l.bf16 %v8585_v27  ;;  %v5621_v18 = vunpack.i.l.bf16 %v8599_v35  ;;  %v5572_v3 = vunpack.i.h.bf16 %v8585_v27  ;;  %v5622_v45 = vunpack.i.h.bf16 %v8599_v35 }
 0x34f   : > { %v5566_v51 = vunpack.i.l.bf16 %v8587_v42  ;;  %v5567_v53 = vunpack.i.h.bf16 %v8587_v42 }
 0x351   : > { %3201 = vmatpush.msrb.mxu0 %v5566_v51 }
 0x355   : > { %v8593_v4 = vpop.permute.xlu1 %5584 }
 0x356   : > { %v5580_v57 = vpop.permute.xlu0 %5579  ;;  %v5586_v29 = vunpack.i.l.bf16 %v8593_v4  ;;  %v5587_v12 = vunpack.i.h.bf16 %v8593_v4 }
 0x357   : > { %v5582_v24 = vunpack.i.h.bf16 %v5580_v57  ;;  %v5581_v2 = vunpack.i.l.bf16 %v5580_v57  ;;  %v8608_v14 = vpop.permute.xlu2 %5629 }
 0x358   : > { %3202 = vmatpush.msrb.mxu0 %v5586_v29  ;;  %v5631_v61 = vunpack.i.l.bf16 %v8608_v14  ;;  %v5632_v27 = vunpack.i.h.bf16 %v8608_v14 }
 0x359   : > { %2901 = vmatpush.msrb.mxu1 %v5582_v24  ;;  %2947 = vmatpush.msrb.mxu3 %v5581_v2 }
 0x35d   : > { %v8601_v59 = vpop.permute.xlu1 %5599 }
 0x35e   : > { %v5595_v34 = vpop.permute.xlu0 %5594  ;;  %v5601_v39 = vunpack.i.l.bf16 %v8601_v59  ;;  %v5602_v43 = vunpack.i.h.bf16 %v8601_v59 }
 0x35f   : > { %v5597_v44 = vunpack.i.h.bf16 %v5595_v34  ;;  %v5596_v63 = vunpack.i.l.bf16 %v5595_v34  ;;  %v8627_v62 = vpop.permute.xlu2 %5644 }
 0x360   : > { %3203 = vmatpush.msrb.mxu0 %v5601_v39  ;;  %v5646_v11 = vunpack.i.l.bf16 %v8627_v62  ;;  %v5647_v39 = vunpack.i.h.bf16 %v8627_v62 }
 0x361   : > { %2926 = vmatpush.msra.mxu2 %v5596_v63  ;;  %2948 = vmatpush.msrb.mxu3 %v5597_v44  ;;  %v4175_v63 = vld [vmem:[%s8928_s1 + $0x280] sm:$0xff] }
 0x362   : > { %2927 = vmatmul.f32.vlgmr.msra.gmra.mxu2 %v4165_v48 }
 0x363   : > { %3239 = vmatpush.msrb.mxu2 %v5481_v46 }
 0x365   : > { %3240 = vmatpush.msrb.mxu2 %v5496_v25  ;;  %v8613_v41 = vpop.permute.xlu1 %5614 }
 0x366   : > { %v5610_v0 = vpop.permute.xlu0 %5609  ;;  %v5616_v20 = vunpack.i.l.bf16 %v8613_v41  ;;  %v5617_v28 = vunpack.i.h.bf16 %v8613_v41 }
 0x367   : > { %3241 = vmatpush.msrb.mxu2 %v5516_v16  ;;  %v5612_v26 = vunpack.i.h.bf16 %v5610_v0  ;;  %v5611_v23 = vunpack.i.l.bf16 %v5610_v0  ;;  %v5660_v6 = vpop.permute.xlu2 %5659  ;;  %v4180_v0 = vld [vmem:[%s8928_s1 + $0x2a8] sm:$0xff] }
 0x368   : > { %3204 = vmatpush.msrb.mxu0 %v5616_v20  ;;  %v5661_v17 = vunpack.i.l.bf16 %v5660_v6  ;;  %v5662_v59 = vunpack.i.h.bf16 %v5660_v6 }
 0x369   : > { %3242 = vmatpush.msrb.mxu2 %v5536_v60  ;;  %2902 = vmatpush.msrb.mxu1 %v5611_v23 }
 0x36a   : > { %2949 = vmatpush.msrb.mxu3 %v5612_v26  ;;  %2930 = vmatmul.f32.gmra.mxu2 %v4170_v10 }
 0x36b   : > { %3243 = vmatpush.msrb.mxu2 %v5556_v22  ;;  %4173 = vmatmul.msk.f32.vlgmr.msrb.gmra.mxu3 %vm605_vm1, %v4166_v19  ;;  %v3311_v22 = vld [vmem:[%s8929_s2 + $0x8] sm:$0xff]  ;;  %v3310_v19 = vld [vmem:[%s8929_s2] sm:$0xff] }
 0x36c   : > { %3262 = vmatpush.msra.mxu3 %v5497_v1 }
 0x36d   : > { %3244 = vmatpush.msrb.mxu2 %v5571_v50  ;;  %v5625_v55 = vpop.permute.xlu1 %5624 }
 0x36e   : > { %3263 = vmatpush.msra.mxu3 %v5517_v58  ;;  %v2684_v13 = vpop.permute.xlu0 %2683  ;;  %v5626_v31 = vunpack.i.l.bf16 %v5625_v55  ;;  %v5627_v51 = vunpack.i.h.bf16 %v5625_v55 }
 0x36f   : > { %3245 = vmatpush.msrb.mxu2 %v5591_v56  ;;  %2903 = vmatpush.msrb.mxu1 %v2684_v13  ;;  %v3113_v34 = vpop.permute.xlu2 %3112  ;;  %v4177_v56 = vld [vmem:[%s8928_s1 + $0x290] sm:$0xff] }
 0x370   : > { %3264 = vmatpush.msra.mxu3 %v5537_v9  ;;  %2904 = vmatmul.f32.vlgmr.msrb.gmra.mxu1 %v4164_v33  ;;  %v5945_v9 = vmov 0  }
 0x371   : > { %3246 = vmatpush.msrb.mxu2 %v5606_v54  ;;  %3216 = vmatpush.msra.mxu1 %v5512_v21 }
 0x372   : > { %3265 = vmatpush.msra.mxu3 %v5557_v7  ;;  %3205 = vmatpush.msrb.mxu0 %v5626_v31 }
 0x373   : > { %3247 = vmatpush.msrb.mxu2 %v5621_v18  ;;  %3217 = vmatpush.msra.mxu1 %v5532_v38  ;;  %v4178_v18 = vld [vmem:[%s8928_s1 + $0x298] sm:$0xff]  ;;  %v4176_v38 = vld [vmem:[%s8928_s1 + $0x288] sm:$0xff] }
 0x374   : > { %3266 = vmatpush.msra.mxu3 %v5572_v3  ;;  %5709 = vset.pattern.permute.xlu0 %v5945_v9 }
 0x375   : > { %4174 = vmatmul.msk.f32.gmra.mxu3 %vm605_vm1, %v4171_v47  ;;  %3248 = vmatpush.msrb.mxu2 %v5631_v61  ;;  %v5640_v37 = vpop.permute.xlu1 %5639  ;;  %v4182_v47 = vld [vmem:[%s8928_s1 + $0x2b8] sm:$0xff] }
 0x376   : > { %3218 = vmatpush.msra.mxu1 %v5552_v8  ;;  %3267 = vmatpush.msra.mxu3 %v5592_v32  ;;  %v5635_v36 = vpop.permute.xlu0 %5634  ;;  %v5641_v5 = vunpack.i.l.bf16 %v5640_v37  ;;  %v5642_v42 = vunpack.i.h.bf16 %v5640_v37  ;;  %v4179_v37 = vld [vmem:[%s8928_s1 + $0x2a0] sm:$0xff] }
 0x377   : > { %v5636_v30 = vunpack.i.l.bf16 %v5635_v36  ;;  %v5637_v29 = vunpack.i.h.bf16 %v5635_v36  ;;  %v5685_v41 = vpop.permute.xlu2 %5684  ;;  %5708 = vset.pattern.permute.xlu2 %v5945_v9  ;;  %3319 = vperm.xlu0 %5709, %v3311_v22   ;;  %v4184_v36 = vld [vmem:[%s8928_s1 + $0x2c8] sm:$0xff] }
 0x378   : > { %3219 = vmatpush.msra.mxu1 %v5567_v53  ;;  %3268 = vmatpush.msra.mxu3 %v5607_v15  ;;  %v5687_v23 = vunpack.i.h.bf16 %v5685_v41  ;;  %v5686_v1 = vunpack.i.l.bf16 %v5685_v41  ;;  %v4183_v53 = vld [vmem:[%s8928_s1 + $0x2c0] sm:$0xff] }
 0x379   : > { %2907 = vmatmul.f32.gmra.mxu1 %v4169_v52  ;;  %3206 = vmatpush.msrb.mxu0 %v5636_v30  ;;  %v4181_v52 = vld [vmem:[%s8928_s1 + $0x2b0] sm:$0xff]  ;;  %v2226_v30 = vpop.f32.mrf.mxu0 }
 0x37a   : > { %3220 = vmatpush.msra.mxu1 %v5587_v12  ;;  %3269 = vmatpush.msra.mxu3 %v5622_v45  ;;  %v2157_v12 = vpop.f32.mrf.mxu1  ;;  %v2180_v45 = vpop.f32.mrf.mxu2 }
 0x37b   : > { %3249 = vmatpush.msrb.mxu2 %v5641_v5  ;;  %3207 = vmatpush.msrb.mxu0 %v5646_v11  ;;  %v2203_v5 = vpop.f32.mrf.mxu3 }
 0x37c   : > { %3221 = vmatpush.msra.mxu1 %v5602_v43  ;;  %3270 = vmatpush.msra.mxu3 %v5632_v27 }
 0x37d   : > { %v5655_v4 = vpop.permute.xlu1 %5654  ;;  %3314 = vperm.xlu2 %5708, %v3310_v19   ;;  %5750 = vset.pattern.permute.xlu1 %v5945_v9 }
 0x37e   : > { %3222 = vmatpush.msra.mxu1 %v5617_v28  ;;  %3271 = vmatpush.msra.mxu3 %v5642_v42  ;;  %v5650_v57 = vpop.permute.xlu0 %5649  ;;  %v5656_v24 = vunpack.i.l.bf16 %v5655_v4  ;;  %v5657_v44 = vunpack.i.h.bf16 %v5655_v4 }
 0x37f   : > { %v5652_v2 = vunpack.i.h.bf16 %v5650_v57  ;;  %v5651_v35 = vunpack.i.l.bf16 %v5650_v57  ;;  %v5700_v33 = vpop.permute.xlu2 %5699 }
 0x380   : > { %3223 = vmatpush.msra.mxu1 %v5627_v51  ;;  %3208 = vmatpush.msrb.mxu0 %v5656_v24  ;;  %v5701_v31 = vunpack.i.l.bf16 %v5700_v33  ;;  %v5702_v3 = vunpack.i.h.bf16 %v5700_v33 }
 0x381   : > { %3250 = vmatpush.msrb.mxu2 %v5651_v35  ;;  %3272 = vmatpush.msra.mxu3 %v5652_v2  ;;  %v8700_v28 = vpop.f32.mrf.mxu0 }
 0x382   : > { %3224 = vmatpush.msra.mxu1 %v5637_v29  ;;  %4185 = vmatpush.msk.msra.mxu0 %vm612_vm0, %v3113_v34  ;;  %v2160_v11 = vpop.f32.mrf.mxu1  ;;  %v2183_v43 = vpop.f32.mrf.mxu2 }
 0x383   : > { %3251 = vmatpush.msrb.mxu2 %v5661_v17  ;;  %3273 = vmatpush.msra.mxu3 %v5662_v59  ;;  %v8698_v27 = vpop.f32.mrf.mxu3 }
 0x384   : > { %3225 = vmatpush.msra.mxu1 %v5647_v39  ;;  %3209 = vmatmul.f32.vlgmr.msrb.gmra.mxu0 %v4175_v63 }
 0x385   : > { %v5670_v46 = vpop.permute.xlu1 %5669 }
 0x386   : > { %3226 = vmatpush.msra.mxu1 %v5657_v44  ;;  %v5665_v48 = vpop.permute.xlu0 %5664  ;;  %v5672_v14 = vunpack.i.h.bf16 %v5670_v46  ;;  %v5671_v25 = vunpack.i.l.bf16 %v5670_v46  ;;  %v3324_v44 = vlaneseq }
 0x387   : > { %v5667_v16 = vunpack.i.h.bf16 %v5665_v48  ;;  %v5666_v60 = vunpack.i.l.bf16 %v5665_v48 }
 0x388   : > { %3274 = vmatpush.msra.mxu3 %v5671_v25  ;;  %v3329_v48 = vand.u32 127, %v3324_v44  ;;  %v8706_v25 = vshrl.u32 %v3324_v44, 7 }
 0x389   : > { %3227 = vmatpush.msra.mxu1 %v5666_v60  ;;  %3252 = vmatpush.msrb.mxu2 %v5667_v16  ;;  %v2554_v57 = vpop.f32.mrf.mxu0 }
 0x38a   : > { %v2508_v42 = vpop.f32.mrf.mxu2  ;;  %v2249_v51 = vpop.f32.mrf.mxu1  ;;  %v8708_v16 = vmul.u32 2, %v3329_v48  ;;  %v3327_v60 = vadd.s32 16, %v8706_v25 }
 0x38b   : > { %3228 = vmatpush.msra.mxu1 %v5672_v14  ;;  %v2531_v4 = vpop.f32.mrf.mxu3 }
 0x38c   : > { %3212 = vmatmul.f32.gmra.mxu0 %v4180_v0  ;;  %v8712_v41 = vadd.s32 1, %v8708_v16  ;;  %vm3333_vm2 = vcmp.eq.s32.totalorder %v3327_v60, %v8708_v16  ;;  %v3326_v0 = vadd.s32 8, %v8706_v25  ;;  %vm3331_vm6 = vcmp.eq.s32.totalorder %v8706_v25, %v8708_v16 }
 0x38d   : > { %v5680_v20 = vpop.permute.xlu1 %5679 }
 0x38e   : > { %v5675_v26 = vpop.permute.xlu0 %5674  ;;  %v5682_v58 = vunpack.i.h.bf16 %v5680_v20  ;;  %v5681_v50 = vunpack.i.l.bf16 %v5680_v20  ;;  %vm3343_vm3 = vcmp.eq.s32.totalorder %v3327_v60, %v8712_v41  ;;  %vm3332_vm4 = vcmp.eq.s32.totalorder %v3326_v0, %v8708_v16 }
 0x38f   : > { %v5677_v10 = vunpack.i.h.bf16 %v5675_v26  ;;  %v5676_v62 = vunpack.i.l.bf16 %v5675_v26  ;;  %v5946_v26 = vmov 1.0   ;;  %vm3342_vm5 = vcmp.eq.s32.totalorder %v3326_v0, %v8712_v41 }
 0x390   : > { %3229 = vmatpush.msra.mxu1 %v5682_v58  ;;  %3294 = vmatpush.msra.mxu0 %v5681_v50  ;;  %vm3341_vm7 = vcmp.eq.s32.totalorder %v8706_v25, %v8712_v41  ;;  %v2181_v58 = vadd.f32 %v2180_v45, %v2157_v12 }
 0x391   : > { %3253 = vmatpush.msrb.mxu2 %v5676_v62  ;;  %3275 = vmatpush.msra.mxu3 %v5677_v10  ;;  %v2557_v2 = vpop.f32.mrf.mxu0  ;;  %v2532_v62 = vadd.f32 %v2531_v4, %v2508_v42 }
 0x392   : > { %v2511_v17 = vpop.f32.mrf.mxu2  ;;  %v8702_v29 = vpop.f32.mrf.mxu1  ;;  %v2204_v9 = vadd.f32 %v2203_v5, %v2181_v58 }
 0x393   : > { %3254 = vmatpush.msrb.mxu2 %v5686_v1  ;;  %3276 = vmatpush.msra.mxu3 %v5687_v23  ;;  %v2534_v24 = vpop.f32.mrf.mxu3 }
 0x394   : > { %3255 = vmatmul.f32.vlgmr.msrb.gmra.mxu2 %v4177_v56 }
 0x395   : > { %v5695_v54 = vpop.permute.xlu1 %5694  ;;  %4199 = vmatpush.msk.msra.mxu2 %vm3343_vm3, %v5946_v26 }
 0x396   : > { %v5690_v55 = vpop.permute.xlu0 %5689  ;;  %v5696_v13 = vunpack.i.l.bf16 %v5695_v54  ;;  %v5697_v61 = vunpack.i.h.bf16 %v5695_v54  ;;  %v2555_v54 = vadd.f32 %v2554_v57, %v2532_v62 }
 0x397   : > { %v5692_v21 = vunpack.i.h.bf16 %v5690_v55  ;;  %v5691_v7 = vunpack.i.l.bf16 %v5690_v55  ;;  %4200 = vmatpush.msk.msra.mxu2 %vm3342_vm5, %v5946_v26  ;;  %v2227_v55 = vadd.f32 %v2226_v30, %v2204_v9  ;;  %v3901_v9 = vld [vmem:[%s8931_s4 + $0x10] sm:$0xff] }
 0x398   : > { %3277 = vmatpush.msra.mxu3 %v5696_v13  ;;  %v2184_v13 = vadd.f32 %v2183_v43, %v2160_v11 }
 0x399   : > { %3230 = vmatpush.msra.mxu1 %v5692_v21  ;;  %3295 = vmatpush.msra.mxu0 %v5691_v7 }
 0x39a   : > { %3278 = vmatmul.f32.vlgmr.msra.gmra.mxu3 %v4178_v18  ;;  %v2600_v59 = vpop.f32.mrf.mxu2  ;;  %4201 = vmatpush.msk.msra.mxu2 %vm3341_vm7, %v5946_v26 }
 0x39b   : > { %3231 = vmatpush.msra.mxu1 %v5701_v31  ;;  %3296 = vmatpush.msra.mxu0 %v5697_v61 }
 0x39c   : > { %3232 = vmatmul.f32.vlgmr.msra.gmra.mxu1 %v4176_v38  ;;  %3258 = vmatmul.f32.gmra.mxu2 %v4182_v47  ;;  %v2535_v38 = vadd.f32 %v2534_v24, %v2511_v17  ;;  %v2250_v47 = vadd.f32 %v2249_v51, %v2227_v55 }
 0x39d   : > { %3297 = vmatpush.msra.mxu0 %v5702_v3  ;;  %v3099_v6 = vpop.permute.xlu1 %3098  ;;  %v2577_v35 = vpop.f32.mrf.mxu1  ;;  %4285 = vmatpush.msk.msrb.mxu1 %vm3333_vm2, %v5946_v26 }
 0x39e   : > { %v5705_v8 = vpop.permute.xlu0 %5704  ;;  %v2859_v34 = vpop.f32.mrf.mxu3  ;;  %v2578_v61 = vadd.f32 %v2577_v35, %v2555_v54 }
 0x39f   : > { %v5706_v32 = vunpack.i.l.bf16 %v5705_v8  ;;  %v5707_v15 = vunpack.i.h.bf16 %v5705_v8  ;;  %4286 = vmatpush.msk.msrb.mxu1 %vm3332_vm4, %v5946_v26  ;;  %v2207_v8 = vadd.f32 %v8698_v27, %v2184_v13  ;;  %v4224_v13 = vld [vmem:[%s8930_s3 + $0x60] sm:$0xff] }
 0x3a1   : > { %3298 = vmatpush.msra.mxu0 %v5706_v32  ;;  %4287 = vmatpush.msk.msrb.mxu1 %vm3331_vm6, %v5946_v26  ;;  %v2230_v12 = vadd.f32 %v8700_v28, %v2207_v8  ;;  %v4226_v8 = vld [vmem:[%s8930_s3 + $0x70] sm:$0xff] }
 0x3a2   : > { %3281 = vmatmul.f32.gmra.mxu3 %v4183_v53  ;;  %v8704_v46 = vpop.f32.mrf.mxu2 }
 0x3a3   : > { %3299 = vmatpush.msra.mxu0 %v5707_v15  ;;  %v2253_v27 = vadd.f32 %v8702_v29, %v2230_v12 }
 0x3a4   : > { %3235 = vmatmul.f32.gmra.mxu1 %v4181_v52  ;;  %v2601_v52 = vadd.f32 %v2600_v59, %v2578_v61  ;;  %v4216_v61 = vld [vmem:[%s8930_s3 + $0x40] sm:$0xff] }
 0x3a5   : > { %3300 = vmatpush.msra.mxu0 %v3099_v6  ;;  %v2580_v63 = vpop.f32.mrf.mxu1  ;;  %v2558_v6 = vadd.f32 %v2557_v2, %v2535_v38  ;;  %v4225_v38 = vld [vmem:[%s8930_s3 + $0x68] sm:$0xff] }
 0x3a6   : > { %4186 = vmatmul.msk.f32.vlgmr.msra.gmra.mxu0 %vm605_vm1, %v4179_v37  ;;  %v2862_v14 = vpop.f32.mrf.mxu3 }
 0x3a7   : > { %4194 = vmatpush.msk.msrb.mxu0 %vm3333_vm2, %v5946_v26  ;;  %v2581_v43 = vadd.f32 %v2580_v63, %v2558_v6 }
 0x3a9   : > { %4195 = vmatpush.msk.msrb.mxu0 %vm3332_vm4, %v5946_v26  ;;  %v2604_v59 = vadd.f32 %v8704_v46, %v2581_v43 }
 0x3ab   : > { %4196 = vmatpush.msk.msrb.mxu0 %vm3331_vm6, %v5946_v26 }
 0x3ae   : > { %4187 = vmatmul.msk.f32.gmra.mxu0 %vm605_vm1, %v4184_v36  ;;  %v2255_v36 = vadd.f32 %v2250_v47, %v8449_v49  ;;  %v4217_v47 = vld [vmem:[%s8930_s3 + $0x48] sm:$0xff] }
 0x3b0   : > { %v2606_v11 = vadd.f32 %v2601_v52, %v2255_v36  ;;  %v4218_v36 = vld [vmem:[%s8930_s3 + $0x50] sm:$0xff] }
 0x3b8   : > { %v2882_v39 = vpop.f32.mrf.mxu0 }
 0x3b9   : > { %v2883_v56 = vadd.f32 %v2882_v39, %v2859_v34  ;;  %v2256_v39 = vadd.f32 %v2253_v27, %v8499_v40  ;;  %v4219_v27 = vld [vmem:[%s8930_s3 + $0x58] sm:$0xff] }
 0x3bb   : > { %v2607_v48 = vadd.f32 %v2604_v59, %v2256_v39 }
 0x3c0   : > { %v2885_v20 = vpop.f32.mrf.mxu0 }
 0x3c1   : > { %v2886_v53 = vadd.f32 %v2885_v20, %v2862_v14 }
 0x3d7   : > { %v3315_v2 = vpop.permute.xlu2 %3314 }
 0x3e5   : > { %v2928_v1 = vpop.f32.mrf.mxu2 }
 0x3e9   : > { %v3320_v20 = vpop.permute.xlu0 %3319 }
 0x3ed   : > { %v2905_v23 = vpop.f32.mrf.mxu1  ;;  %v2931_v10 = vpop.f32.mrf.mxu2 }
 0x3ee   : > { %v2951_v22 = vpop.f32.mrf.mxu3  ;;  %v2906_v21 = vadd.f32 %v2905_v23, %v2883_v56  ;;  %v3900_v56 = vld [vmem:[%s8931_s4 + $0x8] sm:$0xff] }
 0x3f0   : > { %v2929_v32 = vadd.f32 %v2928_v1, %v2906_v21  ;;  %v3407_v21 = vld [vmem:[%s8930_s3] sm:$0xff] }
 0x3f2   : > { %v2952_v45 = vadd.f32 %v2951_v22, %v2929_v32  ;;  %v3409_v32 = vld [vmem:[%s8930_s3 + $0x10] sm:$0xff] }
 0x3f4   : > { %v2957_v17 = vadd.f32 %v2952_v45, %v2606_v11  ;;  %v4204_v45 = vld [vmem:[%s8930_s3 + $0x20] sm:$0xff] }
 0x3f6   : > { %v2908_v50 = vpop.f32.mrf.mxu1 }
 0x3f7   : > { %v2909_v5 = vadd.f32 %v2908_v50, %v2886_v53 }
 0x3f8   : > { %v2954_v33 = vpop.f32.mrf.mxu3 }
 0x3f9   : > { %v2932_v24 = vadd.f32 %v2931_v10, %v2909_v5  ;;  %v4227_v5 = vld [vmem:[%s8930_s3 + $0x78] sm:$0xff] }
 0x3fb   : > { %v2955_v44 = vadd.f32 %v2954_v33, %v2932_v24  ;;  %v4205_v24 = vld [vmem:[%s8930_s3 + $0x28] sm:$0xff] }
 0x3fd   : > { %v2958_v29 = vadd.f32 %v2955_v44, %v2607_v48  ;;  %v4206_v44 = vld [vmem:[%s8930_s3 + $0x30] sm:$0xff]  ;;  %v4257_v48 = vld [vmem:[%s8930_s3 + $0xe8] sm:$0xff] }
 0x401   : > { %v3210_v19 = vpop.f32.mrf.mxu0 }
 0x409   : > { %v3213_v7 = vpop.f32.mrf.mxu0 }
 0x417   : > { %v3256_v18 = vpop.f32.mrf.mxu2 }
 0x419   : > { %v3233_v31 = vpop.f32.mrf.mxu1 }
 0x41a   : > { %v3234_v3 = vadd.f32 %v3233_v31, %v3210_v19 }
 0x41c   : > { %v3257_v37 = vadd.f32 %v3256_v18, %v3234_v3  ;;  %v3408_v3 = vld [vmem:[%s8930_s3 + $0x8] sm:$0xff] }
 0x41d   : > { %v3279_v15 = vpop.f32.mrf.mxu3 }
 0x41e   : > { %v3280_v42 = vadd.f32 %v3279_v15, %v3257_v37 }
 0x41f   : > { %v3259_v51 = vpop.f32.mrf.mxu2 }
 0x421   : > { %v3236_v30 = vpop.f32.mrf.mxu1 }
 0x422   : > { %v3237_v4 = vadd.f32 %v3236_v30, %v3213_v7  ;;  %v3410_v30 = vld [vmem:[%s8930_s3 + $0x18] sm:$0xff] }
 0x423   : > { %v3302_v57 = vpop.f32.mrf.mxu0 }
 0x424   : > { %v3303_v35 = vadd.f32 %v3302_v57, %v3280_v42  ;;  %v3260_v49 = vadd.f32 %v3259_v51, %v3237_v4 }
 0x425   : > { %v3282_v28 = vpop.f32.mrf.mxu3 }
 0x426   : > { %v3308_v34 = vadd.f32 %v3303_v35, %v2957_v17  ;;  %v3283_v14 = vadd.f32 %v3282_v28, %v3260_v49  ;;  %v4256_v35 = vld [vmem:[%s8930_s3 + $0xe0] sm:$0xff] }
 0x427   : > { %v4248_v28 = vld [vmem:[%s8930_s3 + $0xc0] sm:$0xff] }
 0x428   : > { %v3322_v63 = vadd.f32 %v3315_v2, %v3308_v34 }
 0x42a   : > { %4197 = vmatmul.msk.f32.vlgmr.msrb.gmra.mxu0 %vm3350_vm8, %v3322_v63  ;;  %4202 = vmatmul.msk.f32.vlgmr.msra.gmra.mxu2 %vm3350_vm8, %v3322_v63  ;;  %v4240_v63 = vld [vmem:[%s8930_s3 + $0xa0] sm:$0xff] }
 0x42b   : > { %v3305_v60 = vpop.f32.mrf.mxu0 }
 0x42c   : > { %v3306_v0 = vadd.f32 %v3305_v60, %v3283_v14  ;;  %v4249_v14 = vld [vmem:[%s8930_s3 + $0xc8] sm:$0xff]  ;;  %v4207_v60 = vld [vmem:[%s8930_s3 + $0x38] sm:$0xff] }
 0x42e   : > { %v3309_v26 = vadd.f32 %v3306_v0, %v2958_v29  ;;  %v4241_v29 = vld [vmem:[%s8930_s3 + $0xa8] sm:$0xff]  ;;  %v4258_v0 = vld [vmem:[%s8930_s3 + $0xf0] sm:$0xff] }
 0x430   : > { %v3323_v23 = vadd.f32 %v3320_v20, %v3309_v26  ;;  %v4250_v20 = vld [vmem:[%s8930_s3 + $0xd0] sm:$0xff]  ;;  %v4232_v26 = vld [vmem:[%s8930_s3 + $0x80] sm:$0xff] }
 0x432   : > { %4198 = vmatmul.msk.f32.vlgmr.msrb.gmra.mxu1 %vm3350_vm8, %v3323_v23  ;;  %4203 = vmatmul.msk.f32.gmra.mxu2 %vm3350_vm8, %v3323_v23  ;;  %v4242_v23 = vld [vmem:[%s8930_s3 + $0xb0] sm:$0xff] }
 0x4a7   : > { %v3374_v1 = vpop.f32.mrf.mxu0 }
 0x4ad   : > { %v3397_v46 = vpop.f32.mrf.mxu2 }
 0x4ae   : > { %v3403_v22 = vmax.f32 %v3374_v1, %v3397_v46  ;;  %v4259_v46 = vld [vmem:[%s8930_s3 + $0xf8] sm:$0xff] }
 0x4af   : > { %v3377_v19 = vpop.f32.mrf.mxu1  ;;  %v4251_v1 = vld [vmem:[%s8930_s3 + $0xd8] sm:$0xff] }
 0x4b0   : > { %v3405_v50 = vmax.f32 %v3403_v22, 0.0  ;;  %v4233_v22 = vld [vmem:[%s8930_s3 + $0x88] sm:$0xff] }
 0x4b5   : > { %v3400_v58 = vpop.f32.mrf.mxu2 }
 0x4b6   : > { %v3404_v40 = vmax.f32 %v3377_v19, %v3400_v58  ;;  %v4243_v19 = vld [vmem:[%s8930_s3 + $0xb8] sm:$0xff]  ;;  %v3899_v58 = vld [vmem:[%s8931_s4] sm:$0xff] }
 0x4b8   : > { %v3406_v10 = vmax.f32 %v3404_v40, 0.0  ;;  %v4234_v40 = vld [vmem:[%s8930_s3 + $0x90] sm:$0xff] }
 0x4ba   : > { %3492 = vmatpush.msra.mxu0 %v3406_v10  ;;  %v5730_v62 = vpack.i.bf16 %v3405_v50, %v3406_v10  ;;  %v4235_v10 = vld [vmem:[%s8930_s3 + $0x98] sm:$0xff] }
 0x4bc   : > { %5731 = vrot.lane.b32.xlu0 %v5730_v62, %s5943_s15  ;;  %5716 = vrot.lane.b32.xlu2 %v5730_v62, %s5939_s26 }
 0x4bd   : > { %5711 = vrot.lane.b32.xlu1 %v5730_v62, %s5937_s24  ;;  %3493 = vmatpush.msra.mxu0 %v3405_v50  ;;  %v3902_v50 = vld [vmem:[%s8931_s4 + $0x18] sm:$0xff] }
 0x4be   : > { %4212 = vmatmul.msk.f32.vlgmr.msra.gmra.mxu0 %vm3424_vm9, %v3407_v21 }
 0x4c4   : > { %5746 = vrot.lane.b32.xlu0 %v5730_v62, %s5942_s29  ;;  %5726 = vrot.lane.b32.xlu2 %v5730_v62, %s5938_s25 }
 0x4c5   : > { %5721 = vrot.lane.b32.xlu1 %v5730_v62, %s5940_s30 }
 0x4c6   : > { %4213 = vmatmul.msk.f32.gmra.mxu0 %vm3424_vm9, %v3408_v3 }
 0x4cc   : > { %3915 = vperm.xlu0 %5709, %v3901_v9   ;;  %5741 = vrot.lane.b32.xlu2 %v5730_v62, %s5944_s28  ;;  %v4265_v9 = vld [vmem:[%s8930_s3 + $0x108] sm:$0xff] }
 0x4cd   : > { %5736 = vrot.lane.b32.xlu1 %v5730_v62, %s5941_s8  ;;  %v4264_v62 = vld [vmem:[%s8930_s3 + $0x100] sm:$0xff] }
 0x4ce   : > { %4214 = vmatmul.msk.f32.gmra.mxu0 %vm3424_vm9, %v3409_v32 }
 0x4d4   : > { %3910 = vperm.xlu2 %5708, %v3900_v56   ;;  %v4266_v56 = vld [vmem:[%s8930_s3 + $0x110] sm:$0xff] }
 0x4d5   : > { %3905 = vperm.xlu1 %5750, %v3899_v58  }
 0x4d6   : > { %4215 = vmatmul.msk.f32.gmra.mxu0 %vm3424_vm9, %v3410_v30 }
 0x4dd   : > { %3920 = vperm.xlu1 %5750, %v3902_v50  }
 0x516   : > { %v5717_v33 = vpop.permute.xlu2 %5716 }
 0x517   : > { %v5718_v54 = vunpack.i.l.bf16 %v5717_v33  ;;  %v5719_v55 = vunpack.i.h.bf16 %v5717_v33  ;;  %v4267_v33 = vld [vmem:[%s8930_s3 + $0x118] sm:$0xff] }
 0x519   : > { %3600 = vmatpush.msrb.mxu2 %v5718_v54 }
 0x51b   : > { %3601 = vmatpush.msrb.mxu2 %v5719_v55 }
 0x51c   : > { %4228 = vmatmul.msk.f32.vlgmr.msrb.gmra.mxu2 %vm3424_vm9, %v4224_v13 }
 0x51e   : > { %v5727_v7 = vpop.permute.xlu2 %5726 }
 0x51f   : > { %v5728_v31 = vunpack.i.l.bf16 %v5727_v7  ;;  %v5729_v18 = vunpack.i.h.bf16 %v5727_v7 }
 0x521   : > { %3544 = vmatpush.msra.mxu1 %v5728_v31 }
 0x523   : > { %3545 = vmatpush.msra.mxu1 %v5729_v18  ;;  %v5947_v18 = vmov 0.0  }
 0x524   : > { %4220 = vmatmul.msk.f32.vlgmr.msra.gmra.mxu1 %vm3424_vm9, %v4216_v61  ;;  %4229 = vmatmul.msk.f32.gmra.mxu2 %vm3424_vm9, %v4225_v38  ;;  %v4191_v61 = vsel %vm3341_vm7, 1.0, %v5947_v18  ;;  %v4188_v3 = vsel %vm3331_vm6, 1.0, %v5947_v18 }
 0x526   : > { %v5742_v51 = vpop.permute.xlu2 %5741 }
 0x527   : > { %v5743_v2 = vunpack.i.l.bf16 %v5742_v51  ;;  %v5744_v59 = vunpack.i.h.bf16 %v5742_v51 }
 0x52c   : > { %4221 = vmatmul.msk.f32.gmra.mxu1 %vm3424_vm9, %v4217_v47  ;;  %4230 = vmatmul.msk.f32.gmra.mxu2 %vm3424_vm9, %v4226_v8 }
 0x52e   : > { %v5732_v53 = vpop.permute.xlu0 %5731 }
 0x52f   : > { %v5733_v15 = vunpack.i.l.bf16 %v5732_v53  ;;  %v5712_v52 = vpop.permute.xlu1 %5711  ;;  %v5734_v37 = vunpack.i.h.bf16 %v5732_v53 }
 0x530   : > { %v5713_v6 = vunpack.i.l.bf16 %v5712_v52  ;;  %v5714_v12 = vunpack.i.h.bf16 %v5712_v52 }
 0x531   : > { %3824 = vmatpush.msra.mxu2 %v5733_v15 }
 0x532   : > { %3451 = vmatpush.msrb.mxu3 %v5713_v6 }
 0x533   : > { %3825 = vmatpush.msra.mxu2 %v5734_v37 }
 0x534   : > { %3452 = vmatpush.msrb.mxu3 %v5714_v12  ;;  %4222 = vmatmul.msk.f32.gmra.mxu1 %vm3424_vm9, %v4218_v36 }
 0x535   : > { %4208 = vmatmul.msk.f32.vlgmr.msrb.gmra.mxu3 %vm3424_vm9, %v4204_v45  ;;  %4231 = vmatmul.msk.f32.gmra.mxu2 %vm3424_vm9, %v4227_v5 }
 0x536   : > { %v5747_v11 = vpop.permute.xlu0 %5746 }
 0x537   : > { %v5748_v43 = vunpack.i.l.bf16 %v5747_v11  ;;  %v5722_v42 = vpop.permute.xlu1 %5721  ;;  %v5749_v57 = vunpack.i.h.bf16 %v5747_v11 }
 0x538   : > { %v5723_v4 = vunpack.i.l.bf16 %v5722_v42  ;;  %v5724_v17 = vunpack.i.h.bf16 %v5722_v42 }
 0x539   : > { %3768 = vmatpush.msrb.mxu1 %v5748_v43 }
 0x53a   : > { %3656 = vmatpush.msra.mxu3 %v5723_v4 }
 0x53b   : > { %3769 = vmatpush.msrb.mxu1 %v5749_v57  ;;  %v3495_v55 = vpop.f32.mrf.mxu0 }
 0x53c   : > { %3657 = vmatpush.msra.mxu3 %v5724_v17  ;;  %4223 = vmatmul.msk.f32.gmra.mxu1 %vm3424_vm9, %v4219_v27 }
 0x53d   : > { %4209 = vmatmul.msk.f32.gmra.mxu3 %vm3424_vm9, %v4205_v24  ;;  %4260 = vmatmul.msk.f32.vlgmr.msra.gmra.mxu2 %vm3424_vm9, %v4256_v35 }
 0x53e   : > { %3880 = vmatpush.msrb.mxu3 %v5743_v2  ;;  %4277 = vmatpush.msk.msra.mxu1 %vm3940_vm10, %v4191_v61  ;;  %v3916_v18 = vpop.permute.xlu0 %3915 }
 0x53f   : > { %v5737_v49 = vpop.permute.xlu1 %5736 }
 0x540   : > { %v5738_v34 = vunpack.i.l.bf16 %v5737_v49  ;;  %3881 = vmatpush.msrb.mxu3 %v5744_v59  ;;  %v5739_v39 = vunpack.i.h.bf16 %v5737_v49 }
 0x542   : > { %3712 = vmatpush.msrb.mxu0 %v5738_v34 }
 0x543   : > { %v3498_v38 = vpop.f32.mrf.mxu0 }
 0x544   : > { %3713 = vmatpush.msrb.mxu0 %v5739_v39  ;;  %4252 = vmatmul.msk.f32.vlgmr.msrb.gmra.mxu1 %vm3424_vm9, %v4248_v28 }
 0x545   : > { %4210 = vmatmul.msk.f32.gmra.mxu3 %vm3424_vm9, %v4206_v44  ;;  %4244 = vmatmul.msk.f32.vlgmr.msrb.gmra.mxu0 %vm3424_vm9, %v4240_v63 }
 0x546   : > { %4261 = vmatmul.msk.f32.gmra.mxu2 %vm3424_vm9, %v4257_v48  ;;  %4272 = vmatpush.msk.msra.mxu0 %vm3940_vm10, %v4188_v3 }
 0x54b   : > { %v3501_v53 = vpop.f32.mrf.mxu0 }
 0x54c   : > { %4253 = vmatmul.msk.f32.gmra.mxu1 %vm3424_vm9, %v4249_v14 }
 0x54d   : > { %4211 = vmatmul.msk.f32.gmra.mxu3 %vm3424_vm9, %v4207_v60  ;;  %4245 = vmatmul.msk.f32.gmra.mxu0 %vm3424_vm9, %v4241_v29 }
 0x54e   : > { %4262 = vmatmul.msk.f32.gmra.mxu2 %vm3424_vm9, %v4258_v0  ;;  %v3906_v0 = vpop.permute.xlu1 %3905 }
 0x553   : > { %v3504_v37 = vpop.f32.mrf.mxu0 }
 0x554   : > { %4254 = vmatmul.msk.f32.gmra.mxu1 %vm3424_vm9, %v4250_v20 }
 0x555   : > { %4236 = vmatmul.msk.f32.vlgmr.msra.gmra.mxu3 %vm3424_vm9, %v4232_v26  ;;  %4246 = vmatmul.msk.f32.gmra.mxu0 %vm3424_vm9, %v4242_v23 }
 0x556   : > { %4263 = vmatmul.msk.f32.gmra.mxu2 %vm3424_vm9, %v4259_v46 }
 0x55c   : > { %4255 = vmatmul.msk.f32.gmra.mxu1 %vm3424_vm9, %v4251_v1 }
 0x55d   : > { %4237 = vmatmul.msk.f32.gmra.mxu3 %vm3424_vm9, %v4233_v22  ;;  %4247 = vmatmul.msk.f32.gmra.mxu0 %vm3424_vm9, %v4243_v19 }
 0x565   : > { %4238 = vmatmul.msk.f32.gmra.mxu3 %vm3424_vm9, %v4234_v40 }
 0x56d   : > { %4239 = vmatmul.msk.f32.gmra.mxu3 %vm3424_vm9, %v4235_v10  ;;  %v3911_v10 = vpop.permute.xlu2 %3910 }
 0x575   : > { %4268 = vmatmul.msk.f32.vlgmr.msrb.gmra.mxu3 %vm3424_vm9, %v4264_v62 }
 0x57d   : > { %4269 = vmatmul.msk.f32.gmra.mxu3 %vm3424_vm9, %v4265_v9 }
 0x585   : > { %4270 = vmatmul.msk.f32.gmra.mxu3 %vm3424_vm9, %v4266_v56 }
 0x58d   : > { %4271 = vmatmul.msk.f32.gmra.mxu3 %vm3424_vm9, %v4267_v33 }
 0x59f   : > { %v3603_v7 = vpop.f32.mrf.mxu2 }
 0x5a1   : > { %v3547_v21 = vpop.f32.mrf.mxu1 }
 0x5a7   : > { %v3606_v32 = vpop.f32.mrf.mxu2 }
 0x5a9   : > { %v3550_v47 = vpop.f32.mrf.mxu1 }
 0x5af   : > { %v3609_v6 = vpop.f32.mrf.mxu2 }
 0x5b1   : > { %v3553_v15 = vpop.f32.mrf.mxu1 }
 0x5b8   : > { %v3454_v54 = vpop.f32.mrf.mxu3  ;;  %v3612_v5 = vpop.f32.mrf.mxu2 }
 0x5b9   : > { %v3496_v12 = vadd.f32 %v3495_v55, %v3454_v54  ;;  %v3556_v41 = vpop.f32.mrf.mxu1 }
 0x5bb   : > { %v3559_v45 = vadd.f32 %v3547_v21, %v3496_v12 }
 0x5bd   : > { %v3615_v25 = vadd.f32 %v3603_v7, %v3559_v45 }
 0x5c0   : > { %v3457_v13 = vpop.f32.mrf.mxu3  ;;  %v3827_v51 = vpop.f32.mrf.mxu2 }
 0x5c1   : > { %v3499_v16 = vadd.f32 %v3498_v38, %v3457_v13  ;;  %v3771_v43 = vpop.f32.mrf.mxu1 }
 0x5c2   : > { %v3715_v30 = vpop.f32.mrf.mxu0 }
 0x5c3   : > { %v3560_v4 = vadd.f32 %v3550_v47, %v3499_v16 }
 0x5c5   : > { %v3616_v24 = vadd.f32 %v3606_v32, %v3560_v4 }
 0x5c8   : > { %v3460_v31 = vpop.f32.mrf.mxu3 }
 0x5c9   : > { %v3502_v35 = vadd.f32 %v3501_v53, %v3460_v31  ;;  %v3774_v49 = vpop.f32.mrf.mxu1  ;;  %v3830_v44 = vpop.f32.mrf.mxu2 }
 0x5ca   : > { %v3718_v27 = vpop.f32.mrf.mxu0  ;;  %v3921_v53 = vpop.permute.xlu1 %3920 }
 0x5cb   : > { %v3561_v34 = vadd.f32 %v3553_v15, %v3502_v35 }
 0x5cd   : > { %v3617_v48 = vadd.f32 %v3609_v6, %v3561_v34 }
 0x5d0   : > { %v3463_v8 = vpop.f32.mrf.mxu3 }
 0x5d1   : > { %v3505_v14 = vadd.f32 %v3504_v37, %v3463_v8  ;;  %v3777_v1 = vpop.f32.mrf.mxu1  ;;  %v3833_v62 = vpop.f32.mrf.mxu2 }
 0x5d2   : > { %v3721_v29 = vpop.f32.mrf.mxu0 }
 0x5d3   : > { %v3562_v46 = vadd.f32 %v3556_v41, %v3505_v14 }
 0x5d5   : > { %v3618_v40 = vadd.f32 %v3612_v5, %v3562_v46 }
 0x5d8   : > { %v3659_v52 = vpop.f32.mrf.mxu3 }
 0x5d9   : > { %v3671_v42 = vadd.f32 %v3659_v52, %v3615_v25  ;;  %v3780_v21 = vpop.f32.mrf.mxu1  ;;  %v3836_v3 = vpop.f32.mrf.mxu2 }
 0x5da   : > { %v3724_v54 = vpop.f32.mrf.mxu0 }
 0x5db   : > { %v3727_v57 = vadd.f32 %v3715_v30, %v3671_v42 }
 0x5dd   : > { %v3783_v2 = vadd.f32 %v3771_v43, %v3727_v57 }
 0x5df   : > { %v3839_v28 = vadd.f32 %v3827_v51, %v3783_v2 }
 0x5e0   : > { %v3662_v36 = vpop.f32.mrf.mxu3 }
 0x5e1   : > { %v3672_v59 = vadd.f32 %v3662_v36, %v3616_v24 }
 0x5e3   : > { %v3728_v39 = vadd.f32 %v3718_v27, %v3672_v59 }
 0x5e5   : > { %v3784_v20 = vadd.f32 %v3774_v49, %v3728_v39 }
 0x5e7   : > { %v3840_v22 = vadd.f32 %v3830_v44, %v3784_v20 }
 0x5e8   : > { %v3665_v11 = vpop.f32.mrf.mxu3 }
 0x5e9   : > { %v3673_v26 = vadd.f32 %v3665_v11, %v3617_v48 }
 0x5eb   : > { %v3729_v19 = vadd.f32 %v3721_v29, %v3673_v26 }
 0x5ed   : > { %v3785_v9 = vadd.f32 %v3777_v1, %v3729_v19 }
 0x5ef   : > { %v3841_v55 = vadd.f32 %v3833_v62, %v3785_v9 }
 0x5f0   : > { %v3668_v17 = vpop.f32.mrf.mxu3 }
 0x5f1   : > { %v3674_v56 = vadd.f32 %v3668_v17, %v3618_v40 }
 0x5f3   : > { %v3730_v13 = vadd.f32 %v3724_v54, %v3674_v56 }
 0x5f5   : > { %v3786_v61 = vadd.f32 %v3780_v21, %v3730_v13 }
 0x5f7   : > { %v3842_v47 = vadd.f32 %v3836_v3, %v3786_v61 }
 0x5f8   : > { %v3883_v63 = vpop.f32.mrf.mxu3 }
 0x5f9   : > { %v3895_v60 = vadd.f32 %v3883_v63, %v3839_v28 }
 0x5fb   : > { %v3923_v23 = vadd.f32 %v3906_v0, %v3895_v60 }
 0x5fd   : > { %4273 = vmatmul.msk.f32.vlgmr.msra.gmra.mxu0 %vm3927_vm11, %v3923_v23  ;;  %4278 = vmatmul.msk.f32.vlgmr.msra.gmra.mxu1 %vm3927_vm11, %v3923_v23 }
 0x600   : > { %v3886_v58 = vpop.f32.mrf.mxu3 }
 0x601   : > { %v3896_v50 = vadd.f32 %v3886_v58, %v3840_v22 }
 0x603   : > { %v3924_v33 = vadd.f32 %v3911_v10, %v3896_v50 }
 0x605   : > { %4274 = vmatmul.msk.f32.gmra.mxu0 %vm3927_vm11, %v3924_v33  ;;  %4279 = vmatmul.msk.f32.gmra.mxu1 %vm3927_vm11, %v3924_v33 }
 0x608   : > { %v3889_v7 = vpop.f32.mrf.mxu3 }
 0x609   : > { %v3897_v31 = vadd.f32 %v3889_v7, %v3841_v55 }
 0x60b   : > { %v3925_v38 = vadd.f32 %v3916_v18, %v3897_v31 }
 0x60d   : > { %4275 = vmatmul.msk.f32.gmra.mxu0 %vm3927_vm11, %v3925_v38  ;;  %4280 = vmatmul.msk.f32.gmra.mxu1 %vm3927_vm11, %v3925_v38 }
 0x610   : > { %v3892_v8 = vpop.f32.mrf.mxu3 }
 0x611   : > { %v3898_v32 = vadd.f32 %v3892_v8, %v3842_v47 }
 0x613   : > { %v3926_v15 = vadd.f32 %v3921_v53, %v3898_v32 }
 0x615   : > { %4276 = vmatmul.msk.f32.gmra.mxu0 %vm3927_vm11, %v3926_v15  ;;  %4281 = vmatmul.msk.f32.gmra.mxu1 %vm3927_vm11, %v3926_v15 }
 0x67a   : > { %v3961_v52 = vpop.f32.mrf.mxu0  ;;  %v3993_v6 = vpop.f32.mrf.mxu1 }
 0x67b   : > { %v4005_v37 = vmax.f32 %v3961_v52, %v3993_v6 }
 0x67d   : > { %v4009_v36 = vmax.f32 %v4005_v37, 0.0 }
 0x67f   : > { %4014 = vst.msk [vmem:[%s224_s9] sm:$0xff] %vm4013_vm12, %v4009_v36 }
 0x682   : > { %v3964_v12 = vpop.f32.mrf.mxu0  ;;  %v3996_v41 = vpop.f32.mrf.mxu1 }
 0x683   : > { %v4006_v45 = vmax.f32 %v3964_v12, %v3996_v41 }
 0x685   : > { %v4010_v5 = vmax.f32 %v4006_v45, 0.0 }
 0x687   : > { %4015 = vst.msk [vmem:[%s224_s9 + $0x8] sm:$0xff] %vm4013_vm12, %v4010_v5 }
 0x68a   : > { %v3967_v30 = vpop.f32.mrf.mxu0  ;;  %v3999_v11 = vpop.f32.mrf.mxu1 }
 0x68b   : > { %v4007_v25 = vmax.f32 %v3967_v30, %v3999_v11 }
 0x68d   : > { %v4011_v16 = vmax.f32 %v4007_v25, 0.0 }
 0x68f   : > { %4016 = vst.msk [vmem:[%s224_s9 + $0x10] sm:$0xff] %vm4013_vm12, %v4011_v16 }
 0x692   : > { %v3970_v43 = vpop.f32.mrf.mxu0  ;;  %v4002_v42 = vpop.f32.mrf.mxu1 }
 0x693   : > { %v4008_v4 = vmax.f32 %v3970_v43, %v4002_v42 }
 0x695   : > { %v4012_v51 = vmax.f32 %v4008_v4, 0.0 }
 0x697   : > { %4017 = vst.msk [vmem:[%s224_s9 + $0x18] sm:$0xff] %vm4013_vm12, %v4012_v51 }
 0x698 PF: > { %s15_s18 = sadd.s32 1, %s5935_s18  }
 0x699   : > { %p12_p4 = scmp.ge.s32.totalorder %s15_s18, 4  }
 0x69b   :  { %14 = sbr.rel (!%p12_p4) target bundleno = 1 (0x1), region = 86 }

</bundles_post_ra>
